<compile_context>
chip_gen: v7x
topology: tpu7x:2x2x1
jax: 0.10.0
libtpu: 0.0.40
codegen_flags: <defaults>
</compile_context>

<pallas_src>
import functools

import jax
import jax.numpy as jnp
from jax import lax
from jax.experimental import pallas as pl
from jax.experimental.pallas import tpu as pltpu


# ---------------------------------------------------------------------------
# Fused bottleneck kernel (one row-tile of one image per grid step)
# ---------------------------------------------------------------------------
def _bottleneck_kernel(x_top_ref, x_mid_ref, x_bot_ref,
                       w1_ref, b1_ref, w2_ref, b2_ref, w3_ref, b3_ref,
                       o_ref, t1_ref, *, tile_rows, width, dilation, cmid):
    TH, W, d, P = tile_rows, width, dilation, cmid
    t = pl.program_id(1)
    num_t = pl.num_programs(1)
    f32, bf16 = jnp.float32, jnp.bfloat16

    # Zero the left/right conv2 zero-padding columns of the scratch.  Done
    # every step (only 2*d columns -> cheap) so it stays correct no matter how
    # the "parallel" grid axes are sharded across TensorCores.
    t1_ref[:, 0:d, :] = jnp.zeros((TH + 2 * d, d, P), bf16)
    t1_ref[:, d + W:d + W + d, :] = jnp.zeros((TH + 2 * d, d, P), bf16)

    def conv1(xblk):  # (rows, W, Cin) bf16 -> (rows, W, P) bf16  (1x1 conv+bn1+relu)
        rows, cin = xblk.shape[0], xblk.shape[-1]
        y = jnp.dot(xblk.reshape(rows * W, cin), w1_ref[...],
                    preferred_element_type=f32)
        y = jnp.maximum(y + b1_ref[...], 0.0)
        return y.reshape(rows, W, P).astype(bf16)

    # conv1 results land directly in the zero-bordered scratch (no concats,
    # no intermediate activation round-trips).
    t1_ref[d:d + TH, d:d + W, :] = conv1(x_mid_ref[0])

    @pl.when(t > 0)
    def _():
        t1_ref[0:d, d:d + W, :] = conv1(x_top_ref[0])

    @pl.when(t == 0)      # top halo rows fall outside the image -> zero pad
    def _():
        t1_ref[0:d, d:d + W, :] = jnp.zeros((d, W, P), bf16)

    @pl.when(t < num_t - 1)
    def _():
        t1_ref[d + TH:d + TH + d, d:d + W, :] = conv1(x_bot_ref[0])

    @pl.when(t == num_t - 1)   # bottom halo rows outside the image -> zero pad
    def _():
        t1_ref[d + TH:d + TH + d, d:d + W, :] = jnp.zeros((d, W, P), bf16)

    # conv2 (3x3 dilated) + bn2 + relu : ONE matmul with K = 9*P.
    full = t1_ref[...]                                   # (TH+2d, W+2d, P) bf16
    taps = [full[ky * d:ky * d + TH, kx * d:kx * d + W, :]
            for ky in range(3) for kx in range(3)]
    patch = jnp.concatenate(taps, axis=-1).reshape(TH * W, 9 * P)
    y2 = jnp.dot(patch, w2_ref[...], preferred_element_type=f32)
    y2 = jnp.maximum(y2 + b2_ref[...], 0.0)              # (TH*W, P) f32

    # conv3 (1x1) + bn3 + identity residual (added in f32) + relu.
    cout = o_ref.shape[-1]
    y3 = jnp.dot(y2.astype(bf16), w3_ref[...], preferred_element_type=f32)
    res = x_mid_ref[0].reshape(TH * W, cout).astype(f32)
    out = jnp.maximum(y3 + b3_ref[...] + res, 0.0)
    o_ref[0] = out.reshape(TH, W, cout).astype(o_ref.dtype)


# ---------------------------------------------------------------------------
# Tiling helpers
# ---------------------------------------------------------------------------
def _round_up(x, m):
    return (x + m - 1) // m * m


def _vmem_estimate(th, w, cp, p, d):
    """Rough per-step VMEM footprint (bytes): blocks + scratch + temps + weights."""
    bpe = 2  # bf16
    in_blocks = 2 * (th + 2 * d) * w * cp * bpe     # mid + halo blocks, double-buffered
    out_block = 2 * th * w * cp * bpe
    scratch = (th + 2 * d) * (w + 2 * d) * p * bpe
    patch = th * w * 9 * p * bpe                    # conv2 tap patch
    f32_tmp = th * w * (2 * p + cp) * 4             # conv2/conv3/residual f32 temps
    weights = 2 * (cp * p + 9 * p * p + p * cp) * bpe
    return in_blocks + out_block + scratch + patch + f32_tmp + weights


def _pick_tile_rows(h, w, cp, p, d, target, vmem_budget):
    """Largest row-tile TH that divides H, is a multiple of d, <= target and
    fits the VMEM budget."""
    cands = sorted(r for r in range(1, h + 1) if h % r == 0 and r % d == 0)
    if not cands:
        # H not divisible by the dilation: single full-height tile (both halo
        # blocks fall outside the image and are zeroed in-kernel).
        return h
    best = cands[0]
    for r in cands:
        if r <= max(target, d) and _vmem_estimate(r, w, cp, p, d) <= vmem_budget:
            best = max(best, r)
    return best


# ---------------------------------------------------------------------------
# One-time weight preparation (BN folding, channel padding, tap packing)
# ---------------------------------------------------------------------------
def prepare_weights(params, inplanes, planes, dtype=jnp.bfloat16):
    """Fold inference-mode BN into the conv weights, pad channels to lane-dense
    multiples of 128 and pack the 3x3 taps for the single K=9P conv2 matmul.
    Call once and reuse across forward calls (NOT the hot path)."""
    P = _round_up(planes, 128)
    Cp = _round_up(inplanes, 128)
    f32 = jnp.float32

    w1 = params["w1"] * params["s1"][None, :]
    w1 = jnp.pad(w1, ((0, Cp - inplanes), (0, P - planes))).astype(dtype)
    b1 = jnp.pad(params["b1"], (0, P - planes)).reshape(1, P).astype(f32)

    w2 = params["w2"] * params["s2"][None, None, None, :]            # (3,3,I,O) HWIO
    w2 = jnp.pad(w2, ((0, 0), (0, 0), (0, P - planes), (0, P - planes)))
    w2 = w2.reshape(9 * P, P).astype(dtype)                          # (ky,kx,i) packed
    b2 = jnp.pad(params["b2"], (0, P - planes)).reshape(1, P).astype(f32)

    w3 = params["w3"] * params["s3"][None, :]
    w3 = jnp.pad(w3, ((0, P - planes), (0, Cp - inplanes))).astype(dtype)
    b3 = jnp.pad(params["b3"], (0, Cp - inplanes)).reshape(1, Cp).astype(f32)

    return dict(w1=w1, b1=b1, w2=w2, b2=b2, w3=w3, b3=b3,
                P=P, Cp=Cp, cin=inplanes, planes=planes)


# ---------------------------------------------------------------------------
# Hot-path forward: padded NHWC bf16 in -> padded NHWC bf16 out
# ---------------------------------------------------------------------------
def bottleneck_forward(x_nhwc, w, *, dilation=1, tile_rows=16,
                       out_dtype=jnp.bfloat16, vmem_limit_bytes=48 * 1024 * 1024):
    """x_nhwc: (N, H, W, Cp) bf16 with channels pre-padded to w['Cp'].
    Returns (N, H, W, Cp) `out_dtype` NHWC (channel-padded) so consecutive
    bottleneck blocks chain with zero layout work in between."""
    d = int(dilation)
    N, H, W, Cp = x_nhwc.shape
    P = w["P"]
    if Cp != w["Cp"]:
        raise ValueError("input channels must be pre-padded to w['Cp']")
    if w["cin"] != 4 * w["planes"]:
        raise ValueError("identity residual requires inplanes == 4*planes "
                         "(downsample branch not implemented)")
    assert H >= d and W >= d

    TH = _pick_tile_rows(H, W, Cp, P, d, tile_rows, int(0.75 * vmem_limit_bytes))
    T = H // TH
    thb = max(TH // d, 1)               # halo block-index stride (d-row blocks)
    last_halo = max(H // d - 1, 0)

    kernel = functools.partial(_bottleneck_kernel, tile_rows=TH, width=W,
                               dilation=d, cmid=P)

    return pl.pallas_call(
        kernel,
        out_shape=jax.ShapeDtypeStruct((N, H, W, Cp), out_dtype),
        grid=(N, T),
        in_specs=[
            # d rows just above the tile (clamped at the top of the image)
            pl.BlockSpec((1, d, W, Cp),
                         lambda n, t: (n, jnp.maximum(t * thb - 1, 0), 0, 0)),
            # the tile rows themselves (also the identity residual)
            pl.BlockSpec((1, TH, W, Cp), lambda n, t: (n, t, 0, 0)),
            # d rows just below the tile (clamped at the bottom of the image)
            pl.BlockSpec((1, d, W, Cp),
                         lambda n, t: (n, jnp.minimum((t + 1) * thb, last_halo), 0, 0)),
            pl.BlockSpec((Cp, P), lambda n, t: (0, 0)),        # w1 (BN folded)
            pl.BlockSpec((1, P), lambda n, t: (0, 0)),         # b1
            pl.BlockSpec((9 * P, P), lambda n, t: (0, 0)),     # w2 tap-packed
            pl.BlockSpec((1, P), lambda n, t: (0, 0)),         # b2
            pl.BlockSpec((P, Cp), lambda n, t: (0, 0)),        # w3
            pl.BlockSpec((1, Cp), lambda n, t: (0, 0)),        # b3
        ],
        out_specs=pl.BlockSpec((1, TH, W, Cp), lambda n, t: (n, t, 0, 0)),
        scratch_shapes=[pltpu.VMEM((TH + 2 * d, W + 2 * d, P), jnp.bfloat16)],
        compiler_params=pltpu.CompilerParams(
            dimension_semantics=("parallel", "parallel"),
            vmem_limit_bytes=vmem_limit_bytes),
    )(x_nhwc, x_nhwc, x_nhwc, w["w1"], w["b1"], w["w2"], w["b2"], w["w3"], w["b3"])


# ---------------------------------------------------------------------------
# Boundary-only layout helpers (NOT the hot path)
# ---------------------------------------------------------------------------
def prepare_inputs(x_nchw, cp, dtype=jnp.bfloat16):
    """NCHW f32 -> channel-padded NHWC bf16 (do once at the model boundary)."""
    _, c, _, _ = x_nchw.shape
    x = jnp.transpose(x_nchw, (0, 2, 3, 1)).astype(dtype)
    if cp != c:
        x = jnp.pad(x, ((0, 0), (0, 0), (0, 0), (0, cp - c)))
    return x


def finalize_output(out_nhwc, cin):
    """Channel-padded NHWC -> NCHW f32 (do once at the model boundary)."""
    return jnp.transpose(out_nhwc[..., :cin].astype(jnp.float32), (0, 3, 1, 2))


# ---------------------------------------------------------------------------
# Deterministic parameter construction (inference-mode BN folding)
# ---------------------------------------------------------------------------
def make_params(key, inplanes, planes, dtype=jnp.float32, eps=1e-5):
    keys = jax.random.split(key, 6)

    def bn_fold(k, c):
        kg, kb, km, kv = jax.random.split(k, 4)
        gamma = 1.0 + 0.1 * jax.random.normal(kg, (c,), dtype)
        beta = 0.1 * jax.random.normal(kb, (c,), dtype)
        mean = 0.1 * jax.random.normal(km, (c,), dtype)
        var = jax.random.uniform(kv, (c,), dtype, 0.5, 1.5)
        scale = gamma / jnp.sqrt(var + eps)
        bias = beta - mean * scale
        return scale, bias

    w1 = 0.1 * jax.random.normal(keys[0], (inplanes, planes), dtype)       # (Cin, Cout)
    w2 = 0.1 * jax.random.normal(keys[1], (3, 3, planes, planes), dtype)   # HWIO
    w3 = 0.1 * jax.random.normal(keys[2], (planes, planes * 4), dtype)     # (Cin, Cout)
    s1, b1 = bn_fold(keys[3], planes)
    s2, b2 = bn_fold(keys[4], planes)
    s3, b3 = bn_fold(keys[5], planes * 4)
    return dict(w1=w1, w2=w2, w3=w3, s1=s1, b1=b1, s2=s2, b2=b2, s3=s3, b3=b3)


# ---------------------------------------------------------------------------
# Pure-JAX reference (all f32) for correctness check
# ---------------------------------------------------------------------------
def reference_forward(x_nchw, p, *, dilation=1):
    x = jnp.transpose(x_nchw, (0, 2, 3, 1))
    out = jnp.einsum("nhwc,cd->nhwd", x, p["w1"]) * p["s1"] + p["b1"]
    out = jnp.maximum(out, 0.0)
    out = lax.conv_general_dilated(
        out, p["w2"], window_strides=(1, 1),
        padding=[(dilation, dilation), (dilation, dilation)],
        rhs_dilation=(dilation, dilation),
        dimension_numbers=("NHWC", "HWIO", "NHWC"))
    out = jnp.maximum(out * p["s2"] + p["b2"], 0.0)
    out = jnp.einsum("nhwc,cd->nhwd", out, p["w3"]) * p["s3"] + p["b3"]
    out = jnp.maximum(out + x, 0.0)
    return jnp.transpose(out, (0, 3, 1, 2))


if __name__ == "__main__":
    # identity residual requires inplanes == 4 * planes
    N, inplanes, planes, H, W = 2, 16, 4, 16, 16
    key = jax.random.PRNGKey(0)
    kx_, kp = jax.random.split(key)
    x_nchw = jax.random.normal(kx_, (N, inplanes, H, W), jnp.float32)   # NCHW input
    params = make_params(kp, inplanes, planes)

    w = prepare_weights(params, inplanes, planes)   # once, outside the hot path
    x_nhwc = prepare_inputs(x_nchw, w["Cp"])        # once, outside the hot path

    # (dilation, tile_rows): full-height tile, row-tiled with halos, dilated+tiled.
    for dil, trows in ((1, 16), (1, 4), (2, 4)):
        out = jax.block_until_ready(
            bottleneck_forward(x_nhwc, w, dilation=dil, tile_rows=trows))
        ref = jax.block_until_ready(reference_forward(x_nchw, params, dilation=dil))
        out_nchw = finalize_output(out, inplanes)
        assert out_nchw.shape == (N, inplanes, H, W), out_nchw.shape
        err = float(jnp.max(jnp.abs(out_nchw - ref)))
        # bf16 activations + bf16 MXU operands + bf16 output vs an all-f32 reference
        assert err < 1e-1, (dil, trows, err)
    print("KERNEL_OK")
</pallas_src>

<mosaic_0001>
module attributes {stable_mosaic.version = 11 : i64} {
  func.func @_bottleneck_kernel(%arg0: i32, %arg1: i32, %arg2: memref<1x1x16x128xbf16, #tpu.memory_space<vmem>>, %arg3: memref<1x16x16x128xbf16, #tpu.memory_space<vmem>>, %arg4: memref<1x1x16x128xbf16, #tpu.memory_space<vmem>>, %arg5: memref<128x128xbf16, #tpu.memory_space<vmem>>, %arg6: memref<1x128xf32, #tpu.memory_space<vmem>>, %arg7: memref<1152x128xbf16, #tpu.memory_space<vmem>>, %arg8: memref<1x128xf32, #tpu.memory_space<vmem>>, %arg9: memref<128x128xbf16, #tpu.memory_space<vmem>>, %arg10: memref<1x128xf32, #tpu.memory_space<vmem>>, %arg11: memref<1x16x16x128xbf16, #tpu.memory_space<vmem>>, %arg12: memref<18x18x128xbf16, #tpu.memory_space<vmem>>) attributes {dimension_semantics = [#tpu.dimension_semantics<parallel>, #tpu.dimension_semantics<parallel>], iteration_bounds = array<i64: 2, 1>, scalar_prefetch = 0 : i64, scratch_operands = 1 : i64, tpu.core_type = #tpu.core_type<tc>, window_params = [{transform_indices = @transform_0, window_bounds = array<i64: 1, 1, 16, 128>}, {transform_indices = @transform_1, window_bounds = array<i64: 1, 16, 16, 128>}, {transform_indices = @transform_2, window_bounds = array<i64: 1, 1, 16, 128>}, {pipeline_mode = #tpu.pipeline_mode<synchronous>, transform_indices = @transform_3, window_bounds = array<i64: 128, 128>}, {pipeline_mode = #tpu.pipeline_mode<synchronous>, transform_indices = @transform_4, window_bounds = array<i64: 1, 128>}, {pipeline_mode = #tpu.pipeline_mode<synchronous>, transform_indices = @transform_5, window_bounds = array<i64: 1152, 128>}, {pipeline_mode = #tpu.pipeline_mode<synchronous>, transform_indices = @transform_6, window_bounds = array<i64: 1, 128>}, {pipeline_mode = #tpu.pipeline_mode<synchronous>, transform_indices = @transform_7, window_bounds = array<i64: 128, 128>}, {pipeline_mode = #tpu.pipeline_mode<synchronous>, transform_indices = @transform_8, window_bounds = array<i64: 1, 128>}, {transform_indices = @transform_9, window_bounds = array<i64: 1, 16, 16, 128>}]} {
    %cst = arith.constant 0.000000e+00 : bf16
    %0 = vector.broadcast %cst : bf16 to vector<18x1x128xbf16>
    %c0 = arith.constant 0 : index
    %c0_0 = arith.constant 0 : index
    %c0_1 = arith.constant 0 : index
    %1 = vector.load %arg12[%c0, %c0_0, %c0_1] : memref<18x18x128xbf16, #tpu.memory_space<vmem>>, vector<18x1x128xbf16>
    tpu.vector_store %arg12[%c0, %c0_0, %c0_1], %0 {strides = array<i32>} : memref<18x18x128xbf16, #tpu.memory_space<vmem>>, vector<18x1x128xbf16>,
    %cst_2 = arith.constant 0.000000e+00 : bf16
    %2 = vector.broadcast %cst_2 : bf16 to vector<18x1x128xbf16>
    %c0_3 = arith.constant 0 : index
    %c17 = arith.constant 17 : index
    %c0_4 = arith.constant 0 : index
    %3 = vector.load %arg12[%c0_3, %c17, %c0_4] : memref<18x18x128xbf16, #tpu.memory_space<vmem>>, vector<18x1x128xbf16>
    tpu.vector_store %arg12[%c0_3, %c17, %c0_4], %2 {strides = array<i32>} : memref<18x18x128xbf16, #tpu.memory_space<vmem>>, vector<18x1x128xbf16>,
    %c0_5 = arith.constant 0 : index
    %c0_6 = arith.constant 0 : index
    %c0_7 = arith.constant 0 : index
    %c0_8 = arith.constant 0 : index
    %4 = vector.load %arg3[%c0_5, %c0_6, %c0_7, %c0_8] : memref<1x16x16x128xbf16, #tpu.memory_space<vmem>>, vector<1x16x16x128xbf16>
    %5 = vector.shape_cast %4 : vector<1x16x16x128xbf16> to vector<16x16x128xbf16>
    %6 = vector.shape_cast %5 : vector<16x16x128xbf16> to vector<256x128xbf16>
    %c0_9 = arith.constant 0 : index
    %c0_10 = arith.constant 0 : index
    %7 = vector.load %arg5[%c0_9, %c0_10] : memref<128x128xbf16, #tpu.memory_space<vmem>>, vector<128x128xbf16>
    %cst_11 = arith.constant dense<0.000000e+00> : vector<256x128xf32>
    %8 = tpu.matmul %6, %7, %cst_11 {dimension_numbers = #tpu.dot_dimension_numbers<[1], [0], [0], [1], [0, 0, 1, 1], [], []>} : vector<256x128xbf16>, vector<128x128xbf16>, vector<256x128xf32> -> vector<256x128xf32>
    %c0_12 = arith.constant 0 : index
    %c0_13 = arith.constant 0 : index
    %9 = vector.load %arg6[%c0_12, %c0_13] : memref<1x128xf32, #tpu.memory_space<vmem>>, vector<1x128xf32>
    %10 = vector.broadcast %9 : vector<1x128xf32> to vector<256x128xf32>
    %11 = arith.addf %8, %10 : vector<256x128xf32>
    %cst_14 = arith.constant 0.000000e+00 : f32
    %12 = vector.broadcast %cst_14 : f32 to vector<256x128xf32>
    %13 = arith.maximumf %11, %12 : vector<256x128xf32>
    %14 = vector.shape_cast %13 : vector<256x128xf32> to vector<16x16x128xf32>
    %15 = arith.truncf %14 : vector<16x16x128xf32> to vector<16x16x128xbf16>
    %c1 = arith.constant 1 : index
    %c1_15 = arith.constant 1 : index
    %c0_16 = arith.constant 0 : index
    %16 = vector.load %arg12[%c1, %c1_15, %c0_16] : memref<18x18x128xbf16, #tpu.memory_space<vmem>>, vector<16x16x128xbf16>
    tpu.vector_store %arg12[%c1, %c1_15, %c0_16], %15 {strides = array<i32>} : memref<18x18x128xbf16, #tpu.memory_space<vmem>>, vector<16x16x128xbf16>,
    %c0_i32 = arith.constant 0 : i32
    %17 = arith.cmpi sgt, %arg1, %c0_i32 : i32
    %18 = arith.extui %17 : i1 to i32
    %c0_i32_17 = arith.constant 0 : i32
    %19 = arith.cmpi ne, %18, %c0_i32_17 : i32
    scf.if %19 {
      %c0_47 = arith.constant 0 : index
      %c0_48 = arith.constant 0 : index
      %c0_49 = arith.constant 0 : index
      %c0_50 = arith.constant 0 : index
      %66 = vector.load %arg2[%c0_47, %c0_48, %c0_49, %c0_50] : memref<1x1x16x128xbf16, #tpu.memory_space<vmem>>, vector<1x1x16x128xbf16>
      %67 = vector.shape_cast %66 : vector<1x1x16x128xbf16> to vector<1x16x128xbf16>
      %68 = vector.shape_cast %67 : vector<1x16x128xbf16> to vector<16x128xbf16>
      %c0_51 = arith.constant 0 : index
      %c0_52 = arith.constant 0 : index
      %69 = vector.load %arg5[%c0_51, %c0_52] : memref<128x128xbf16, #tpu.memory_space<vmem>>, vector<128x128xbf16>
      %cst_53 = arith.constant dense<0.000000e+00> : vector<16x128xf32>
      %70 = tpu.matmul %68, %69, %cst_53 {dimension_numbers = #tpu.dot_dimension_numbers<[1], [0], [0], [1], [0, 0, 1, 1], [], []>} : vector<16x128xbf16>, vector<128x128xbf16>, vector<16x128xf32> -> vector<16x128xf32>
      %c0_54 = arith.constant 0 : index
      %c0_55 = arith.constant 0 : index
      %71 = vector.load %arg6[%c0_54, %c0_55] : memref<1x128xf32, #tpu.memory_space<vmem>>, vector<1x128xf32>
      %72 = vector.broadcast %71 : vector<1x128xf32> to vector<16x128xf32>
      %73 = arith.addf %70, %72 : vector<16x128xf32>
      %cst_56 = arith.constant 0.000000e+00 : f32
      %74 = vector.broadcast %cst_56 : f32 to vector<16x128xf32>
      %75 = arith.maximumf %73, %74 : vector<16x128xf32>
      %76 = vector.shape_cast %75 : vector<16x128xf32> to vector<1x16x128xf32>
      %77 = arith.truncf %76 : vector<1x16x128xf32> to vector<1x16x128xbf16>
      %c0_57 = arith.constant 0 : index
      %c1_58 = arith.constant 1 : index
      %c0_59 = arith.constant 0 : index
      %78 = vector.load %arg12[%c0_57, %c1_58, %c0_59] : memref<18x18x128xbf16, #tpu.memory_space<vmem>>, vector<1x16x128xbf16>
      tpu.vector_store %arg12[%c0_57, %c1_58, %c0_59], %77 {strides = array<i32>} : memref<18x18x128xbf16, #tpu.memory_space<vmem>>, vector<1x16x128xbf16>,
    } else {
    }
    %c0_i32_18 = arith.constant 0 : i32
    %20 = arith.cmpi eq, %arg1, %c0_i32_18 : i32
    %21 = arith.extui %20 : i1 to i32
    %c0_i32_19 = arith.constant 0 : i32
    %22 = arith.cmpi ne, %21, %c0_i32_19 : i32
    scf.if %22 {
      %cst_47 = arith.constant 0.000000e+00 : bf16
      %66 = vector.broadcast %cst_47 : bf16 to vector<1x16x128xbf16>
      %c0_48 = arith.constant 0 : index
      %c1_49 = arith.constant 1 : index
      %c0_50 = arith.constant 0 : index
      %67 = vector.load %arg12[%c0_48, %c1_49, %c0_50] : memref<18x18x128xbf16, #tpu.memory_space<vmem>>, vector<1x16x128xbf16>
      tpu.vector_store %arg12[%c0_48, %c1_49, %c0_50], %66 {strides = array<i32>} : memref<18x18x128xbf16, #tpu.memory_space<vmem>>, vector<1x16x128xbf16>,
    } else {
    }
    %c0_i32_20 = arith.constant 0 : i32
    %23 = arith.cmpi slt, %arg1, %c0_i32_20 : i32
    %24 = arith.extui %23 : i1 to i32
    %c0_i32_21 = arith.constant 0 : i32
    %25 = arith.cmpi ne, %24, %c0_i32_21 : i32
    scf.if %25 {
      %c0_47 = arith.constant 0 : index
      %c0_48 = arith.constant 0 : index
      %c0_49 = arith.constant 0 : index
      %c0_50 = arith.constant 0 : index
      %66 = vector.load %arg4[%c0_47, %c0_48, %c0_49, %c0_50] : memref<1x1x16x128xbf16, #tpu.memory_space<vmem>>, vector<1x1x16x128xbf16>
      %67 = vector.shape_cast %66 : vector<1x1x16x128xbf16> to vector<1x16x128xbf16>
      %68 = vector.shape_cast %67 : vector<1x16x128xbf16> to vector<16x128xbf16>
      %c0_51 = arith.constant 0 : index
      %c0_52 = arith.constant 0 : index
      %69 = vector.load %arg5[%c0_51, %c0_52] : memref<128x128xbf16, #tpu.memory_space<vmem>>, vector<128x128xbf16>
      %cst_53 = arith.constant dense<0.000000e+00> : vector<16x128xf32>
      %70 = tpu.matmul %68, %69, %cst_53 {dimension_numbers = #tpu.dot_dimension_numbers<[1], [0], [0], [1], [0, 0, 1, 1], [], []>} : vector<16x128xbf16>, vector<128x128xbf16>, vector<16x128xf32> -> vector<16x128xf32>
      %c0_54 = arith.constant 0 : index
      %c0_55 = arith.constant 0 : index
      %71 = vector.load %arg6[%c0_54, %c0_55] : memref<1x128xf32, #tpu.memory_space<vmem>>, vector<1x128xf32>
      %72 = vector.broadcast %71 : vector<1x128xf32> to vector<16x128xf32>
      %73 = arith.addf %70, %72 : vector<16x128xf32>
      %cst_56 = arith.constant 0.000000e+00 : f32
      %74 = vector.broadcast %cst_56 : f32 to vector<16x128xf32>
      %75 = arith.maximumf %73, %74 : vector<16x128xf32>
      %76 = vector.shape_cast %75 : vector<16x128xf32> to vector<1x16x128xf32>
      %77 = arith.truncf %76 : vector<1x16x128xf32> to vector<1x16x128xbf16>
      %c17_57 = arith.constant 17 : index
      %c1_58 = arith.constant 1 : index
      %c0_59 = arith.constant 0 : index
      %78 = vector.load %arg12[%c17_57, %c1_58, %c0_59] : memref<18x18x128xbf16, #tpu.memory_space<vmem>>, vector<1x16x128xbf16>
      tpu.vector_store %arg12[%c17_57, %c1_58, %c0_59], %77 {strides = array<i32>} : memref<18x18x128xbf16, #tpu.memory_space<vmem>>, vector<1x16x128xbf16>,
    } else {
    }
    %c0_i32_22 = arith.constant 0 : i32
    %26 = arith.cmpi eq, %arg1, %c0_i32_22 : i32
    %27 = arith.extui %26 : i1 to i32
    %c0_i32_23 = arith.constant 0 : i32
    %28 = arith.cmpi ne, %27, %c0_i32_23 : i32
    scf.if %28 {
      %cst_47 = arith.constant 0.000000e+00 : bf16
      %66 = vector.broadcast %cst_47 : bf16 to vector<1x16x128xbf16>
      %c17_48 = arith.constant 17 : index
      %c1_49 = arith.constant 1 : index
      %c0_50 = arith.constant 0 : index
      %67 = vector.load %arg12[%c17_48, %c1_49, %c0_50] : memref<18x18x128xbf16, #tpu.memory_space<vmem>>, vector<1x16x128xbf16>
      tpu.vector_store %arg12[%c17_48, %c1_49, %c0_50], %66 {strides = array<i32>} : memref<18x18x128xbf16, #tpu.memory_space<vmem>>, vector<1x16x128xbf16>,
    } else {
    }
    %c0_24 = arith.constant 0 : index
    %c0_25 = arith.constant 0 : index
    %c0_26 = arith.constant 0 : index
    %29 = vector.load %arg12[%c0_24, %c0_25, %c0_26] : memref<18x18x128xbf16, #tpu.memory_space<vmem>>, vector<18x18x128xbf16>
    %30 = vector.extract_strided_slice %29 {offsets = [0, 0, 0], sizes = [16, 16, 128], strides = [1, 1, 1]} : vector<18x18x128xbf16> to vector<16x16x128xbf16>
    %31 = vector.extract_strided_slice %29 {offsets = [0, 1, 0], sizes = [16, 16, 128], strides = [1, 1, 1]} : vector<18x18x128xbf16> to vector<16x16x128xbf16>
    %32 = vector.extract_strided_slice %29 {offsets = [0, 2, 0], sizes = [16, 16, 128], strides = [1, 1, 1]} : vector<18x18x128xbf16> to vector<16x16x128xbf16>
    %33 = vector.extract_strided_slice %29 {offsets = [1, 0, 0], sizes = [16, 16, 128], strides = [1, 1, 1]} : vector<18x18x128xbf16> to vector<16x16x128xbf16>
    %34 = vector.extract_strided_slice %29 {offsets = [1, 1, 0], sizes = [16, 16, 128], strides = [1, 1, 1]} : vector<18x18x128xbf16> to vector<16x16x128xbf16>
    %35 = vector.extract_strided_slice %29 {offsets = [1, 2, 0], sizes = [16, 16, 128], strides = [1, 1, 1]} : vector<18x18x128xbf16> to vector<16x16x128xbf16>
    %36 = vector.extract_strided_slice %29 {offsets = [2, 0, 0], sizes = [16, 16, 128], strides = [1, 1, 1]} : vector<18x18x128xbf16> to vector<16x16x128xbf16>
    %37 = vector.extract_strided_slice %29 {offsets = [2, 1, 0], sizes = [16, 16, 128], strides = [1, 1, 1]} : vector<18x18x128xbf16> to vector<16x16x128xbf16>
    %38 = vector.extract_strided_slice %29 {offsets = [2, 2, 0], sizes = [16, 16, 128], strides = [1, 1, 1]} : vector<18x18x128xbf16> to vector<16x16x128xbf16>
    %39 = tpu.concatenate %30, %31, %32, %33, %34, %35, %36, %37, %38 in 2 : vector<16x16x128xbf16>, vector<16x16x128xbf16>, vector<16x16x128xbf16>, vector<16x16x128xbf16>, vector<16x16x128xbf16>, vector<16x16x128xbf16>, vector<16x16x128xbf16>, vector<16x16x128xbf16>, vector<16x16x128xbf16> -> vector<16x16x1152xbf16>
    %40 = vector.shape_cast %39 : vector<16x16x1152xbf16> to vector<256x1152xbf16>
    %c0_27 = arith.constant 0 : index
    %c0_28 = arith.constant 0 : index
    %41 = vector.load %arg7[%c0_27, %c0_28] : memref<1152x128xbf16, #tpu.memory_space<vmem>>, vector<1152x128xbf16>
    %cst_29 = arith.constant dense<0.000000e+00> : vector<256x128xf32>
    %42 = tpu.matmul %40, %41, %cst_29 {dimension_numbers = #tpu.dot_dimension_numbers<[1], [0], [0], [1], [0, 0, 1, 1], [], []>} : vector<256x1152xbf16>, vector<1152x128xbf16>, vector<256x128xf32> -> vector<256x128xf32>
    %c0_30 = arith.constant 0 : index
    %c0_31 = arith.constant 0 : index
    %43 = vector.load %arg8[%c0_30, %c0_31] : memref<1x128xf32, #tpu.memory_space<vmem>>, vector<1x128xf32>
    %44 = vector.broadcast %43 : vector<1x128xf32> to vector<256x128xf32>
    %45 = arith.addf %42, %44 : vector<256x128xf32>
    %cst_32 = arith.constant 0.000000e+00 : f32
    %46 = vector.broadcast %cst_32 : f32 to vector<256x128xf32>
    %47 = arith.maximumf %45, %46 : vector<256x128xf32>
    %48 = arith.truncf %47 : vector<256x128xf32> to vector<256x128xbf16>
    %c0_33 = arith.constant 0 : index
    %c0_34 = arith.constant 0 : index
    %49 = vector.load %arg9[%c0_33, %c0_34] : memref<128x128xbf16, #tpu.memory_space<vmem>>, vector<128x128xbf16>
    %cst_35 = arith.constant dense<0.000000e+00> : vector<256x128xf32>
    %50 = tpu.matmul %48, %49, %cst_35 {dimension_numbers = #tpu.dot_dimension_numbers<[1], [0], [0], [1], [0, 0, 1, 1], [], []>} : vector<256x128xbf16>, vector<128x128xbf16>, vector<256x128xf32> -> vector<256x128xf32>
    %c0_36 = arith.constant 0 : index
    %c0_37 = arith.constant 0 : index
    %c0_38 = arith.constant 0 : index
    %c0_39 = arith.constant 0 : index
    %51 = vector.load %arg3[%c0_36, %c0_37, %c0_38, %c0_39] : memref<1x16x16x128xbf16, #tpu.memory_space<vmem>>, vector<1x16x16x128xbf16>
    %52 = vector.shape_cast %51 : vector<1x16x16x128xbf16> to vector<16x16x128xbf16>
    %53 = vector.shape_cast %52 : vector<16x16x128xbf16> to vector<256x128xbf16>
    %54 = arith.extf %53 : vector<256x128xbf16> to vector<256x128xf32>
    %c0_40 = arith.constant 0 : index
    %c0_41 = arith.constant 0 : index
    %55 = vector.load %arg10[%c0_40, %c0_41] : memref<1x128xf32, #tpu.memory_space<vmem>>, vector<1x128xf32>
    %56 = vector.broadcast %55 : vector<1x128xf32> to vector<256x128xf32>
    %57 = arith.addf %50, %56 : vector<256x128xf32>
    %58 = arith.addf %57, %54 : vector<256x128xf32>
    %cst_42 = arith.constant 0.000000e+00 : f32
    %59 = vector.broadcast %cst_42 : f32 to vector<256x128xf32>
    %60 = arith.maximumf %58, %59 : vector<256x128xf32>
    %61 = vector.shape_cast %60 : vector<256x128xf32> to vector<16x16x128xf32>
    %62 = arith.truncf %61 : vector<16x16x128xf32> to vector<16x16x128xbf16>
    %c0_43 = arith.constant 0 : index
    %c0_44 = arith.constant 0 : index
    %c0_45 = arith.constant 0 : index
    %c0_46 = arith.constant 0 : index
    %63 = vector.load %arg11[%c0_43, %c0_44, %c0_45, %c0_46] : memref<1x16x16x128xbf16, #tpu.memory_space<vmem>>, vector<1x16x16x128xbf16>
    %64 = vector.shape_cast %63 : vector<1x16x16x128xbf16> to vector<16x16x128xbf16>
    %65 = vector.shape_cast %62 : vector<16x16x128xbf16> to vector<1x16x16x128xbf16>
    tpu.vector_store %arg11[%c0_43, %c0_44, %c0_45, %c0_46], %65 {strides = array<i32>} : memref<1x16x16x128xbf16, #tpu.memory_space<vmem>>, vector<1x16x16x128xbf16>,
    return
  }
  func.func @transform_0(%arg0: i32, %arg1: i32) -> (i32, i32, i32, i32) {
    %c16_i32 = arith.constant 16 : i32
    %0 = arith.muli %arg1, %c16_i32 : i32
    %c1_i32 = arith.constant 1 : i32
    %1 = arith.subi %0, %c1_i32 : i32
    %c0_i32 = arith.constant 0 : i32
    %2 = arith.maxsi %1, %c0_i32 : i32
    %c0_i32_0 = arith.constant 0 : i32
    %c0_i32_1 = arith.constant 0 : i32
    %c0_i32_2 = arith.constant 0 : i32
    return %arg0, %2, %c0_i32_0, %c0_i32_1 : i32, i32, i32, i32
  }
  func.func @transform_1(%arg0: i32, %arg1: i32) -> (i32, i32, i32, i32) {
    %c0_i32 = arith.constant 0 : i32
    %c0_i32_0 = arith.constant 0 : i32
    %c0_i32_1 = arith.constant 0 : i32
    return %arg0, %arg1, %c0_i32, %c0_i32_0 : i32, i32, i32, i32
  }
  func.func @transform_2(%arg0: i32, %arg1: i32) -> (i32, i32, i32, i32) {
    %c1_i32 = arith.constant 1 : i32
    %0 = arith.addi %arg1, %c1_i32 : i32
    %c16_i32 = arith.constant 16 : i32
    %1 = arith.muli %0, %c16_i32 : i32
    %c15_i32 = arith.constant 15 : i32
    %2 = arith.minsi %1, %c15_i32 : i32
    %c0_i32 = arith.constant 0 : i32
    %c0_i32_0 = arith.constant 0 : i32
    %c0_i32_1 = arith.constant 0 : i32
    return %arg0, %2, %c0_i32, %c0_i32_0 : i32, i32, i32, i32
  }
  func.func @transform_3(%arg0: i32, %arg1: i32) -> (i32, i32) {
    %c0_i32 = arith.constant 0 : i32
    %c0_i32_0 = arith.constant 0 : i32
    %c0_i32_1 = arith.constant 0 : i32
    return %c0_i32, %c0_i32_0 : i32, i32
  }
  func.func @transform_4(%arg0: i32, %arg1: i32) -> (i32, i32) {
    %c0_i32 = arith.constant 0 : i32
    %c0_i32_0 = arith.constant 0 : i32
    %c0_i32_1 = arith.constant 0 : i32
    return %c0_i32, %c0_i32_0 : i32, i32
  }
  func.func @transform_5(%arg0: i32, %arg1: i32) -> (i32, i32) {
    %c0_i32 = arith.constant 0 : i32
    %c0_i32_0 = arith.constant 0 : i32
    %c0_i32_1 = arith.constant 0 : i32
    return %c0_i32, %c0_i32_0 : i32, i32
  }
  func.func @transform_6(%arg0: i32, %arg1: i32) -> (i32, i32) {
    %c0_i32 = arith.constant 0 : i32
    %c0_i32_0 = arith.constant 0 : i32
    %c0_i32_1 = arith.constant 0 : i32
    return %c0_i32, %c0_i32_0 : i32, i32
  }
  func.func @transform_7(%arg0: i32, %arg1: i32) -> (i32, i32) {
    %c0_i32 = arith.constant 0 : i32
    %c0_i32_0 = arith.constant 0 : i32
    %c0_i32_1 = arith.constant 0 : i32
    return %c0_i32, %c0_i32_0 : i32, i32
  }
  func.func @transform_8(%arg0: i32, %arg1: i32) -> (i32, i32) {
    %c0_i32 = arith.constant 0 : i32
    %c0_i32_0 = arith.constant 0 : i32
    %c0_i32_1 = arith.constant 0 : i32
    return %c0_i32, %c0_i32_0 : i32, i32
  }
  func.func @transform_9(%arg0: i32, %arg1: i32) -> (i32, i32, i32, i32) {
    %c0_i32 = arith.constant 0 : i32
    %c0_i32_0 = arith.constant 0 : i32
    %c0_i32_1 = arith.constant 0 : i32
    return %arg0, %arg1, %c0_i32, %c0_i32_0 : i32, i32, i32, i32
  }
}

</mosaic_0001>

<bundles_post_ra>
// kernel: tpu_custom_call.1
= control target key start
LH: loop header
LB: loop body
LE: loop exit
PB: predicated region body
PF: predicated region fallthrough
CT: control target
= control target key end

     0   :  { %s7765_s0 = inlined_call_operand.hbm [shape: bf16[2,16,16,128], index: 0, kind: input, shape index: {}]   ;;  %s7766_s1 = inlined_call_operand.hbm [shape: bf16[2,16,16,128], index: 1, kind: input, shape index: {}]   ;;  %s7767_s2 = inlined_call_operand.hbm [shape: bf16[2,16,16,128], index: 2, kind: input, shape index: {}]   ;;  %s7768_s3 = inlined_call_operand.hbm [shape: bf16[128,128], index: 3, kind: input, shape index: {}]   ;;  %s7769_s4 = inlined_call_operand.vmem [shape: f32[1,128], index: 4, kind: input, shape index: {}]   ;;  %s7770_s5 = inlined_call_operand.hbm [shape: bf16[1152,128], index: 5, kind: input, shape index: {}]   ;;  %s7771_s6 = inlined_call_operand.vmem [shape: f32[1,128], index: 6, kind: input, shape index: {}]   ;;  %s7772_s7 = inlined_call_operand.hbm [shape: bf16[128,128], index: 7, kind: input, shape index: {}]   ;;  %s7773_s8 = inlined_call_operand.vmem [shape: f32[1,128], index: 8, kind: input, shape index: {}]   ;;  %s7774_s9 = inlined_call_operand.hbm [shape: bf16[2,16,16,128], index: 9, kind: output, shape index: {}]  }
   0x1   :  { %7801 = sst [smem:[#allocation29_spill]] %s7766_s1 }
   0x2   :  { %7802 = sst [smem:[#allocation30_spill]] %s7768_s3 }
   0x3   :  { %7803 = sst [smem:[#allocation31_spill]] %s7773_s8 }
   0x4   :  { %7804 = sst [smem:[#allocation32_spill]] %s7774_s9 }
   0x5   :  { %14 = vsyncpa [#allocation4], 0 }
   0x6   :  { %16 = vsyncpa [#allocation4 + $0x1], 0 }
   0x7   :  { %17 = vsyncpa [#allocation7], 0 }
   0x8   :  { %19 = vsyncpa [#allocation7 + $0x1], 0 }
   0x9   :  { %20 = vsyncpa [#allocation10], 0 }
   0xa   :  { %21 = vsyncpa [#allocation13], 0 }
   0xb   :  { %22 = vsyncpa [#allocation5], 0 }
   0xc   :  { %24 = vsyncpa [#allocation5 + $0x1], 0  ;;  %s6348_s30 = smov 0   ;;  %s6350_s10 = smov 0  }
   0xd   :  { %s6352_s11 = smov 0   ;;  %s6354_s12 = smov 0  }
   0xe   :  { %s6356_s13 = smov 0   ;;  %s6358_s14 = smov 0  }
   0xf LB: > { %7805 = sst [smem:[#allocation20_spill]] %s6264_s30  ;;  %s6379_s15 = sadd.s32 4294967295, %s6284_s14   ;;  %s6284_s14 = sphi %s6358_s14, %s30_s14   ;;  %s6280_s13 = sphi %s6356_s13, %s7861_s13   ;;  %s6276_s12 = sphi %s6354_s12, %s7860_s12   ;;  %s6272_s11 = sphi %s6352_s11, %s7864_s11   ;;  %s6268_s10 = sphi %s6350_s10, %s7863_s10   ;;  %s6264_s30 = sphi %s6348_s30, %s7862_s30  }
  0x10   : > { %7806 = sst [smem:[#allocation21_spill]] %s6272_s11  ;;  %s4576_s16 = sadd.s32 4294967294, %s6284_s14  }
  0x11   : > { %7807 = sst [smem:[#allocation22_spill]] %s6276_s12  ;;  %p66_p0 = scmp.ne.s32.totalorder %s6272_s11, %s6268_s10 }
  0x12   : > { %7808 = sst [smem:[#allocation23_spill]] %s6280_s13  ;;  %p67_p1 = scmp.eq.s32.totalorder %s6284_s14, 0 }
  0x13   : > { %7809 = sst [smem:[#allocation24_spill]] %s6284_s14  ;;  %p72_p2 = scmp.ne.s32.totalorder %s6268_s10, %s6264_s30 }
  0x14   : > { %p7778_p3 = scmp.eq.s32.totalorder %s6379_s15, 0  ;;  %p6388_p4 = por %p67_p1, %p66_p0 }
  0x15   : > { %p288_p5 = scmp.eq.s32.totalorder %s6379_s15, 1  ;;  %p294_p7 = scmp.eq.s32.totalorder %s4576_s16, 1 }
  0x16   : > { %p6395_p6 = por %p7778_p3, %p72_p2  ;;  %p4577_p9 = scmp.ge.s32.totalorder %s6284_s14, 1 }
  0x17   : > { %p6399_p8 = por %p288_p5, %p66_p0  ;;  %p6404_p10 = por %p294_p7, %p72_p2 }
  0x18   : > { %s7811_s18 = scalar_select %p6395_p6, 1, 0 }
  0x19   : > { %s7812_s19 = scalar_select %p6399_p8, 1, 0 }
  0x1a   : > { %s7814_s20 = scalar_select %p6404_p10, 1, 0 }
  0x1b   : > { %7813 = sst [smem:[#allocation25_spill]] %s7812_s19  ;;  %p301_p11 = scmp.lt.s32.totalorder %s6284_s14, 3 }
  0x1c   : > { %7815 = sst [smem:[#allocation26_spill]] %s7814_s20  ;;  %s6286_s22 = smov [#allocation9]  }
  0x1d   : > { %p6409_p12 = pnand %p4577_p9, %p301_p11  ;;  %s313_s23 = sshll.u32 %s6286_s22, 4  ;;  %s6413_s23 = int_to_ptr.vmem [resolvable:$true] %s313_s23 }
  0x1e   : > { %s42_s25 = sadd.s32 1, %s6280_s13  ;;  %s7819_s3 = sld [smem:[#allocation30_spill]] }
  0x1f   : > { %s7816_s21 = scalar_select %p6409_p12, 1, 0 }
  0x20   : > { %p5783_p13 = pneg %p6409_p12  ;;  %p6426_p2 = scmp.ge.s32.totalorder %s42_s25, 2 }
  0x22   : > { %p6420_p1 = pnand %p5783_p13, %p7778_p3 }
  0x24   : > { %s7817_s24 = scalar_select %p6420_p1, 1, 0 }
  0x25   : > { %s6016_s16 = scalar_lea.hbm %s7819_s3, 1024  ;;  %p6438_p7 = pneg %p6420_p1 }
  0x26   : > { %p6017_p5 = scmp.ne.s32.totalorder %s7819_s3, %s6016_s16  ;;  %p6023_p13 = scmp.lt.u32.totalorder %s6016_s16, %s7819_s3 }
  0x27   : > { %s7820_s30 = scalar_select %p6438_p7, 1, 0 }
  0x28   : > { %p6019_p9 = pnand %p6438_p7, %p6017_p5 }
  0x2a   : > { %p6020_p11 = pneg %p6019_p9 }
  0x2c   : > { %p6025_p0 = pnand %p6023_p13, %p6020_p11 }
  0x2e   : > { %6028 = shalt.err (!%p6025_p0)
}
  0x2f   : > { %s6029_s20 = scalar_lea.vmem %s6413_s23, 1024  ;;  %p6037_p6 = scmp.lt.s32.totalorder %s6413_s23, %s6413_s23 }
  0x30   : > { %p6030_p3 = scmp.ne.s32.totalorder %s6413_s23, %s6029_s20  ;;  %p6038_p12 = scmp.lt.s32.totalorder %s6029_s20, %s6029_s20 }
  0x32   : > { %p6032_p10 = pnand %p6030_p3, %p6438_p7  ;;  %p6039_p5 = por %p6038_p12, %p6037_p6 }
  0x34   : > { %p6033_p8 = pneg %p6032_p10 }
  0x36   : > { %p6040_p9 = pnand %p6039_p5, %p6033_p8 }
  0x38   : > { %6043 = shalt.err (!%p6040_p9)
}
  0x39   : > { %s7784_s28 = smov 64   ;;  %s7786_s9 = smov 4  }
  0x3a   : > { %5786 = dma.hbm_to_vmem [thread:$0]  (!%p6420_p1), %s7819_s3, 1024, %s6413_s23, [#allocation10], %s7784_s28, %s7784_s28, %s7786_s9  }
  0x3b   : > { %s7866_s25 = smov (%p6426_p2, %s42_s25), 0  ;;  %p5810_p3 = scmp.lt.s32.totalorder %s6284_s14, 2 }
  0x3c   : > { %7821 = sst [smem:[#allocation27_spill]] %s7866_s25  ;;  %s6468_s16 = sand.u32 1, %s6272_s11  }
  0x3d   : > { %s54_s22 = ssub.s32 %s6280_s13, %s7866_s25  ;;  %s6473_s20 = sshll.u32 %s6280_s13, 11 }
  0x3e   : > { %p57_p6 = scmp.eq.s32.totalorder %s54_s22, 0  ;;  %p6477_p8 = pnand %p5810_p3, %p6388_p4 }
  0x3f   : > { %s389_s23 = sand.u32 1, %s6284_s14   ;;  %s4585_s27 = sshll.u32 %s6468_s16, 7 }
  0x40   : > { %s7822_s19 = scalar_select %p6477_p8, 1, 0 }
  0x41   : > { %s7823_s26 = sadd.s32 1, %s6272_s11  ;;  %s7825_s1 = sld [smem:[#allocation29_spill]] }
  0x42   : > { %s6486_s29 = scalar_select %p57_p6, %s6272_s11, %s7823_s26  }
  0x43   : > { %s393_s17 = scalar_lea.vmem [#allocation6], %s4585_s27  ;;  %s6289_s25 = smov [#allocation11]  }
  0x44   : > { %7824 = sst [smem:[#allocation28_spill]] %s6486_s29  ;;  %s403_s22 = sshll.u32 %s393_s17, 4  ;;  %s6494_s22 = int_to_ptr.vmem [resolvable:$true] %s403_s22 }
  0x45   : > { %s6496_s13 = sshll.u32 %s6289_s25, 4  ;;  %s6498_s14 = scalar_lea.sflag [#allocation7], %s389_s23  ;;  %s330_s13 = int_to_ptr.vmem [resolvable:$true] %s6496_s13 }
  0x46   : > { %p6504_p10 = pneg %p6477_p8 }
  0x47   : > { %s6492_s3 = scalar_lea.hbm %s7825_s1, %s6473_s20  ;;  %s6049_s17 = scalar_lea.hbm %s7825_s1, 4096 }
  0x48   : > { %s6044_s26 = scalar_lea.hbm %s6492_s3, 2048  ;;  %p6050_p2 = scmp.lt.u32.totalorder %s6492_s3, %s7825_s1 }
  0x49   : > { %p6045_p4 = scmp.ne.s32.totalorder %s6492_s3, %s6044_s26  ;;  %p6051_p11 = scmp.lt.u32.totalorder %s6049_s17, %s6044_s26 }
  0x4a   : > { %s7826_s28 = scalar_select %p6504_p10, 1, 0 }
  0x4b   : > { %p6047_p12 = pnand %p6504_p10, %p6045_p4  ;;  %p6052_p13 = por %p6051_p11, %p6050_p2 }
  0x4c   : > { %p6053_p5 = scmp.lt.u32.totalorder %s6044_s26, %s6492_s3 }
  0x4d   : > { %p6048_p0 = pneg %p6047_p12 }
  0x4e   : > { %p6054_p9 = por %p6053_p5, %p6052_p13 }
  0x50   : > { %p6055_p3 = pnand %p6054_p9, %p6048_p0 }
  0x52   : > { %6058 = shalt.err (!%p6055_p3)
}
  0x53   : > { %s6059_s23 = scalar_lea.vmem %s6494_s22, 2048  ;;  %s6290_s9 = smov [#allocation6]  }
  0x54   : > { %p6060_p6 = scmp.ne.s32.totalorder %s6494_s22, %s6059_s23  ;;  %s6064_s27 = sshll.u32 %s6290_s9, 4  ;;  %s6065_s27 = int_to_ptr.vmem [resolvable:$false] %s6064_s27 }
  0x55   : > { %s6066_s29 = scalar_lea.vmem %s6065_s27, 4096  ;;  %p6067_p1 = scmp.lt.s32.totalorder %s6494_s22, %s6065_s27 }
  0x56   : > { %p6062_p4 = pnand %p6060_p6, %p6504_p10  ;;  %p6068_p7 = scmp.lt.s32.totalorder %s6066_s29, %s6059_s23 }
  0x58   : > { %p6063_p12 = pneg %p6062_p4  ;;  %p6069_p2 = por %p6068_p7, %p6067_p1 }
  0x5a   : > { %p6070_p11 = pnand %p6069_p2, %p6063_p12 }
  0x5c   : > { %6073 = shalt.err (!%p6070_p11)
}
  0x5d   : > { %s7827_s26 = smov 4   ;;  %s7828_s17 = smov 64  }
  0x5e   : > { %5799 = dma.hbm_to_vmem [thread:$0]  (!%p6477_p8), %s6492_s3, 2048, %s6494_s22, %s6498_s14, %s7828_s17, %s7828_s17, %s7827_s26  }
  0x5f   : > { %s6074_s27 = scalar_lea.hbm %s7770_s5, 9216  ;;  %p7829_p7 = scmp.ne.s32.totalorder %s7820_s30, 0 }
  0x60   : > { %p6075_p1 = scmp.ne.s32.totalorder %s7770_s5, %s6074_s27  ;;  %p6081_p5 = scmp.lt.u32.totalorder %s6074_s27, %s7770_s5 }
  0x62   : > { %p6077_p0 = pnand %p6075_p1, %p7829_p7 }
  0x64   : > { %p6078_p13 = pneg %p6077_p0 }
  0x66   : > { %p6083_p9 = pnand %p6081_p5, %p6078_p13 }
  0x68   : > { %6086 = shalt.err (!%p6083_p9)
}
  0x69   : > { %s6087_s12 = scalar_lea.vmem %s330_s13, 9216  ;;  %p6095_p12 = scmp.lt.s32.totalorder %s330_s13, %s330_s13 }
  0x6a   : > { %p6088_p3 = scmp.ne.s32.totalorder %s330_s13, %s6087_s12  ;;  %p6096_p2 = scmp.lt.s32.totalorder %s6087_s12, %s6087_s12 }
  0x6c   : > { %p6090_p6 = pnand %p6088_p3, %p7829_p7  ;;  %p6097_p11 = por %p6096_p2, %p6095_p12 }
  0x6e   : > { %p6091_p4 = pneg %p6090_p6 }
  0x70   : > { %p6098_p8 = pnand %p6097_p11, %p6091_p4 }
  0x72   : > { %6101 = shalt.err (!%p6098_p8)
}
  0x73   : > { %p7830_p1 = scmp.ne.s32.totalorder %s7817_s24, 0  ;;  %s6291_s11 = smov [#allocation12]  }
  0x74   : > { %s345_s22 = sshll.u32 %s6291_s11, 4  ;;  %s4582_s25 = sshll.u32 %s6468_s16, 3  ;;  %s346_s22 = int_to_ptr.vmem [resolvable:$true] %s345_s22 }
  0x75   : > { %5789 = dma.hbm_to_vmem [thread:$0]  (!%p7830_p1), %s7770_s5, 9216, %s330_s13, [#allocation10], %s7828_s17, %s7828_s17, %s7827_s26  }
  0x76   : > { %s6102_s27 = scalar_lea.hbm %s7772_s7, 1024 }
  0x77   : > { %p6103_p8 = scmp.ne.s32.totalorder %s7772_s7, %s6102_s27  ;;  %p6109_p5 = scmp.lt.u32.totalorder %s6102_s27, %s7772_s7 }
  0x79   : > { %p6105_p0 = pnand %p6103_p8, %p7829_p7 }
  0x7b   : > { %p6106_p13 = pneg %p6105_p0 }
  0x7d   : > { %p6111_p9 = pnand %p6109_p5, %p6106_p13 }
  0x7f   : > { %6114 = shalt.err (!%p6111_p9)
}
  0x80   : > { %s6115_s13 = scalar_lea.vmem %s346_s22, 1024  ;;  %p6123_p12 = scmp.lt.s32.totalorder %s346_s22, %s346_s22 }
  0x81   : > { %p6116_p3 = scmp.ne.s32.totalorder %s346_s22, %s6115_s13  ;;  %p6124_p2 = scmp.lt.s32.totalorder %s6115_s13, %s6115_s13 }
  0x83   : > { %p6118_p6 = pnand %p6116_p3, %p7829_p7  ;;  %p6125_p11 = por %p6124_p2, %p6123_p12 }
  0x85   : > { %p6119_p4 = pneg %p6118_p6 }
  0x87   : > { %p6126_p10 = pnand %p6125_p11, %p6119_p4 }
  0x89   : > { %6129 = shalt.err (!%p6126_p10)
}
  0x8a   : > { %5792 = dma.hbm_to_vmem [thread:$0]  (!%p7830_p1), %s7772_s7, 1024, %s346_s22, [#allocation13], %s7828_s17, %s7828_s17, %s7827_s26  }
  0x8b   : > { %s6579_s9 = scalar_lea.hbm %s7765_s0, %s6473_s20  ;;  %s366_s24 = scalar_lea.vmem [#allocation3], %s4582_s25 }
  0x8c   : > { %s379_s12 = sshll.u32 %s366_s24, 4  ;;  %s6583_s27 = scalar_lea.vmem [#allocation8], %s4582_s25  ;;  %s6581_s12 = int_to_ptr.vmem [resolvable:$true] %s379_s12 }
  0x8d   : > { %s430_s23 = sshll.u32 %s6583_s27, 4  ;;  %s363_s29 = scalar_lea.sflag [#allocation4], %s6468_s16  ;;  %s6615_s23 = int_to_ptr.vmem [resolvable:$true] %s430_s23 }
  0x8e   : > { %s6130_s1 = scalar_lea.hbm %s6579_s9, 128  ;;  %p7831_p7 = scmp.ne.s32.totalorder %s7826_s28, 0 }
  0x8f   : > { %p6131_p10 = scmp.ne.s32.totalorder %s6579_s9, %s6130_s1  ;;  %s6135_s8 = scalar_lea.hbm %s7765_s0, 4096 }
  0x90   : > { %p6136_p0 = scmp.lt.u32.totalorder %s6579_s9, %s7765_s0  ;;  %p6137_p13 = scmp.lt.u32.totalorder %s6135_s8, %s6130_s1 }
  0x91   : > { %p6133_p1 = pnand %p6131_p10, %p7831_p7  ;;  %p6139_p9 = scmp.lt.u32.totalorder %s6130_s1, %s6579_s9 }
  0x92   : > { %p6138_p5 = por %p6137_p13, %p6136_p0 }
  0x93   : > { %p6134_p8 = pneg %p6133_p1 }
  0x94   : > { %p6140_p3 = por %p6139_p9, %p6138_p5 }
  0x96   : > { %p6141_p6 = pnand %p6140_p3, %p6134_p8 }
  0x98   : > { %6144 = shalt.err (!%p6141_p6)
}
  0x99   : > { %s6145_s25 = scalar_lea.vmem %s6581_s12, 128  ;;  %s6292_s11 = smov [#allocation3]  }
  0x9a   : > { %p6146_p4 = scmp.ne.s32.totalorder %s6581_s12, %s6145_s25  ;;  %s6150_s24 = sshll.u32 %s6292_s11, 4  ;;  %s6151_s24 = int_to_ptr.vmem [resolvable:$false] %s6150_s24 }
  0x9b   : > { %s6152_s22 = scalar_lea.vmem %s6151_s24, 256  ;;  %p6153_p11 = scmp.lt.s32.totalorder %s6581_s12, %s6151_s24 }
  0x9c   : > { %p6148_p12 = pnand %p6146_p4, %p7831_p7  ;;  %p6154_p10 = scmp.lt.s32.totalorder %s6152_s22, %s6145_s25 }
  0x9e   : > { %p6149_p2 = pneg %p6148_p12  ;;  %p6155_p1 = por %p6154_p10, %p6153_p11 }
  0xa0   : > { %p6156_p0 = pnand %p6155_p1, %p6149_p2 }
  0xa2   : > { %6159 = shalt.err (!%p6156_p0)
}
  0xa3   : > { %p7832_p8 = scmp.ne.s32.totalorder %s7822_s19, 0  ;;  %s4838_s1 = sadd.s32 1920, %s6473_s20 }
  0xa4   : > { %s6621_s3 = scalar_lea.hbm %s7767_s2, %s4838_s1 }
  0xa5   : > { %5796 = dma.hbm_to_vmem [thread:$0]  (!%p7832_p8), %s6579_s9, 128, %s6581_s12, %s363_s29, %s7828_s17, %s7828_s17, %s7827_s26  }
  0xa6   : > { %s6160_s16 = scalar_lea.hbm %s6621_s3, 128  ;;  %s6165_s12 = scalar_lea.hbm %s7767_s2, 4096 }
  0xa7   : > { %p6161_p13 = scmp.ne.s32.totalorder %s6621_s3, %s6160_s16  ;;  %p6166_p3 = scmp.lt.u32.totalorder %s6621_s3, %s7767_s2 }
  0xa8   : > { %p6167_p6 = scmp.lt.u32.totalorder %s6165_s12, %s6160_s16  ;;  %p6169_p12 = scmp.lt.u32.totalorder %s6160_s16, %s6621_s3 }
  0xa9   : > { %p6163_p5 = pnand %p6161_p13, %p7831_p7 }
  0xaa   : > { %p6168_p4 = por %p6167_p6, %p6166_p3 }
  0xab   : > { %p6164_p9 = pneg %p6163_p5 }
  0xac   : > { %p6170_p2 = por %p6169_p12, %p6168_p4 }
  0xae   : > { %p6171_p11 = pnand %p6170_p2, %p6164_p9 }
  0xb0   : > { %6174 = shalt.err (!%p6171_p11)
}
  0xb1   : > { %s6175_s29 = scalar_lea.vmem %s6615_s23, 128  ;;  %s6293_s25 = smov [#allocation8]  }
  0xb2   : > { %p6176_p10 = scmp.ne.s32.totalorder %s6615_s23, %s6175_s29  ;;  %s6180_s11 = sshll.u32 %s6293_s25, 4  ;;  %s6181_s11 = int_to_ptr.vmem [resolvable:$false] %s6180_s11 }
  0xb3   : > { %s6182_s24 = scalar_lea.vmem %s6181_s11, 256  ;;  %p6183_p13 = scmp.lt.s32.totalorder %s6615_s23, %s6181_s11 }
  0xb4   : > { %p6178_p1 = pnand %p6176_p10, %p7831_p7  ;;  %p6184_p5 = scmp.lt.s32.totalorder %s6182_s24, %s6175_s29 }
  0xb6   : > { %p6179_p0 = pneg %p6178_p1  ;;  %p6185_p3 = por %p6184_p5, %p6183_p13 }
  0xb8   : > { %p6186_p6 = pnand %p6185_p3, %p6179_p0 }
  0xba   : > { %6189 = shalt.err (!%p6186_p6)
}
  0xbb   : > { %5802 = dma.hbm_to_vmem [thread:$0]  (!%p7832_p8), %s6621_s3, 128, %s6615_s23, %s6498_s14, %s7828_s17, %s7828_s17, %s7827_s26  }
  0xbc   : > { %p7833_p7 = scmp.ne.s32.totalorder %s7816_s21, 0 }
  0xbd   : > { %s6651_s28 = sand.u32 (!%p7833_p7), 1, %s6268_s10   ;;  %p7834_p9 = scmp.ne.s32.totalorder (!%p7833_p7), %s7811_s18, 0 }
  0xbe   : > { %442 = sbr.rel (%p7833_p7) target bundleno = 1256 (0x4e8), region = 56  ;;  %s445_s22 = scalar_lea.sflag (!%p7833_p7), [#allocation4], %s6651_s28 }
  0xc5   : > { %6243 = dma.done.wait (%p7834_p9), %s445_s22, 128  }
  0xc6   : > { %6245 = vsyncadd (%p7834_p9), %s445_s22, 4294967168  ;;  %s453_s19 = sand.u32 1, %s6379_s15   ;;  %s4593_s14 = sshll.u32 %s6651_s28, 7 }
  0xc7   : > { %s454_s26 = scalar_lea.sflag [#allocation7], %s453_s19  ;;  %s6662_s21 = scalar_lea.vmem [#allocation6], %s4593_s14 }
  0xc8   : > { %6247 = dma.done.wait (%p7834_p9), %s454_s26, 2176  }
  0xc9   : > { %6249 = vsyncadd (%p7834_p9), %s454_s26, 4294965120  ;;  %p7835_p8 = scmp.eq.s32.totalorder %s6379_s15, 0 }
  0xcb   : > { %6251 = dma.done.wait (%p7835_p8), [#allocation10], 10240   ;;  %p7836_p4 = pmov %p7835_p8 }
  0xcd   : > { %6253 = vsyncadd (%p7836_p4), [#allocation10], 4294957056  ;;  %p7837_p12 = pmov %p7836_p4 }
  0xce   : > { %p7838_p2 = pmov %p7836_p4 }
  0xcf   : > { %6255 = dma.done.wait (%p7837_p12), [#allocation13], 1024  }
  0xd0   : > { %6257 = vsyncadd (%p7838_p2), [#allocation13], 4294966272  ;;  %v5871_v0 = vld [vmem:[#allocation9] sm:$0xff]   ;;  %v5872_v1 = vld [vmem:[#allocation9 + $0x8] sm:$0xff]   ;;  %vm534_vm0 = vcmask 1040384   ;;  %vm1458_vm5 = vcmask 1043456  }
  0xd1   : > { %5603 = vmatprep.subr.bf16.mxu0 %v5871_v0  ;;  %5747 = vmatprep.subr.bf16.mxu1 %v5871_v0  ;;  %v5873_v2 = vld [vmem:[#allocation9 + $0x10] sm:$0xff]   ;;  %v5874_v3 = vld [vmem:[#allocation9 + $0x18] sm:$0xff]   ;;  %v5875_v5 = vld [vmem:[#allocation9 + $0x20] sm:$0xff]   ;;  %vm535_vm1 = vsmask.f32 256  ;;  %v6294_v59 = vmov 0  }
  0xd2   : > { %5604 = vmatpush3.bf16.msra.mxu0 %v5871_v0  ;;  %5755 = vmatpush3.bf16.msra.mxu1 %v5871_v0  ;;  %v5879_v4 = vld [vmem:[%s6662_s21] sm:$0xff]   ;;  %v5876_v6 = vld [vmem:[#allocation9 + $0x28] sm:$0xff]   ;;  %v5878_v9 = vld [vmem:[#allocation9 + $0x38] sm:$0xff]   ;;  %vm591_vm3 = vsmask.f32 7938  ;;  %vm2320_vm8 = vcmask 1046528  }
  0xd3   : > { %5605 = vmatprep.subr.bf16.mxu0 %v5872_v1  ;;  %5748 = vmatprep.subr.bf16.mxu1 %v5872_v1  ;;  %v5887_v7 = vld [vmem:[%s6662_s21 + $0x40] sm:$0xff]   ;;  %vm6680_vm2 = vmand %vm534_vm0, %vm535_vm1  ;;  %v5895_v11 = vld [vmem:[#allocation11 + $0x40] sm:$0xff]   ;;  %1738 = vst [vmem:[#allocation2 + $0x4] sm:$0xf] %v6294_v59  ;;  %vm2111_vm7 = vsmask.f32 7424 }
  0xd4   : > { %5619 = vmatprep.mubr.bf16.mxu0 %v5879_v4  ;;  %5635 = vmatprep.mubr.bf16.mxu1 %v5887_v7  ;;  %v5877_v8 = vld [vmem:[#allocation9 + $0x30] sm:$0xff]   ;;  %v5880_v12 = vld [vmem:[%s6662_s21 + $0x8] sm:$0xff]   ;;  %v5898_v14 = vld [vmem:[#allocation11 + $0xc0] sm:$0xff]   ;;  %1909 = vst [vmem:[#allocation2 + $0xd0] sm:$0xf] %v6294_v59  ;;  %s7847_s16 = sld [smem:[#allocation31_spill]] }
  0xd5   : > { %v5888_v13 = vld [vmem:[%s6662_s21 + $0x48] sm:$0xff]   ;;  %v5881_v15 = vld [vmem:[%s6662_s21 + $0x10] sm:$0xff]   ;;  %v5897_v19 = vld [vmem:[#allocation11 + $0x48] sm:$0xff]   ;;  %vm1135_vm9 = vsmask.f32 4368  ;;  %s7653_s30 = scalar_lea.vmem [#allocation14], %s4593_s14 }
  0xd6   : > { %5606 = vmatpush3.bf16.msra.mxu0 %v5872_v1  ;;  %5756 = vmatpush3.bf16.msra.mxu1 %v5872_v1  ;;  %v5889_v16 = vld [vmem:[%s6662_s21 + $0x50] sm:$0xff]   ;;  %v5899_v22 = vld [vmem:[#allocation11 + $0x8] sm:$0xff]   ;;  %v5883_v25 = vld [vmem:[%s6662_s21 + $0x20] sm:$0xff]   ;;  %s7848_s9 = sld [smem:[#allocation22_spill]]  ;;  %s7849_s12 = sld [smem:[#allocation25_spill]] }
  0xd7   : > { %5607 = vmatprep.subr.bf16.mxu0 %v5873_v2  ;;  %5749 = vmatprep.subr.bf16.mxu1 %v5873_v2  ;;  %v5896_v17 = vld [vmem:[#allocation11] sm:$0xff]   ;;  %v5882_v23 = vld [vmem:[%s6662_s21 + $0x18] sm:$0xff]   ;;  %v5891_v26 = vld [vmem:[%s6662_s21 + $0x60] sm:$0xff]   ;;  %s4410_s20 = sshll.u32 %s7653_s30, 4  ;;  %s7850_s11 = sld [smem:[#allocation32_spill]]  ;;  %s7714_s20 = int_to_ptr.vmem [resolvable:$true] %s4410_s20 }
  0xd8   : > { %v543_v18 = vld [vmem:[#allocation2 + $0x18] sm:$0x1]  ;;  %v5890_v24 = vld [vmem:[%s6662_s21 + $0x58] sm:$0xff]   ;;  %v5884_v27 = vld [vmem:[%s6662_s21 + $0x28] sm:$0xff]   ;;  %s4394_s19 = scalar_lea.sflag [#allocation5], %s6651_s28  ;;  %s6190_s14 = scalar_lea.vmem %s7714_s20, 2048 }
  0xd9   : > { %v5900_v20 = vld [vmem:[#allocation11 + $0x80] sm:$0xff]   ;;  %v544_v21 = vsel %vm6680_vm2, 0, %v543_v18  ;;  %v5892_v28 = vld [vmem:[%s6662_s21 + $0x68] sm:$0xff]   ;;  %v5886_v31 = vld [vmem:[%s6662_s21 + $0x38] sm:$0xff]   ;;  %p6191_p11 = scmp.ne.s32.totalorder %s7714_s20, %s6190_s14  ;;  %s6295_s26 = smov [#allocation14]  }
  0xda   : > { %5608 = vmatpush3.bf16.msra.mxu0 %v5873_v2  ;;  %5757 = vmatpush3.bf16.msra.mxu1 %v5873_v2  ;;  %545 = vst [vmem:[#allocation2 + $0x18] sm:$0x1] %v544_v21  ;;  %v5885_v29 = vld [vmem:[%s6662_s21 + $0x30] sm:$0xff]   ;;  %v5894_v32 = vld [vmem:[%s6662_s21 + $0x78] sm:$0xff]   ;;  %v5901_v33 = vld [vmem:[#allocation11 + $0x50] sm:$0xff]  }
  0xdb   : > { %5609 = vmatprep.subr.bf16.mxu0 %v5874_v3  ;;  %5750 = vmatprep.subr.bf16.mxu1 %v5874_v3  ;;  %v5893_v30 = vld [vmem:[%s6662_s21 + $0x70] sm:$0xff]   ;;  %v5902_v34 = vld [vmem:[#allocation11 + $0xc8] sm:$0xff]   ;;  %v5903_v35 = vld [vmem:[#allocation11 + $0x10] sm:$0xff]  }
  0xdc   : > { %v5904_v36 = vld [vmem:[#allocation11 + $0x88] sm:$0xff]   ;;  %vm6702_vm4 = vmand %vm534_vm0, %vm591_vm3  ;;  %v5905_v40 = vld [vmem:[#allocation11 + $0x58] sm:$0xff]   ;;  %s4907_s27 = sshll.u32 %s7848_s9, 11  ;;  %p7852_p10 = scmp.ne.s32.totalorder %s7849_s12, 0 }
  0xdd   : > { %v537_v38 = vld [vmem:[#allocation2] sm:$0x1]  ;;  %v5906_v41 = vld [vmem:[#allocation11 + $0xd0] sm:$0xff]   ;;  %v5907_v43 = vld [vmem:[#allocation11 + $0x18] sm:$0xff]   ;;  %s7851_s24 = smov %s7850_s11  ;;  %s7712_s22 = scalar_lea.hbm %s7850_s11, %s4907_s27 }
  0xde   : > { %5610 = vmatpush3.bf16.msra.mxu0 %v5874_v3  ;;  %5758 = vmatpush3.bf16.msra.mxu1 %v5874_v3  ;;  %v538_v39 = vsel %vm6680_vm2, 0, %v537_v38  ;;  %v593_v42 = vld [vmem:[#allocation2 + $0x8] sm:$0x1]  ;;  %vm6711_vm6 = vmand %vm1458_vm5, %vm591_vm3  ;;  %v540_v47 = vld [vmem:[#allocation2 + $0xc] sm:$0x1]  ;;  %p6192_p1 = pnand %p6191_p11, %p7852_p10 }
  0xdf   : > { %5611 = vmatprep.subr.bf16.mxu0 %v5875_v5  ;;  %5751 = vmatprep.subr.bf16.mxu1 %v5875_v5  ;;  %539 = vst [vmem:[#allocation2] sm:$0x1] %v538_v39  ;;  %v5908_v44 = vld [vmem:[#allocation11 + $0x90] sm:$0xff]   ;;  %v594_v45 = vsel %vm6702_vm4, 0, %v593_v42  ;;  %v541_v48 = vsel %vm6680_vm2, 0, %v540_v47  ;;  %v5909_v50 = vld [vmem:[#allocation11 + $0x60] sm:$0xff]   ;;  %vm6822_vm10 = vmor %vm535_vm1, %vm1135_vm9 }
  0xe0   : > { %595 = vst [vmem:[#allocation2 + $0x8] sm:$0x1] %v594_v45  ;;  %v599_v49 = vld [vmem:[#allocation2 + $0x20] sm:$0x1]  ;;  %v5910_v51 = vld [vmem:[#allocation11 + $0xd8] sm:$0xff]   ;;  %v5911_v54 = vld [vmem:[#allocation11 + $0x20] sm:$0xff]   ;;  %p6193_p0 = pneg %p6192_p1 }
  0xe1   : > { %542 = vst [vmem:[#allocation2 + $0xc] sm:$0x1] %v541_v48  ;;  %v600_v52 = vsel %vm6702_vm4, 0, %v599_v49  ;;  %v596_v53 = vld [vmem:[#allocation2 + $0x14] sm:$0x1]  ;;  %v5913_v62 = vld [vmem:[#allocation11 + $0x68] sm:$0xff]  }
  0xe2   : > { %5612 = vmatpush3.bf16.msra.mxu0 %v5875_v5  ;;  %5759 = vmatpush3.bf16.msra.mxu1 %v5875_v5  ;;  %v5912_v55 = vld [vmem:[#allocation11 + $0x98] sm:$0xff]   ;;  %601 = vst [vmem:[#allocation2 + $0x20] sm:$0x1] %v600_v52  ;;  %v597_v56 = vsel %vm6702_vm4, 0, %v596_v53  ;;  %v5914_v63 = vld [vmem:[#allocation11 + $0xe0] sm:$0xff]   ;;  %v5915_v0 = vld [vmem:[#allocation11 + $0x28] sm:$0xff]  }
  0xe3   : > { %5613 = vmatprep.subr.bf16.mxu0 %v5876_v6  ;;  %5752 = vmatprep.subr.bf16.mxu1 %v5876_v6  ;;  %598 = vst [vmem:[#allocation2 + $0x14] sm:$0x1] %v597_v56  ;;  %v549_v1 = vld [vmem:[#allocation2 + $0x30] sm:$0x1]  ;;  %v546_v2 = vld [vmem:[#allocation2 + $0x24] sm:$0x1] }
  0xe4   : > { %v550_v3 = vsel %vm6680_vm2, 0, %v549_v1  ;;  %v547_v4 = vsel %vm6680_vm2, 0, %v546_v2  ;;  %v5916_v5 = vld [vmem:[#allocation11 + $0xa0] sm:$0xff]   ;;  %v5917_v7 = vld [vmem:[#allocation11 + $0x70] sm:$0xff]   ;;  %v5923_v21 = vld [vmem:[#allocation11 + $0x38] sm:$0xff]  }
  0xe5   : > { %551 = vst [vmem:[#allocation2 + $0x30] sm:$0x1] %v550_v3  ;;  %548 = vst [vmem:[#allocation2 + $0x24] sm:$0x1] %v547_v4  ;;  %v611_v38 = vld [vmem:[#allocation2 + $0x50] sm:$0x1] }
  0xe6   : > { %5614 = vmatpush3.bf16.msra.mxu0 %v5876_v6  ;;  %5760 = vmatpush3.bf16.msra.mxu1 %v5876_v6  ;;  %v1735_v57 = vld [vmem:[#allocation2] sm:$0xf]  ;;  %v605_v6 = vld [vmem:[#allocation2 + $0x38] sm:$0x1]  ;;  %v558_v47 = vld [vmem:[#allocation2 + $0x54] sm:$0x1] }
  0xe7   : > { %5615 = vmatprep.subr.bf16.mxu0 %v5877_v8  ;;  %5753 = vmatprep.subr.bf16.mxu1 %v5877_v8  ;;  %v1736_v58 = vsel %vm6711_vm6, 0, %v1735_v57  ;;  %v1739_v60 = vld [vmem:[#allocation2 + $0x8] sm:$0x1]  ;;  %v559_v48 = vsel %vm6680_vm2, 0, %v558_v47  ;;  %v5936_v49 = vld [vmem:[#allocation11 + $0x148] sm:$0xff]   ;;  %v6012_v46 = vld [vmem:[#allocation11 + $0x200] sm:$0xff]  }
  0xe8   : > { %1737 = vst [vmem:[#allocation2] sm:$0xf] %v1736_v58  ;;  %v1740_v61 = vsel %vm6680_vm2, 0, %v1739_v60  ;;  %560 = vst [vmem:[#allocation2 + $0x54] sm:$0x1] %v559_v48  ;;  %v5937_v52 = vld [vmem:[#allocation11 + $0x108] sm:$0xff]  }
  0xe9   : > { %1741 = vst [vmem:[#allocation2 + $0x8] sm:$0x1] %v1740_v61  ;;  %v614_v53 = vld [vmem:[#allocation2 + $0x5c] sm:$0x1]  ;;  %v564_v56 = vld [vmem:[#allocation2 + $0x6c] sm:$0x1] }
  0xea   : > { %5616 = vmatpush3.bf16.msra.mxu0 %v5877_v8  ;;  %5761 = vmatpush3.bf16.msra.mxu1 %v5877_v8  ;;  %v5918_v8 = vld [vmem:[#allocation11 + $0xe8] sm:$0xff]   ;;  %v565_v58 = vsel %vm6680_vm2, 0, %v564_v56  ;;  %v5942_v59 = vld [vmem:[#allocation11 + $0x150] sm:$0xff]   ;;  %v573_v1 = vld [vmem:[#allocation2 + $0x90] sm:$0x1] }
  0xeb   : > { %5617 = vmatprep.subr.bf16.mxu0 %v5878_v9  ;;  %5754 = vmatprep.subr.bf16.mxu1 %v5878_v9  ;;  %566 = vst [vmem:[#allocation2 + $0x6c] sm:$0x1] %v565_v58  ;;  %v623_v60 = vld [vmem:[#allocation2 + $0x80] sm:$0x1]  ;;  %v574_v2 = vsel %vm6680_vm2, 0, %v573_v1  ;;  %v5995_v10 = vld [vmem:[#allocation11 + $0x218] sm:$0xff]  }
  0xec   : > { %v624_v61 = vsel %vm6702_vm4, 0, %v623_v60  ;;  %575 = vst [vmem:[#allocation2 + $0x90] sm:$0x1] %v574_v2  ;;  %v570_v3 = vld [vmem:[#allocation2 + $0x84] sm:$0x1] }
  0xed   : > { %625 = vst [vmem:[#allocation2 + $0x80] sm:$0x1] %v624_v61  ;;  %v571_v4 = vsel %vm6680_vm2, 0, %v570_v3 }
  0xee   : > { %5618 = vmatpush3.bf16.msra.mxu0 %v5878_v9  ;;  %5762 = vmatpush3.bf16.msra.mxu1 %v5878_v9  ;;  %v606_v9 = vsel %vm6702_vm4, 0, %v605_v6  ;;  %v629_v6 = vld [vmem:[#allocation2 + $0x98] sm:$0x1]  ;;  %572 = vst [vmem:[#allocation2 + $0x84] sm:$0x1] %v571_v4 }
  0xef   : > { %5107 = vmatprep.subr.bf16.mxu1 %v5895_v11  ;;  %5219 = vmatprep.subr.bf16.mxu0 %v5898_v14  ;;  %v5919_v11 = vld [vmem:[#allocation11 + $0x30] sm:$0xff]   ;;  %607 = vst [vmem:[#allocation2 + $0x38] sm:$0x1] %v606_v9 }
  0xf0   : > { %v5926_v14 = vld [vmem:[#allocation2 + $0x8] ss:$0 sps:$4 sm:$0x11]   ;;  %v626_v9 = vld [vmem:[#allocation2 + $0x8c] sm:$0x1] }
  0xf1   : > { %5620 = vmatmul.mubr.bf16.vlgmr.msra.gmra.mrb[0].mxu0 %v5880_v12  ;;  %5636 = vmatmul.mubr.bf16.vlgmr.msra.gmra.mrb[0].mxu1 %v5888_v13  ;;  %v5920_v12 = vld [vmem:[#allocation11 + $0xa8] sm:$0xff]  }
  0xf2   : > { %5623 = vmatprep.mubr.bf16.mxu0 %v5881_v15  ;;  %5639 = vmatprep.mubr.bf16.mxu1 %v5889_v16  ;;  %v5925_v13 = vld [vmem:[#allocation2] sm:$0xff]   ;;  %v602_v15 = vld [vmem:[#allocation2 + $0x2c] sm:$0x1]  ;;  %v5921_v16 = vld [vmem:[#allocation11 + $0x78] sm:$0xff]  }
  0xf3   : > { %5108 = vmatpush3.bf16.msra.mxu1 %v5896_v17  ;;  %5220 = vmatpush3.bf16.msra.mxu0 %v5900_v20  ;;  %v5922_v17 = vld [vmem:[#allocation11 + $0xf0] sm:$0xff]   ;;  %v2113_v18 = vshrl.u32 %v5925_v13, 16  ;;  %v603_v20 = vsel %vm6702_vm4, 0, %v602_v15  ;;  %v576_v15 = vld [vmem:[#allocation2 + $0x9c] sm:$0x1] }
  0xf4   : > { %5109 = vmatprep.subr.bf16.mxu1 %v5897_v19  ;;  %5221 = vmatprep.subr.bf16.mxu0 %v5902_v34  ;;  %v2115_v19 = vshll.u32 %v5925_v13, 16  ;;  %604 = vst [vmem:[#allocation2 + $0x2c] sm:$0x1] %v603_v20  ;;  %v5957_v20 = vld [vmem:[#allocation11 + $0x120] sm:$0xff]  }
  0xf7   : > { %5110 = vmatpush3.bf16.msra.mxu1 %v5899_v22  ;;  %5222 = vmatpush3.bf16.msra.mxu0 %v5904_v36  ;;  %v5924_v22 = vld [vmem:[#allocation11 + $0xb0] sm:$0xff]   ;;  %v5929_v36 = vld [vmem:[#allocation11 + $0x140] sm:$0xff]  }
  0xf8   : > { %5111 = vmatprep.subr.bf16.mxu1 %v5901_v33  ;;  %5223 = vmatprep.subr.bf16.mxu0 %v5906_v41  ;;  %v608_v41 = vld [vmem:[#allocation2 + $0x44] sm:$0x1] }
  0xf9   : > { %5624 = vmatmul.mubr.bf16.gmra.mrb[4].mxu0 %v5882_v23  ;;  %5640 = vmatmul.mubr.bf16.gmra.mrb[4].mxu1 %v5890_v24  ;;  %v2120_v23 = vshll.u32 %v5926_v14, 16  ;;  %v2117_v24 = vrot.slane %v2115_v19, 1  ;;  %v609_v42 = vsel %vm6702_vm4, 0, %v608_v41 }
  0xfa   : > { %5627 = vmatprep.mubr.bf16.mxu0 %v5883_v25  ;;  %5643 = vmatprep.mubr.bf16.mxu1 %v5891_v26  ;;  %610 = vst [vmem:[#allocation2 + $0x44] sm:$0x1] %v609_v42 }
  0xfb   : > { %5112 = vmatpush3.bf16.msra.mxu1 %v5903_v35  ;;  %5224 = vmatpush3.bf16.msra.mxu0 %v5908_v44  ;;  %v2118_v25 = vor.u32 %v2117_v24, %v2113_v18  ;;  %v2122_v26 = vrot.slane %v2120_v23, 1  ;;  %v552_v35 = vld [vmem:[#allocation2 + $0x3c] sm:$0x1]  ;;  %v561_v44 = vld [vmem:[#allocation2 + $0x60] sm:$0x1]  ;;  %v577_v18 = vsel %vm6680_vm2, 0, %v576_v15 }
  0xfc   : > { %5113 = vmatprep.subr.bf16.mxu1 %v5905_v40  ;;  %5225 = vmatprep.subr.bf16.mxu0 %v5910_v51  ;;  %v553_v39 = vsel %vm6680_vm2, 0, %v552_v35  ;;  %v612_v40 = vsel %vm6702_vm4, 0, %v611_v38  ;;  %v562_v45 = vsel %vm6680_vm2, 0, %v561_v44  ;;  %578 = vst [vmem:[#allocation2 + $0x9c] sm:$0x1] %v577_v18 }
  0xfd   : > { %554 = vst [vmem:[#allocation2 + $0x3c] sm:$0x1] %v553_v39  ;;  %613 = vst [vmem:[#allocation2 + $0x50] sm:$0x1] %v612_v40  ;;  %v585_v23 = vld [vmem:[#allocation2 + $0xc0] sm:$0x1] }
  0xfe   : > { %563 = vst [vmem:[#allocation2 + $0x60] sm:$0x1] %v562_v45  ;;  %v586_v24 = vsel %vm6680_vm2, 0, %v585_v23  ;;  %v6788_v35 = vld [vmem:[%s7769_s4] ss:$0 sm:$0xff] }
  0xff   : > { %5114 = vmatpush3.bf16.msra.mxu1 %v5907_v43  ;;  %5226 = vmatpush3.bf16.msra.mxu0 %v5912_v55  ;;  %v5931_v43 = vld [vmem:[#allocation11 + $0x100] sm:$0xff]   ;;  %587 = vst [vmem:[#allocation2 + $0xc0] sm:$0x1] %v586_v24 }
 0x100   : > { %5115 = vmatprep.subr.bf16.mxu1 %v5909_v50  ;;  %5227 = vmatprep.subr.bf16.mxu0 %v5914_v63  ;;  %v617_v50 = vld [vmem:[#allocation2 + $0x68] sm:$0x1]  ;;  %v567_v55 = vld [vmem:[#allocation2 + $0x78] sm:$0x1]  ;;  %v620_v63 = vld [vmem:[#allocation2 + $0x74] sm:$0x1] }
 0x101   : > { %5628 = vmatmul.mubr.bf16.gmra.mrb[8].mxu0 %v5884_v27  ;;  %5644 = vmatmul.mubr.bf16.gmra.mrb[8].mxu1 %v5892_v28  ;;  %v5927_v27 = vld [vmem:[#allocation11 + $0xf8] sm:$0xff]   ;;  %v618_v51 = vsel %vm6702_vm4, 0, %v617_v50  ;;  %v568_v57 = vsel %vm6680_vm2, 0, %v567_v55 }
 0x102   : > { %5631 = vmatprep.mubr.bf16.mxu0 %v5885_v29  ;;  %5647 = vmatprep.mubr.bf16.mxu1 %v5893_v30  ;;  %v5928_v28 = vld [vmem:[#allocation11 + $0xb8] sm:$0xff]   ;;  %v2123_v29 = vsel %vm2111_vm7, %v2118_v25, %v2122_v26  ;;  %v2321_v30 = vrot.slane %v5925_v13, 1  ;;  %619 = vst [vmem:[#allocation2 + $0x68] sm:$0x1] %v618_v51  ;;  %569 = vst [vmem:[#allocation2 + $0x78] sm:$0x1] %v568_v57 }
 0x103   : > { %5116 = vmatpush3.bf16.msra.mxu1 %v5911_v54  ;;  %5228 = vmatpush3.bf16.msra.mxu0 %v5916_v5  ;;  %v615_v54 = vsel %vm6702_vm4, 0, %v614_v53  ;;  %v5948_v5 = vld [vmem:[#allocation11 + $0x158] sm:$0xff]   ;;  %v5964_v26 = vld [vmem:[#allocation11 + $0x168] sm:$0xff]  }
 0x104   : > { %5117 = vmatprep.subr.bf16.mxu1 %v5913_v62  ;;  %5229 = vmatprep.subr.bf16.mxu0 %v5918_v8  ;;  %616 = vst [vmem:[#allocation2 + $0x5c] sm:$0x1] %v615_v54  ;;  %v5943_v62 = vld [vmem:[#allocation11 + $0x110] sm:$0xff]   ;;  %v5949_v8 = vld [vmem:[#allocation11 + $0x118] sm:$0xff]  }
 0x105   : > { %v582_v25 = vld [vmem:[#allocation2 + $0xb4] sm:$0x1] }
 0x107   : > { %5118 = vmatpush3.bf16.msra.mxu1 %v5915_v0  ;;  %5230 = vmatpush3.bf16.msra.mxu0 %v5920_v12  ;;  %v621_v0 = vsel %vm6702_vm4, 0, %v620_v63  ;;  %v5954_v12 = vld [vmem:[#allocation11 + $0x1c0] sm:$0xff]  }
 0x108   : > { %5119 = vmatprep.subr.bf16.mxu1 %v5917_v7  ;;  %5231 = vmatprep.subr.bf16.mxu0 %v5922_v17  ;;  %622 = vst [vmem:[#allocation2 + $0x74] sm:$0x1] %v621_v0  ;;  %v630_v7 = vsel %vm6702_vm4, 0, %v629_v6  ;;  %v635_v17 = vld [vmem:[#allocation2 + $0xb0] sm:$0x1] }
 0x109   : > { %5632 = vmatmul.mubr.bf16.gmra.mrb[12].mxu0 %v5886_v31  ;;  %5648 = vmatmul.mubr.bf16.gmra.mrb[12].mxu1 %v5894_v32  ;;  %v2322_v31 = vrot.slane %v5926_v14, 1  ;;  %v555_v32 = vld [vmem:[#allocation2 + $0x48] sm:$0x1]  ;;  %631 = vst [vmem:[#allocation2 + $0x98] sm:$0x1] %v630_v7  ;;  %v636_v19 = vsel %vm6702_vm4, 0, %v635_v17 }
 0x10a   : > { %3052 = vmatprep.mubr.bf16.mxu1 %v2123_v29  ;;  %v556_v34 = vsel %vm6680_vm2, 0, %v555_v32  ;;  %637 = vst [vmem:[#allocation2 + $0xb0] sm:$0x1] %v636_v19  ;;  %v1467_v7 = vld [vmem:[#allocation2 + $0x18] sm:$0xf] }
 0x10b   : > { %5120 = vmatpush3.bf16.msra.mxu1 %v5919_v11  ;;  %5232 = vmatpush3.bf16.msra.mxu0 %v5924_v22  ;;  %v6735_v33 = vsel %vm2320_vm8, %v2321_v30, %v2322_v31  ;;  %557 = vst [vmem:[#allocation2 + $0x48] sm:$0x1] %v556_v34  ;;  %v627_v11 = vsel %vm6702_vm4, 0, %v626_v9  ;;  %v5965_v30 = vld [vmem:[#allocation11 + $0x128] sm:$0xff]   ;;  %v638_v31 = vld [vmem:[#allocation2 + $0xbc] sm:$0x1] }
 0x10c   : > { %5121 = vmatprep.subr.bf16.mxu1 %v5921_v16  ;;  %5233 = vmatprep.subr.bf16.mxu0 %v5927_v27  ;;  %628 = vst [vmem:[#allocation2 + $0x8c] sm:$0x1] %v627_v11  ;;  %v5956_v16 = vld [vmem:[#allocation11 + $0x160] sm:$0xff]   ;;  %v641_v27 = vld [vmem:[#allocation2 + $0xc8] sm:$0x1]  ;;  %v639_v32 = vsel %vm6702_vm4, 0, %v638_v31 }
 0x10d   : > { %v642_v29 = vsel %vm6702_vm4, 0, %v641_v27  ;;  %640 = vst [vmem:[#allocation2 + $0xbc] sm:$0x1] %v639_v32  ;;  %v5972_v34 = vld [vmem:[#allocation11 + $0x170] sm:$0xff]  }
 0x10e   : > { %643 = vst [vmem:[#allocation2 + $0xc8] sm:$0x1] %v642_v29 }
 0x10f   : > { %5122 = vmatpush3.bf16.msra.mxu1 %v5923_v21  ;;  %5234 = vmatpush3.bf16.msra.mxu0 %v5928_v28  ;;  %v632_v21 = vld [vmem:[#allocation2 + $0xa4] sm:$0x1]  ;;  %v583_v28 = vsel %vm6680_vm2, 0, %v582_v25 }
 0x110   : > { %5331 = vmatprep.subr.bf16.mxu1 %v5929_v36  ;;  %5443 = vmatprep.subr.bf16.mxu0 %v5954_v12  ;;  %v633_v22 = vsel %vm6702_vm4, 0, %v632_v21  ;;  %584 = vst [vmem:[#allocation2 + $0xb4] sm:$0x1] %v583_v28  ;;  %v5973_v36 = vld [vmem:[#allocation11 + $0x130] sm:$0xff]  }
 0x111   : > { %634 = vst [vmem:[#allocation2 + $0xa4] sm:$0x1] %v633_v22 }
 0x112   : > { %3053 = vmatmul.mubr.bf16.vlgmr.msra.gmra.mrb[16].mxu1 %v5925_v13  ;;  %v579_v13 = vld [vmem:[#allocation2 + $0xa8] sm:$0x1] }
 0x113   : > { %5332 = vmatpush3.bf16.msra.mxu1 %v5931_v43  ;;  %v580_v14 = vsel %vm6680_vm2, 0, %v579_v13 }
 0x114   : > { %5333 = vmatprep.subr.bf16.mxu1 %v5936_v49  ;;  %581 = vst [vmem:[#allocation2 + $0xa8] sm:$0x1] %v580_v14 }
 0x117   : > { %5334 = vmatpush3.bf16.msra.mxu1 %v5937_v52 }
 0x118   : > { %5335 = vmatprep.subr.bf16.mxu1 %v5942_v59 }
 0x11b   : > { %5336 = vmatpush3.bf16.msra.mxu1 %v5943_v62 }
 0x11c   : > { %5337 = vmatprep.subr.bf16.mxu1 %v5948_v5 }
 0x11f   : > { %5338 = vmatpush3.bf16.msra.mxu1 %v5949_v8 }
 0x120   : > { %5339 = vmatprep.subr.bf16.mxu1 %v5956_v16  ;;  %v1460_v16 = vld [vmem:[#allocation2 + $0xc] sm:$0xf] }
 0x123   : > { %5340 = vmatpush3.bf16.msra.mxu1 %v5957_v20 }
 0x124   : > { %5341 = vmatprep.subr.bf16.mxu1 %v5964_v26 }
 0x127   : > { %5342 = vmatpush3.bf16.msra.mxu1 %v5965_v30 }
 0x128   : > { %5343 = vmatprep.subr.bf16.mxu1 %v5972_v34 }
 0x12b   : > { %5344 = vmatpush3.bf16.msra.mxu1 %v5973_v36  ;;  %v5980_v36 = vld [vmem:[#allocation11 + $0x178] sm:$0xff]  }
 0x12c   : > { %5345 = vmatprep.subr.bf16.mxu1 %v5980_v36 }
 0x1c4   : > { %v5621_v38 = vpop.f32.mrb[0].mxu0  ;;  %v5637_v39 = vpop.f32.mrb[0].mxu1 }
 0x1c5   : > { %v889_v40 = vadd.f32 %v5621_v38, %v6788_v35  ;;  %v880_v41 = vpop.f32.mrb[1].mxu0  ;;  %v953_v42 = vadd.f32 %v5637_v39, %v6788_v35  ;;  %v944_v43 = vpop.f32.mrb[1].mxu1 }
 0x1c6   : > { %v881_v44 = vadd.f32 %v6788_v35, %v880_v41  ;;  %v5622_v45 = vpop.f32.mrb[2].mxu0  ;;  %v945_v47 = vadd.f32 %v6788_v35, %v944_v43  ;;  %v5638_v48 = vpop.f32.mrb[2].mxu1  ;;  %v1471_v41 = vld [vmem:[#allocation2 + $0x20] sm:$0x1] }
 0x1c7   : > { %v1009_v49 = vmax.f32 %v889_v40, 0.0  ;;  %v892_v50 = vadd.f32 %v5622_v45, %v6788_v35  ;;  %v883_v51 = vpop.f32.mrb[3].mxu0  ;;  %v1025_v52 = vmax.f32 %v953_v42, 0.0  ;;  %v6796_v53 = vadd.f32 %v5638_v48, %v6788_v35  ;;  %v947_v54 = vpop.f32.mrb[3].mxu1  ;;  %v1464_v48 = vld [vmem:[#allocation2 + $0x14] sm:$0x1] }
 0x1c8   : > { %v1007_v55 = vmax.f32 %v881_v44, 0.0  ;;  %v884_v56 = vadd.f32 %v6788_v35, %v883_v51  ;;  %v1023_v57 = vmax.f32 %v945_v47, 0.0  ;;  %v6800_v58 = vadd.f32 %v6788_v35, %v947_v54 }
 0x1c9   : > { %v4841_v59 = vpack.c.bf16 %v1009_v49, %v1009_v49  ;;  %v1010_v60 = vmax.f32 %v892_v50, 0.0  ;;  %v6802_v61 = vpack.c.bf16 %v1025_v52, %v1025_v52  ;;  %v1026_v62 = vmax.f32 %v6796_v53, 0.0 }
 0x1ca   : > { %v4839_v63 = vpack.c.bf16 %v1007_v55, %v1007_v55  ;;  %v1008_v0 = vmax.f32 %v884_v56, 0.0  ;;  %v6805_v1 = vpack.c.bf16 %v1023_v57, %v1023_v57  ;;  %v1024_v2 = vmax.f32 %v6800_v58, 0.0 }
 0x1cb   : > { %v1155_v3 = vshrl.u32 %v4841_v59, 16  ;;  %v1158_v4 = vshll.u32 %v4841_v59, 16  ;;  %v4842_v5 = vpack.c.bf16 %v1010_v60, %v1010_v60  ;;  %v1291_v6 = vshrl.u32 %v6802_v61, 16  ;;  %v5981_v60 = vld [vmem:[#allocation11 + $0x138] sm:$0xff]  }
 0x1cc   : > { %v1138_v8 = vshrl.u32 %v4839_v63, 16  ;;  %v1141_v9 = vshll.u32 %v4839_v63, 16  ;;  %v4840_v11 = vpack.c.bf16 %v1008_v0, %v1008_v0  ;;  %v5625_v12 = vpop.f32.mrb[4].mxu0  ;;  %v1294_v13 = vshll.u32 %v6802_v61, 16  ;;  %v6810_v14 = vpop.f32.mrb[4].mxu1  ;;  %5346 = vmatpush3.bf16.msra.mxu1 %v5981_v60 }
 0x1cd   : > { %v1157_v15 = vrot.slane %v1155_v3, 7  ;;  %v1163_v17 = vshrl.u32 %v4842_v5, 16  ;;  %v1166_v18 = vshll.u32 %v4842_v5, 16  ;;  %v905_v19 = vadd.f32 %v5625_v12, %v6788_v35  ;;  %v896_v20 = vpop.f32.mrb[5].mxu0  ;;  %v6813_v21 = vpop.f32.mrb[5].mxu1 }
 0x1ce   : > { %v1140_v22 = vrot.slane %v1138_v8, 7  ;;  %v1146_v23 = vshrl.u32 %v4840_v11, 16  ;;  %v1149_v24 = vshll.u32 %v4840_v11, 16  ;;  %v897_v25 = vadd.f32 %v6788_v35, %v896_v20  ;;  %v5626_v26 = vpop.f32.mrb[6].mxu0  ;;  %v6816_v27 = vpop.f32.mrb[6].mxu1 }
 0x1cf   : > { %v1160_v28 = vor.u32 %v1158_v4, %v1157_v15  ;;  %v1161_v29 = vrot.slane %v1157_v15, 4  ;;  %v1165_v30 = vrot.slane %v1163_v17, 7  ;;  %v1013_v31 = vmax.f32 %v905_v19, 0.0  ;;  %v899_v32 = vpop.f32.mrb[7].mxu0  ;;  %v6818_v34 = vpop.f32.mrb[7].mxu1 }
 0x1d0   : > { %v1143_v38 = vor.u32 %v1141_v9, %v1140_v22  ;;  %v1144_v39 = vrot.slane %v1140_v22, 4  ;;  %v1148_v42 = vrot.slane %v1146_v23, 7  ;;  %v1011_v43 = vmax.f32 %v897_v25, 0.0  ;;  %v1481_v3 = vld [vmem:[#allocation2 + $0x30] sm:$0xf] }
 0x1d1   : > { %v1468_v44 = vsel %vm6711_vm6, %v1160_v28, %v1467_v7  ;;  %v1168_v45 = vor.u32 %v1166_v18, %v1165_v30  ;;  %v1170_v47 = vrot.slane %v1165_v30, 4  ;;  %v4845_v49 = vpack.c.bf16 %v1013_v31, %v1013_v31  ;;  %v1474_v11 = vld [vmem:[#allocation2 + $0x24] sm:$0xf] }
 0x1d2   : > { %1469 = vst [vmem:[#allocation2 + $0x18] sm:$0xf] %v1468_v44  ;;  %v1461_v50 = vsel %vm6711_vm6, %v1143_v38, %v1460_v16  ;;  %v1151_v51 = vor.u32 %v1149_v24, %v1148_v42  ;;  %v1153_v52 = vrot.slane %v1148_v42, 4  ;;  %v4843_v54 = vpack.c.bf16 %v1011_v43, %v1011_v43 }
 0x1d3   : > { %1462 = vst [vmem:[#allocation2 + $0xc] sm:$0xf] %v1461_v50  ;;  %v1169_v55 = vsel %vm6822_vm10, %v1161_v29, %v1168_v45  ;;  %v1472_v56 = vsel %vm6680_vm2, %v1170_v47, %v1471_v41  ;;  %v1189_v57 = vshrl.u32 %v4845_v49, 16  ;;  %v1192_v59 = vshll.u32 %v4845_v49, 16 }
 0x1d4   : > { %1470 = vst [vmem:[#allocation2 + $0x1c] sm:$0xf] %v1169_v55  ;;  %1473 = vst [vmem:[#allocation2 + $0x20] sm:$0x1] %v1472_v56  ;;  %v1152_v63 = vsel %vm6822_vm10, %v1144_v39, %v1151_v51  ;;  %v1465_v0 = vsel %vm6680_vm2, %v1153_v52, %v1464_v48  ;;  %v1172_v4 = vshrl.u32 %v4843_v54, 16  ;;  %v1175_v5 = vshll.u32 %v4843_v54, 16 }
 0x1d5   : > { %v5629_v7 = vpop.f32.mrb[8].mxu0  ;;  %v6838_v8 = vpop.f32.mrb[8].mxu1  ;;  %1463 = vst [vmem:[#allocation2 + $0x10] sm:$0xf] %v1152_v63  ;;  %1466 = vst [vmem:[#allocation2 + $0x14] sm:$0x1] %v1465_v0  ;;  %v908_v12 = vadd.f32 %v5626_v26, %v6788_v35  ;;  %v900_v15 = vadd.f32 %v6788_v35, %v899_v32 }
 0x1d6   : > { %v6840_v9 = vrot.slane %v1189_v57, 7  ;;  %v921_v16 = vadd.f32 %v5629_v7, %v6788_v35  ;;  %v912_v17 = vpop.f32.mrb[9].mxu0  ;;  %v6845_v18 = vpop.f32.mrb[9].mxu1  ;;  %v6847_v19 = vrot.slane %v1172_v4, 7  ;;  %v6852_v23 = vrot.slane %v1291_v6, 7  ;;  %v5955_v0 = vld [vmem:[#allocation11 + $0x180] sm:$0xff]  }
 0x1d7   : > { %v913_v20 = vadd.f32 %v6788_v35, %v912_v17  ;;  %v5630_v22 = vpop.f32.mrb[10].mxu0  ;;  %v1274_v24 = vshrl.u32 %v6805_v1, 16  ;;  %v6855_v25 = vpop.f32.mrb[10].mxu1  ;;  %v1014_v29 = vmax.f32 %v908_v12, 0.0  ;;  %v1012_v30 = vmax.f32 %v900_v15, 0.0 }
 0x1d8   : > { %v1194_v26 = vor.u32 %v1192_v59, %v6840_v9  ;;  %v1195_v28 = vrot.slane %v6840_v9, 4  ;;  %v915_v31 = vpop.f32.mrb[11].mxu0  ;;  %v6859_v32 = vpop.f32.mrb[11].mxu1  ;;  %v1177_v36 = vor.u32 %v1175_v5, %v6847_v19  ;;  %v1178_v38 = vrot.slane %v6847_v19, 4  ;;  %v1485_v55 = vld [vmem:[#allocation2 + $0x38] sm:$0x1] }
 0x1d9   : > { %v1017_v39 = vmax.f32 %v921_v16, 0.0  ;;  %v1015_v6 = vmax.f32 %v913_v20, 0.0  ;;  %v4846_v42 = vpack.c.bf16 %v1014_v29, %v1014_v29  ;;  %v4844_v43 = vpack.c.bf16 %v1012_v30, %v1012_v30  ;;  %v1478_v56 = vld [vmem:[#allocation2 + $0x2c] sm:$0x1]  ;;  %v1495_v5 = vld [vmem:[#allocation2 + $0x48] sm:$0xf] }
 0x1da   : > { %v1482_v41 = vsel %vm6711_vm6, %v1194_v26, %v1481_v3  ;;  %v924_v44 = vadd.f32 %v5630_v22, %v6788_v35  ;;  %v1475_v45 = vsel %vm6711_vm6, %v1177_v36, %v1474_v11  ;;  %v916_v49 = vadd.f32 %v6788_v35, %v915_v31  ;;  %v1488_v7 = vld [vmem:[#allocation2 + $0x3c] sm:$0xf]  ;;  %v5962_v16 = vld [vmem:[#allocation11 + $0x1c8] sm:$0xff]  }
 0x1db   : > { %1483 = vst [vmem:[#allocation2 + $0x30] sm:$0xf] %v1482_v41  ;;  %v4849_v47 = vpack.c.bf16 %v1017_v39, %v1017_v39  ;;  %v4847_v48 = vpack.c.bf16 %v1015_v6, %v1015_v6  ;;  %1476 = vst [vmem:[#allocation2 + $0x24] sm:$0xf] %v1475_v45  ;;  %v1197_v50 = vshrl.u32 %v4846_v42, 16  ;;  %v1200_v51 = vshll.u32 %v4846_v42, 16 }
 0x1dc   : > { %v1180_v52 = vshrl.u32 %v4844_v43, 16  ;;  %v1183_v54 = vshll.u32 %v4844_v43, 16  ;;  %v1018_v9 = vmax.f32 %v924_v44, 0.0  ;;  %v6869_v11 = vld [vmem:[#allocation2 + $0xc] sm:$0xff]   ;;  %v1016_v12 = vmax.f32 %v916_v49, 0.0  ;;  %v6871_v15 = vld [vmem:[#allocation2 + $0x18] sm:$0xff]  }
 0x1dd   : > { %v1223_v57 = vshrl.u32 %v4849_v47, 16  ;;  %v1226_v59 = vshll.u32 %v4849_v47, 16  ;;  %v1206_v60 = vshrl.u32 %v4847_v48, 16  ;;  %v1209_v63 = vshll.u32 %v4847_v48, 16  ;;  %3213 = vmatprep.mubr.bf16.mxu0 %v6869_v11  ;;  %v5633_v39 = vpop.f32.mrb[12].mxu0 }
 0x1de   : > { %v1199_v3 = vrot.slane %v1197_v50, 7  ;;  %v1182_v4 = vrot.slane %v1180_v52, 7  ;;  %v6880_v20 = vor.u32 %v1294_v13, %v6852_v23  ;;  %v6885_v22 = vpack.c.bf16 %v1026_v62, %v1026_v62  ;;  %v6888_v36 = vld [vmem:[#allocation2 + $0x14] ss:$0 sps:$4 sm:$0x11]   ;;  %3214 = vmatmul.mubr.bf16.vlgmr.msra.gmra.mrb[16].mxu0 %v6735_v33  ;;  %v6897_v41 = vpop.f32.mrb[13].mxu0 }
 0x1df   : > { %v6873_v17 = vrot.slane %v1223_v57, 7  ;;  %v6875_v19 = vrot.slane %v1206_v60, 7  ;;  %v6895_v62 = vld [vmem:[#allocation2 + $0x20] ss:$0 sps:$4 sm:$0x11]   ;;  %3221 = vmatprep.mubr.bf16.mxu0 %v6871_v15  ;;  %v6908_v47 = vpop.f32.mrb[14].mxu0  ;;  %v4848_v49 = vpack.c.bf16 %v1016_v12, %v1016_v12  ;;  %5444 = vmatpush3.bf16.msra.mxu0 %v5955_v0 }
 0x1e0   : > { %v1202_v26 = vor.u32 %v1200_v51, %v1199_v3  ;;  %v1204_v29 = vrot.slane %v1199_v3, 4  ;;  %v1185_v30 = vor.u32 %v1183_v54, %v1182_v4  ;;  %v1187_v31 = vrot.slane %v1182_v4, 4  ;;  %v6910_v33 = vpop.f32.mrb[12].mxu1  ;;  %v6916_v50 = vpop.f32.mrb[15].mxu0  ;;  %v5963_v51 = vld [vmem:[#allocation11 + $0x188] sm:$0xff]   ;;  %v5970_v54 = vld [vmem:[#allocation11 + $0x1d0] sm:$0xff]   ;;  %5445 = vmatprep.subr.bf16.mxu0 %v5962_v16 }
 0x1e1   : > { %v1228_v6 = vor.u32 %v1226_v59, %v6873_v17  ;;  %v1229_v61 = vrot.slane %v6873_v17, 4  ;;  %v1211_v13 = vor.u32 %v1209_v63, %v6875_v19  ;;  %v1212_v53 = vrot.slane %v6875_v19, 4  ;;  %v6918_v52 = vpop.f32.mrb[13].mxu1  ;;  %v5992_v63 = vld [vmem:[#allocation11 + $0x200] sm:$0xff]  }
 0x1e2   : > { %v1203_v42 = vsel %vm6822_vm10, %v1195_v28, %v1202_v26  ;;  %v1486_v43 = vsel %vm6680_vm2, %v1204_v29, %v1485_v55  ;;  %v1186_v44 = vsel %vm6822_vm10, %v1178_v38, %v1185_v30  ;;  %v1479_v45 = vsel %vm6680_vm2, %v1187_v31, %v1478_v56  ;;  %v6924_v60 = vpop.f32.mrb[14].mxu1  ;;  %5651 = vmatprep.subr.bf16.mxu1 %v5992_v63 }
 0x1e3   : > { %1484 = vst [vmem:[#allocation2 + $0x34] sm:$0xf] %v1203_v42  ;;  %1487 = vst [vmem:[#allocation2 + $0x38] sm:$0x1] %v1486_v43  ;;  %v1496_v28 = vsel %vm6711_vm6, %v1228_v6, %v1495_v5  ;;  %v1489_v48 = vsel %vm6711_vm6, %v1211_v13, %v1488_v7  ;;  %v4850_v38 = vpack.c.bf16 %v1018_v9, %v1018_v9  ;;  %v2125_v55 = vshrl.u32 %v6869_v11, 16  ;;  %v6926_v7 = vpop.f32.mrb[15].mxu1 }
 0x1e4   : > { %1477 = vst [vmem:[#allocation2 + $0x28] sm:$0xf] %v1186_v44  ;;  %1480 = vst [vmem:[#allocation2 + $0x2c] sm:$0x1] %v1479_v45  ;;  %v2127_v56 = vshll.u32 %v6869_v11, 16  ;;  %v2132_v57 = vshll.u32 %v6888_v36, 16  ;;  %5446 = vmatpush3.bf16.msra.mxu0 %v5963_v51 }
 0x1e5   : > { %1497 = vst [vmem:[#allocation2 + $0x48] sm:$0xf] %v1496_v28  ;;  %1490 = vst [vmem:[#allocation2 + $0x3c] sm:$0xf] %v1489_v48  ;;  %v2137_v59 = vshrl.u32 %v6871_v15, 16  ;;  %v1231_v3 = vshrl.u32 %v4850_v38, 16  ;;  %v937_v28 = vadd.f32 %v5633_v39, %v6788_v35  ;;  %5447 = vmatprep.subr.bf16.mxu0 %v5970_v54 }
 0x1e6   : > { %v1234_v0 = vshll.u32 %v4850_v38, 16  ;;  %v1214_v4 = vshrl.u32 %v4848_v49, 16  ;;  %v1217_v5 = vshll.u32 %v4848_v49, 16  ;;  %v2129_v9 = vrot.slane %v2127_v56, 1  ;;  %v1499_v13 = vld [vmem:[#allocation2 + $0x50] sm:$0x1] }
 0x1e7   : > { %v2134_v12 = vrot.slane %v2132_v57, 1  ;;  %v2139_v26 = vshll.u32 %v6871_v15, 16  ;;  %v2144_v29 = vshll.u32 %v6895_v62, 16  ;;  %v1233_v30 = vrot.slane %v1231_v3, 7  ;;  %v1492_v42 = vld [vmem:[#allocation2 + $0x44] sm:$0x1] }
 0x1e8   : > { %v1216_v31 = vrot.slane %v1214_v4, 7  ;;  %v2324_v16 = vrot.slane %v6869_v11, 1  ;;  %v2325_v6 = vrot.slane %v6888_v36, 1  ;;  %v2130_v43 = vor.u32 %v2129_v9, %v2125_v55  ;;  %v5971_v57 = vld [vmem:[#allocation11 + $0x190] sm:$0xff]  }
 0x1e9   : > { %v2141_v44 = vrot.slane %v2139_v26, 1  ;;  %v2146_v45 = vrot.slane %v2144_v29, 1  ;;  %v1236_v48 = vor.u32 %v1234_v0, %v1233_v30  ;;  %v1238_v38 = vrot.slane %v1233_v30, 4  ;;  %5448 = vmatpush3.bf16.msra.mxu0 %v5971_v57 }
 0x1ea   : > { %v1219_v49 = vor.u32 %v1217_v5, %v1216_v31  ;;  %v1221_v56 = vrot.slane %v1216_v31, 4  ;;  %v6934_v63 = vsel %vm2111_vm7, %v2130_v43, %v2134_v12  ;;  %v6937_v36 = vsel %vm2320_vm8, %v2324_v16, %v2325_v6  ;;  %v5978_v5 = vld [vmem:[#allocation11 + $0x1d8] sm:$0xff]  }
 0x1eb   : > { %v2142_v3 = vor.u32 %v2141_v44, %v2137_v59  ;;  %v6939_v51 = vld [vmem:[#allocation2 + $0x24] sm:$0xff]   ;;  %v1021_v55 = vmax.f32 %v937_v28, 0.0  ;;  %v1237_v39 = vsel %vm6822_vm10, %v1229_v61, %v1236_v48  ;;  %v1500_v54 = vsel %vm6680_vm2, %v1238_v38, %v1499_v13  ;;  %3060 = vmatprep.mubr.bf16.mxu1 %v6934_v63  ;;  %v6954_v4 = vld [vmem:[#allocation2 + $0x2c] ss:$0 sps:$4 sm:$0x11]   ;;  %3222 = vmatmul.mubr.bf16.gmra.mrb[20].mxu0 %v6937_v36  ;;  %v6964_v9 = vld [vmem:[#allocation2 + $0x30] sm:$0xff]  }
 0x1ec   : > { %v1220_v0 = vsel %vm6822_vm10, %v1212_v53, %v1219_v49  ;;  %v1493_v59 = vsel %vm6680_vm2, %v1221_v56, %v1492_v42  ;;  %1498 = vst [vmem:[#allocation2 + $0x4c] sm:$0xf] %v1237_v39  ;;  %1501 = vst [vmem:[#allocation2 + $0x50] sm:$0x1] %v1500_v54  ;;  %3061 = vmatmul.mubr.bf16.gmra.mrb[20].mxu1 %v6869_v11  ;;  %v929_v61 = vadd.f32 %v6788_v35, %v6897_v41  ;;  %v5979_v6 = vld [vmem:[#allocation11 + $0x198] sm:$0xff]  }
 0x1ed   : > { %1491 = vst [vmem:[#allocation2 + $0x40] sm:$0xf] %v1220_v0  ;;  %1494 = vst [vmem:[#allocation2 + $0x44] sm:$0x1] %v1493_v59  ;;  %v6958_v17 = vsel %vm2111_vm7, %v2142_v3, %v2146_v45  ;;  %v4853_v19 = vpack.c.bf16 %v1021_v55, %v1021_v55  ;;  %v2149_v53 = vshrl.u32 %v6939_v51, 16  ;;  %3229 = vmatprep.mubr.bf16.mxu0 %v6939_v51  ;;  %v2151_v26 = vshll.u32 %v6939_v51, 16 }
 0x1ee   : > { %3068 = vmatprep.mubr.bf16.mxu1 %v6958_v17  ;;  %v940_v11 = vadd.f32 %v6908_v47, %v6788_v35  ;;  %v932_v12 = vadd.f32 %v6788_v35, %v6916_v50  ;;  %v2156_v29 = vshll.u32 %v6954_v4, 16  ;;  %v1019_v31 = vmax.f32 %v929_v61, 0.0  ;;  %5449 = vmatprep.subr.bf16.mxu0 %v5978_v5  ;;  %v5983_v47 = vld [vmem:[#allocation11 + $0x1e0] sm:$0xff]   ;;  %v1509_v38 = vld [vmem:[#allocation2 + $0x60] sm:$0xf] }
 0x1ef   : > { %v1257_v30 = vshrl.u32 %v4853_v19, 16  ;;  %v1260_v41 = vshll.u32 %v4853_v19, 16  ;;  %v2327_v16 = vrot.slane %v6871_v15, 1  ;;  %v2153_v43 = vrot.slane %v2151_v26, 1  ;;  %5450 = vmatpush3.bf16.msra.mxu0 %v5979_v6  ;;  %v5985_v5 = vld [vmem:[#allocation11 + $0x1a0] sm:$0xff]   ;;  %v5986_v19 = vld [vmem:[#allocation11 + $0x1e8] sm:$0xff]  }
 0x1f0   : > { %v1022_v13 = vmax.f32 %v940_v11, 0.0  ;;  %v1020_v42 = vmax.f32 %v932_v12, 0.0  ;;  %v2158_v44 = vrot.slane %v2156_v29, 1  ;;  %v4851_v28 = vpack.c.bf16 %v1019_v31, %v1019_v31  ;;  %v6977_v55 = vld [vmem:[#allocation2 + $0x38] ss:$0 sps:$4 sm:$0x11]   ;;  %5451 = vmatprep.subr.bf16.mxu0 %v5983_v47 }
 0x1f1   : > { %v1259_v45 = vrot.slane %v1257_v30, 7  ;;  %v2328_v50 = vrot.slane %v6895_v62, 1  ;;  %v2161_v48 = vshrl.u32 %v6964_v9, 16  ;;  %v2154_v3 = vor.u32 %v2153_v43, %v2149_v53  ;;  %v1502_v61 = vld [vmem:[#allocation2 + $0x54] sm:$0xf] }
 0x1f2   : > { %v4854_v49 = vpack.c.bf16 %v1022_v13, %v1022_v13  ;;  %v4852_v56 = vpack.c.bf16 %v1020_v42, %v1020_v42  ;;  %v2163_v57 = vshll.u32 %v6964_v9, 16  ;;  %v1240_v0 = vshrl.u32 %v4851_v28, 16  ;;  %v1513_v30 = vld [vmem:[#allocation2 + $0x68] sm:$0x1]  ;;  %v1506_v42 = vld [vmem:[#allocation2 + $0x5c] sm:$0x1] }
 0x1f3   : > { %v1262_v39 = vor.u32 %v1260_v41, %v1259_v45  ;;  %v1263_v54 = vrot.slane %v1259_v45, 4  ;;  %v1243_v59 = vshll.u32 %v4851_v28, 16  ;;  %v6984_v41 = vsel %vm2111_vm7, %v2154_v3, %v2158_v44  ;;  %v1523_v44 = vld [vmem:[#allocation2 + $0x78] sm:$0xf]  ;;  %5452 = vmatpush3.bf16.msra.mxu0 %v5985_v5 }
 0x1f4   : > { %v1265_v11 = vshrl.u32 %v4854_v49, 16  ;;  %v1268_v62 = vshll.u32 %v4854_v49, 16  ;;  %v1248_v12 = vshrl.u32 %v4852_v56, 16  ;;  %v1251_v26 = vshll.u32 %v4852_v56, 16  ;;  %3069 = vmatmul.mubr.bf16.gmra.mrb[24].mxu1 %v6871_v15  ;;  %5453 = vmatprep.subr.bf16.mxu0 %v5986_v19 }
 0x1f5   : > { %v1510_v53 = vsel %vm6711_vm6, %v1262_v39, %v1509_v38  ;;  %v1242_v29 = vrot.slane %v1240_v0, 7  ;;  %v6987_v31 = vsel %vm2320_vm8, %v2327_v16, %v2328_v50  ;;  %3076 = vmatprep.mubr.bf16.mxu1 %v6984_v41  ;;  %v2165_v43 = vrot.slane %v2163_v57, 1  ;;  %v5987_v50 = vld [vmem:[#allocation11 + $0x1a8] sm:$0xff]   ;;  %v5988_v39 = vld [vmem:[#allocation11 + $0x1f0] sm:$0xff]  }
 0x1f6   : > { %1511 = vst [vmem:[#allocation2 + $0x60] sm:$0xf] %v1510_v53  ;;  %v1267_v6 = vrot.slane %v1265_v11, 7  ;;  %v1250_v13 = vrot.slane %v1248_v12, 7  ;;  %3230 = vmatmul.mubr.bf16.gmra.mrb[24].mxu0 %v6987_v31  ;;  %v2168_v47 = vshll.u32 %v6977_v55, 16  ;;  %v2330_v15 = vrot.slane %v6939_v51, 1 }
 0x1f7   : > { %v1245_v45 = vor.u32 %v1243_v59, %v1242_v29  ;;  %v1246_v28 = vrot.slane %v1242_v29, 4  ;;  %3237 = vmatprep.mubr.bf16.mxu0 %v6964_v9  ;;  %v2331_v16 = vrot.slane %v6954_v4, 1  ;;  %v2166_v0 = vor.u32 %v2165_v43, %v2161_v48  ;;  %v6997_v11 = vld [vmem:[#allocation2 + $0x3c] sm:$0xff]   ;;  %v6999_v12 = vld [vmem:[#allocation2 + $0x44] ss:$0 sps:$4 sm:$0x11]   ;;  %5454 = vmatpush3.bf16.msra.mxu0 %v5987_v50 }
 0x1f8   : > { %v1270_v38 = vor.u32 %v1268_v62, %v1267_v6  ;;  %v1272_v49 = vrot.slane %v1267_v6, 4  ;;  %v1253_v56 = vor.u32 %v1251_v26, %v1250_v13  ;;  %v1255_v3 = vrot.slane %v1250_v13, 4  ;;  %v1516_v53 = vld [vmem:[#allocation2 + $0x6c] sm:$0xf]  ;;  %5455 = vmatprep.subr.bf16.mxu0 %v5988_v39 }
 0x1f9   : > { %v1503_v57 = vsel %vm6711_vm6, %v1245_v45, %v1502_v61  ;;  %v2170_v59 = vrot.slane %v2168_v47, 1  ;;  %v7013_v61 = vsel %vm2320_vm8, %v2330_v15, %v2331_v16  ;;  %v1276_v26 = vrot.slane %v1274_v24, 7  ;;  %v5989_v29 = vld [vmem:[#allocation11 + $0x1b0] sm:$0xff]   ;;  %v1527_v47 = vld [vmem:[#allocation2 + $0x80] sm:$0x1] }
 0x1fa   : > { %1504 = vst [vmem:[#allocation2 + $0x54] sm:$0xf] %v1503_v57  ;;  %v1271_v4 = vsel %vm6822_vm10, %v1263_v54, %v1270_v38  ;;  %v1514_v5 = vsel %vm6680_vm2, %v1272_v49, %v1513_v30  ;;  %v1254_v19 = vsel %vm6822_vm10, %v1246_v28, %v1253_v56  ;;  %v1507_v62 = vsel %vm6680_vm2, %v1255_v3, %v1506_v42  ;;  %v7026_v43 = vld [vmem:[#allocation2 + $0x48] sm:$0xff]   ;;  %v7035_v16 = vld [vmem:[#allocation2 + $0x50] ss:$0 sps:$4 sm:$0x11]  }
 0x1fb   : > { %1512 = vst [vmem:[#allocation2 + $0x64] sm:$0xf] %v1271_v4  ;;  %1515 = vst [vmem:[#allocation2 + $0x68] sm:$0x1] %v1514_v5  ;;  %v7010_v48 = vsel %vm2111_vm7, %v2166_v0, %v2170_v59  ;;  %v1524_v54 = vsel %vm6711_vm6, %v6880_v20, %v1523_v44  ;;  %v1277_v30 = vshll.u32 %v6805_v1, 16  ;;  %v1299_v6 = vshrl.u32 %v6885_v22, 16  ;;  %5456 = vmatpush3.bf16.msra.mxu0 %v5989_v29 }
 0x1fc   : > { %1505 = vst [vmem:[#allocation2 + $0x58] sm:$0xf] %v1254_v19  ;;  %1508 = vst [vmem:[#allocation2 + $0x5c] sm:$0x1] %v1507_v62  ;;  %v1302_v13 = vshll.u32 %v6885_v22, 16  ;;  %v4856_v42 = vpack.c.bf16 %v1024_v2, %v1024_v2  ;;  %v5990_v20 = vld [vmem:[#allocation11 + $0x1f8] sm:$0xff]   ;;  %3077 = vmatmul.mubr.bf16.gmra.mrb[28].mxu1 %v6939_v51 }
 0x1fd   : > { %1525 = vst [vmem:[#allocation2 + $0x78] sm:$0xf] %v1524_v54  ;;  %v1297_v24 = vrot.slane %v6852_v23, 4  ;;  %v2173_v45 = vshrl.u32 %v6997_v11, 16  ;;  %v2175_v1 = vshll.u32 %v6997_v11, 16  ;;  %v2180_v28 = vshll.u32 %v6999_v12, 16  ;;  %3084 = vmatprep.mubr.bf16.mxu1 %v7010_v48  ;;  %5457 = vmatprep.subr.bf16.mxu0 %v5990_v20 }
 0x1fe   : > { %3238 = vmatmul.mubr.bf16.gmra.mrb[28].mxu0 %v7013_v61  ;;  %v1279_v58 = vor.u32 %v1277_v30, %v1276_v26  ;;  %v1301_v2 = vrot.slane %v1299_v6, 7  ;;  %v1282_v22 = vshrl.u32 %v4856_v42, 16  ;;  %v1285_v15 = vshll.u32 %v4856_v42, 16  ;;  %v5991_v38 = vld [vmem:[#allocation11 + $0x1b8] sm:$0xff]  }
 0x1ff   : > { %3245 = vmatprep.mubr.bf16.mxu0 %v6997_v11  ;;  %v1280_v23 = vrot.slane %v1276_v26, 4  ;;  %v2177_v51 = vrot.slane %v2175_v1, 1  ;;  %v2182_v44 = vrot.slane %v2180_v28, 1  ;;  %v2333_v50 = vrot.slane %v6964_v9, 1  ;;  %v1520_v57 = vld [vmem:[#allocation2 + $0x74] sm:$0x1]  ;;  %5458 = vmatpush3.bf16.msra.mxu0 %v5991_v38 }
 0x200   : > { %v1517_v49 = vsel %vm6711_vm6, %v1279_v58, %v1516_v53  ;;  %v1304_v56 = vor.u32 %v1302_v13, %v1301_v2  ;;  %v1306_v3 = vrot.slane %v1301_v2, 4  ;;  %v1284_v39 = vrot.slane %v1282_v22, 7 }
 0x201   : > { %1518 = vst [vmem:[#allocation2 + $0x6c] sm:$0xf] %v1517_v49  ;;  %v2178_v0 = vor.u32 %v2177_v51, %v2173_v45  ;;  %v2334_v59 = vrot.slane %v6977_v55, 1  ;;  %v2185_v4 = vshrl.u32 %v7026_v43, 16  ;;  %v2187_v5 = vshll.u32 %v7026_v43, 16 }
 0x202   : > { %v1305_v19 = vsel %vm6822_vm10, %v1297_v24, %v1304_v56  ;;  %v1528_v62 = vsel %vm6680_vm2, %v1306_v3, %v1527_v47  ;;  %v1287_v54 = vor.u32 %v1285_v15, %v1284_v39  ;;  %v1289_v26 = vrot.slane %v1284_v39, 4  ;;  %v1537_v39 = vld [vmem:[#allocation2 + $0x90] sm:$0xf] }
 0x203   : > { %1526 = vst [vmem:[#allocation2 + $0x7c] sm:$0xf] %v1305_v19  ;;  %1529 = vst [vmem:[#allocation2 + $0x80] sm:$0x1] %v1528_v62  ;;  %v7049_v53 = vsel %vm2111_vm7, %v2178_v0, %v2182_v44  ;;  %v2189_v29 = vrot.slane %v2187_v5, 1  ;;  %v2192_v55 = vshll.u32 %v7035_v16, 16  ;;  %v969_v24 = vadd.f32 %v6810_v14, %v6788_v35 }
 0x204   : > { %v2336_v30 = vrot.slane %v6997_v11, 1  ;;  %v7053_v6 = vld [vmem:[#allocation2 + $0x54] sm:$0xff]   ;;  %v1288_v13 = vsel %vm6822_vm10, %v1280_v23, %v1287_v54  ;;  %v1521_v42 = vsel %vm6680_vm2, %v1289_v26, %v1520_v57  ;;  %v2337_v20 = vrot.slane %v6999_v12, 1  ;;  %3085 = vmatmul.mubr.bf16.gmra.mrb[32].mxu1 %v6964_v9  ;;  %v7070_v28 = vld [vmem:[#allocation2 + $0x5c] ss:$0 sps:$4 sm:$0x11]  }
 0x205   : > { %1519 = vst [vmem:[#allocation2 + $0x70] sm:$0xf] %v1288_v13  ;;  %1522 = vst [vmem:[#allocation2 + $0x74] sm:$0x1] %v1521_v42  ;;  %v7064_v47 = vsel %vm2320_vm8, %v2333_v50, %v2334_v59  ;;  %v961_v45 = vadd.f32 %v6788_v35, %v6813_v21  ;;  %v972_v1 = vadd.f32 %v6816_v27, %v6788_v35  ;;  %3092 = vmatprep.mubr.bf16.mxu1 %v7049_v53  ;;  %v1530_v62 = vld [vmem:[#allocation2 + $0x84] sm:$0xf] }
 0x206   : > { %3246 = vmatmul.mubr.bf16.gmra.mrb[32].mxu0 %v7064_v47  ;;  %v1029_v14 = vmax.f32 %v969_v24, 0.0  ;;  %v964_v9 = vadd.f32 %v6788_v35, %v6818_v34  ;;  %v2190_v12 = vor.u32 %v2189_v29, %v2185_v4  ;;  %v2199_v21 = vshll.u32 %v7053_v6, 16  ;;  %v1541_v54 = vld [vmem:[#allocation2 + $0x98] sm:$0x1] }
 0x207   : > { %3253 = vmatprep.mubr.bf16.mxu0 %v7026_v43  ;;  %v1027_v58 = vmax.f32 %v961_v45, 0.0  ;;  %v1030_v2 = vmax.f32 %v972_v1, 0.0  ;;  %v2194_v22 = vrot.slane %v2192_v55, 1  ;;  %v7079_v27 = vsel %vm2320_vm8, %v2336_v30, %v2337_v20  ;;  %v7086_v55 = vld [vmem:[#allocation2 + $0x60] sm:$0xff]  }
 0x208   : > { %v4861_v15 = vpack.c.bf16 %v1029_v14, %v1029_v14  ;;  %v1028_v23 = vmax.f32 %v964_v9, 0.0  ;;  %v2197_v50 = vshrl.u32 %v7053_v6, 16  ;;  %v2204_v38 = vshll.u32 %v7070_v28, 16  ;;  %v7092_v9 = vld [vmem:[#allocation2 + $0x68] ss:$0 sps:$4 sm:$0x11]  }
 0x209   : > { %v4859_v51 = vpack.c.bf16 %v1027_v58, %v1027_v58  ;;  %v4862_v44 = vpack.c.bf16 %v1030_v2, %v1030_v2  ;;  %v2201_v3 = vrot.slane %v2199_v21, 1  ;;  %v7084_v5 = vsel %vm2111_vm7, %v2190_v12, %v2194_v22  ;;  %v1534_v22 = vld [vmem:[#allocation2 + $0x8c] sm:$0x1] }
 0x20a   : > { %v1325_v34 = vshrl.u32 %v4861_v15, 16  ;;  %v1328_v49 = vshll.u32 %v4861_v15, 16  ;;  %v4860_v56 = vpack.c.bf16 %v1028_v23, %v1028_v23  ;;  %v2206_v42 = vrot.slane %v2204_v38, 1 }
 0x20b   : > { %v1308_v57 = vshrl.u32 %v4859_v51, 16  ;;  %v1311_v0 = vshll.u32 %v4859_v51, 16  ;;  %v1333_v59 = vshrl.u32 %v4862_v44, 16  ;;  %v1336_v4 = vshll.u32 %v4862_v44, 16 }
 0x20c   : > { %v1327_v19 = vrot.slane %v1325_v34, 7  ;;  %v1316_v26 = vshrl.u32 %v4860_v56, 16  ;;  %v1319_v29 = vshll.u32 %v4860_v56, 16  ;;  %3093 = vmatmul.mubr.bf16.gmra.mrb[36].mxu1 %v6997_v11  ;;  %v2339_v20 = vrot.slane %v7026_v43, 1 }
 0x20d   : > { %v1310_v30 = vrot.slane %v1308_v57, 7  ;;  %v1335_v13 = vrot.slane %v1333_v59, 7  ;;  %3100 = vmatprep.mubr.bf16.mxu1 %v7084_v5  ;;  %v2202_v14 = vor.u32 %v2201_v3, %v2197_v50  ;;  %v2211_v44 = vshll.u32 %v7086_v55, 16 }
 0x20e   : > { %3254 = vmatmul.mubr.bf16.gmra.mrb[36].mxu0 %v7079_v27  ;;  %v1330_v24 = vor.u32 %v1328_v49, %v1327_v19  ;;  %v1331_v45 = vrot.slane %v1327_v19, 4  ;;  %v1318_v1 = vrot.slane %v1316_v26, 7  ;;  %v2340_v49 = vrot.slane %v7035_v16, 1  ;;  %v7114_v16 = vld [vmem:[#allocation2 + $0x6c] sm:$0xff]  }
 0x20f   : > { %3261 = vmatprep.mubr.bf16.mxu0 %v7053_v6  ;;  %v1313_v12 = vor.u32 %v1311_v0, %v1310_v30  ;;  %v1314_v58 = vrot.slane %v1310_v30, 4  ;;  %v1338_v2 = vor.u32 %v1336_v4, %v1335_v13  ;;  %v1340_v21 = vrot.slane %v1335_v13, 4  ;;  %v7124_v26 = vld [vmem:[#allocation2 + $0x74] ss:$0 sps:$4 sm:$0x11]  }
 0x210   : > { %v1538_v15 = vsel %vm6711_vm6, %v1330_v24, %v1537_v39  ;;  %v1321_v23 = vor.u32 %v1319_v29, %v1318_v1  ;;  %v1323_v51 = vrot.slane %v1318_v1, 4  ;;  %v2209_v39 = vshrl.u32 %v7086_v55, 16 }
 0x211   : > { %1539 = vst [vmem:[#allocation2 + $0x90] sm:$0xf] %v1538_v15  ;;  %v1531_v50 = vsel %vm6711_vm6, %v1313_v12, %v1530_v62  ;;  %v1339_v38 = vsel %vm6822_vm10, %v1331_v45, %v1338_v2  ;;  %v1542_v34 = vsel %vm6680_vm2, %v1340_v21, %v1541_v54  ;;  %v2216_v57 = vshll.u32 %v7092_v9, 16 }
 0x212   : > { %1532 = vst [vmem:[#allocation2 + $0x84] sm:$0xf] %v1531_v50  ;;  %1540 = vst [vmem:[#allocation2 + $0x94] sm:$0xf] %v1339_v38  ;;  %v1322_v56 = vsel %vm6822_vm10, %v1314_v58, %v1321_v23  ;;  %v1535_v3 = vsel %vm6680_vm2, %v1323_v51, %v1534_v22  ;;  %v7112_v0 = vsel %vm2111_vm7, %v2202_v14, %v2206_v42  ;;  %v2213_v59 = vrot.slane %v2211_v44, 1 }
 0x213   : > { %1543 = vst [vmem:[#allocation2 + $0x98] sm:$0x1] %v1542_v34  ;;  %1533 = vst [vmem:[#allocation2 + $0x88] sm:$0xf] %v1322_v56  ;;  %v985_v4 = vadd.f32 %v6838_v8, %v6788_v35  ;;  %v977_v19 = vadd.f32 %v6788_v35, %v6845_v18  ;;  %v988_v62 = vadd.f32 %v6855_v25, %v6788_v35  ;;  %v2342_v30 = vrot.slane %v7053_v6, 1 }
 0x214   : > { %1536 = vst [vmem:[#allocation2 + $0x8c] sm:$0x1] %v1535_v3  ;;  %v980_v54 = vadd.f32 %v6788_v35, %v6859_v32  ;;  %3101 = vmatmul.mubr.bf16.gmra.mrb[40].mxu1 %v7026_v43  ;;  %v7128_v29 = vsel %vm2320_vm8, %v2339_v20, %v2340_v49  ;;  %v2218_v18 = vrot.slane %v2216_v57, 1  ;;  %v2343_v25 = vrot.slane %v7070_v28, 1  ;;  %v1551_v28 = vld [vmem:[#allocation2 + $0xa8] sm:$0xf] }
 0x215   : > { %v1033_v13 = vmax.f32 %v985_v4, 0.0  ;;  %v1031_v8 = vmax.f32 %v977_v19, 0.0  ;;  %3108 = vmatprep.mubr.bf16.mxu1 %v7112_v0  ;;  %v1034_v42 = vmax.f32 %v988_v62, 0.0  ;;  %v2214_v32 = vor.u32 %v2213_v59, %v2209_v39  ;;  %v1544_v23 = vld [vmem:[#allocation2 + $0x9c] sm:$0xf] }
 0x216   : > { %3262 = vmatmul.mubr.bf16.gmra.mrb[40].mxu0 %v7128_v29  ;;  %v1032_v35 = vmax.f32 %v980_v54, 0.0  ;;  %v2223_v20 = vshll.u32 %v7114_v16, 16  ;;  %v2221_v12 = vshrl.u32 %v7114_v16, 16  ;;  %v2228_v58 = vshll.u32 %v7124_v26, 16  ;;  %v1555_v3 = vld [vmem:[#allocation2 + $0xb0] sm:$0x1] }
 0x217   : > { %3269 = vmatprep.mubr.bf16.mxu0 %v7086_v55  ;;  %v4865_v24 = vpack.c.bf16 %v1033_v13, %v1033_v13  ;;  %v4863_v45 = vpack.c.bf16 %v1031_v8, %v1031_v8  ;;  %v4866_v1 = vpack.c.bf16 %v1034_v42, %v1034_v42  ;;  %v7139_v34 = vsel %vm2320_vm8, %v2342_v30, %v2343_v25  ;;  %v1548_v39 = vld [vmem:[#allocation2 + $0xa4] sm:$0x1]  ;;  %v7141_v59 = vld [vmem:[#allocation2 + $0x78] sm:$0xff]   ;;  %v7147_v25 = vld [vmem:[#allocation2 + $0x80] ss:$0 sps:$4 sm:$0x11]  }
 0x218   : > { %v4864_v14 = vpack.c.bf16 %v1032_v35, %v1032_v35  ;;  %v2225_v57 = vrot.slane %v2223_v20, 1  ;;  %v7144_v4 = vsel %vm2111_vm7, %v2214_v32, %v2218_v18  ;;  %v2230_v54 = vrot.slane %v2228_v58, 1 }
 0x219   : > { %v1359_v2 = vshrl.u32 %v4865_v24, 16  ;;  %v1362_v21 = vshll.u32 %v4865_v24, 16  ;;  %v1342_v22 = vshrl.u32 %v4863_v45, 16  ;;  %v1345_v15 = vshll.u32 %v4863_v45, 16 }
 0x21a   : > { %v1367_v51 = vshrl.u32 %v4866_v1, 16  ;;  %v1370_v44 = vshll.u32 %v4866_v1, 16  ;;  %v1350_v50 = vshrl.u32 %v4864_v14, 16  ;;  %v1353_v38 = vshll.u32 %v4864_v14, 16  ;;  %v7157_v58 = vld [vmem:[#allocation2 + $0x84] sm:$0xff]  }
 0x21b   : > { %v1361_v49 = vrot.slane %v1359_v2, 7  ;;  %v1344_v56 = vrot.slane %v1342_v22, 7  ;;  %v2226_v1 = vor.u32 %v2225_v57, %v2221_v12  ;;  %v2235_v14 = vshll.u32 %v7141_v59, 16 }
 0x21c   : > { %v1369_v19 = vrot.slane %v1367_v51, 7  ;;  %v1352_v62 = vrot.slane %v1350_v50, 7  ;;  %3109 = vmatmul.mubr.bf16.gmra.mrb[44].mxu1 %v7053_v6  ;;  %v2345_v12 = vrot.slane %v7086_v55, 1  ;;  %v6011_v51 = vld [vmem:[%s7769_s4] ss:$0 sm:$0xff]  ;;  %v2247_v57 = vshll.u32 %v7157_v58, 16 }
 0x21d   : > { %v1364_v13 = vor.u32 %v1362_v21, %v1361_v49  ;;  %v1365_v8 = vrot.slane %v1361_v49, 4  ;;  %v1347_v42 = vor.u32 %v1345_v15, %v1344_v56  ;;  %v1348_v30 = vrot.slane %v1344_v56, 4  ;;  %3116 = vmatprep.mubr.bf16.mxu1 %v7144_v4 }
 0x21e   : > { %3270 = vmatmul.mubr.bf16.gmra.mrb[44].mxu0 %v7139_v34  ;;  %v1372_v35 = vor.u32 %v1370_v44, %v1369_v19  ;;  %v1374_v24 = vrot.slane %v1369_v19, 4  ;;  %v1355_v45 = vor.u32 %v1353_v38, %v1352_v62  ;;  %v1357_v18 = vrot.slane %v1352_v62, 4 }
 0x21f   : > { %3277 = vmatprep.mubr.bf16.mxu0 %v7114_v16  ;;  %v1552_v32 = vsel %vm6711_vm6, %v1364_v13, %v1551_v28  ;;  %v1545_v20 = vsel %vm6711_vm6, %v1347_v42, %v1544_v23  ;;  %v2346_v28 = vrot.slane %v7092_v9, 1  ;;  %v2240_v23 = vshll.u32 %v7147_v25, 16 }
 0x220   : > { %1553 = vst [vmem:[#allocation2 + $0xa8] sm:$0xf] %v1552_v32  ;;  %1546 = vst [vmem:[#allocation2 + $0x9c] sm:$0xf] %v1545_v20  ;;  %v1373_v2 = vsel %vm6822_vm10, %v1365_v8, %v1372_v35  ;;  %v1556_v21 = vsel %vm6680_vm2, %v1374_v24, %v1555_v3  ;;  %v1356_v22 = vsel %vm6822_vm10, %v1348_v30, %v1355_v45  ;;  %v2233_v3 = vshrl.u32 %v7141_v59, 16 }
 0x221   : > { %v1549_v15 = vsel %vm6680_vm2, %v1357_v18, %v1548_v39  ;;  %1554 = vst [vmem:[#allocation2 + $0xac] sm:$0xf] %v1373_v2  ;;  %1557 = vst [vmem:[#allocation2 + $0xb0] sm:$0x1] %v1556_v21  ;;  %v1001_v44 = vadd.f32 %v6011_v51, %v6910_v33  ;;  %v993_v50 = vadd.f32 %v6011_v51, %v6918_v52  ;;  %v2237_v9 = vrot.slane %v2235_v14, 1 }
 0x222   : > { %1547 = vst [vmem:[#allocation2 + $0xa0] sm:$0xf] %v1356_v22  ;;  %1550 = vst [vmem:[#allocation2 + $0xa4] sm:$0x1] %v1549_v15  ;;  %v1004_v38 = vadd.f32 %v6011_v51, %v6924_v60  ;;  %v996_v49 = vadd.f32 %v6011_v51, %v6926_v7  ;;  %v7178_v56 = vsel %vm2111_vm7, %v2226_v1, %v2230_v54  ;;  %v2242_v60 = vrot.slane %v2240_v23, 1 }
 0x223   : > { %v7181_v39 = vld [vmem:[#allocation2 + $0x8c] ss:$0 sps:$4 sm:$0x11]   ;;  %v1037_v19 = vmax.f32 %v1001_v44, 0.0  ;;  %v1035_v62 = vmax.f32 %v993_v50, 0.0  ;;  %v7186_v52 = vsel %vm2320_vm8, %v2345_v12, %v2346_v28  ;;  %v2348_v7 = vrot.slane %v7114_v16, 1 }
 0x224   : > { %v1038_v13 = vmax.f32 %v1004_v38, 0.0  ;;  %v1036_v33 = vmax.f32 %v996_v49, 0.0  ;;  %3117 = vmatmul.mubr.bf16.gmra.mrb[48].mxu1 %v7086_v55  ;;  %v2349_v54 = vrot.slane %v7124_v26, 1  ;;  %v2245_v35 = vshrl.u32 %v7157_v58, 16  ;;  %v1565_v2 = vld [vmem:[#allocation2 + $0xc0] sm:$0xf] }
 0x225   : > { %3124 = vmatprep.mubr.bf16.mxu1 %v7178_v56  ;;  %v4869_v8 = vpack.c.bf16 %v1037_v19, %v1037_v19  ;;  %v4867_v42 = vpack.c.bf16 %v1035_v62, %v1035_v62  ;;  %v2238_v24 = vor.u32 %v2237_v9, %v2233_v3  ;;  %v2249_v18 = vrot.slane %v2247_v57, 1  ;;  %v1558_v50 = vld [vmem:[#allocation2 + $0xb4] sm:$0xf]  ;;  %v1569_v62 = vld [vmem:[#allocation2 + $0xc8] sm:$0x1] }
 0x226   : > { %3278 = vmatmul.mubr.bf16.gmra.mrb[48].mxu0 %v7186_v52  ;;  %v4870_v30 = vpack.c.bf16 %v1038_v13, %v1038_v13  ;;  %v4868_v45 = vpack.c.bf16 %v1036_v33, %v1036_v33  ;;  %v2252_v32 = vshll.u32 %v7181_v39, 16  ;;  %v7199_v44 = vsel %vm2320_vm8, %v2348_v7, %v2349_v54  ;;  %v1562_v13 = vld [vmem:[#allocation2 + $0xbc] sm:$0x1] }
 0x227   : > { %3285 = vmatprep.mubr.bf16.mxu0 %v7141_v59  ;;  %v1393_v20 = vshrl.u32 %v4869_v8, 16  ;;  %v1396_v1 = vshll.u32 %v4869_v8, 16  ;;  %v1376_v14 = vshrl.u32 %v4867_v42, 16  ;;  %v1379_v26 = vshll.u32 %v4867_v42, 16 }
 0x228   : > { %v1401_v21 = vshrl.u32 %v4870_v30, 16  ;;  %v1404_v22 = vshll.u32 %v4870_v30, 16  ;;  %v1384_v15 = vshrl.u32 %v4868_v45, 16  ;;  %v1387_v12 = vshll.u32 %v4868_v45, 16 }
 0x229   : > { %v1395_v28 = vrot.slane %v1393_v20, 7  ;;  %v1378_v23 = vrot.slane %v1376_v14, 7  ;;  %v7196_v51 = vsel %vm2111_vm7, %v2238_v24, %v2242_v60  ;;  %v7202_v60 = vld [vmem:[#allocation2 + $0x90] sm:$0xff]   ;;  %v2250_v24 = vor.u32 %v2249_v18, %v2245_v35 }
 0x22a   : > { %v1403_v38 = vrot.slane %v1401_v21, 7  ;;  %v1386_v49 = vrot.slane %v1384_v15, 7  ;;  %v2254_v45 = vrot.slane %v2252_v32, 1  ;;  %v2351_v35 = vrot.slane %v7141_v59, 1 }
 0x22b   : > { %v1398_v3 = vor.u32 %v1396_v1, %v1395_v28  ;;  %v1399_v9 = vrot.slane %v1395_v28, 4  ;;  %v1381_v57 = vor.u32 %v1379_v26, %v1378_v23  ;;  %v1382_v19 = vrot.slane %v1378_v23, 4  ;;  %v5968_v32 = vld [vmem:[#allocation2 + $0x98] ss:$0 sps:$4 sm:$0x11]  }
 0x22c   : > { %3125 = vmatmul.mubr.bf16.gmra.mrb[52].mxu1 %v7114_v16  ;;  %v1406_v33 = vor.u32 %v1404_v22, %v1403_v38  ;;  %v1408_v8 = vrot.slane %v1403_v38, 4  ;;  %v1389_v42 = vor.u32 %v1387_v12, %v1386_v49  ;;  %v1391_v30 = vrot.slane %v1386_v49, 4  ;;  %v7225_v22 = vld [vmem:[#allocation2 + $0x9c] sm:$0xff]   ;;  %v5974_v23 = vld [vmem:[#allocation2 + $0xa4] ss:$0 sps:$4 sm:$0x11]  }
 0x22d   : > { %3132 = vmatprep.mubr.bf16.mxu1 %v7196_v51  ;;  %v1566_v7 = vsel %vm6711_vm6, %v1398_v3, %v1565_v2  ;;  %v1559_v54 = vsel %vm6711_vm6, %v1381_v57, %v1558_v50  ;;  %v2352_v18 = vrot.slane %v7147_v25, 1  ;;  %v2259_v2 = vshll.u32 %v7202_v60, 16  ;;  %v5123_v25 = vpop.f32.mrb[16].mxu1 }
 0x22e   : > { %3286 = vmatmul.mubr.bf16.gmra.mrb[52].mxu0 %v7199_v44  ;;  %1567 = vst [vmem:[#allocation2 + $0xc0] sm:$0xf] %v1566_v7  ;;  %1560 = vst [vmem:[#allocation2 + $0xb4] sm:$0xf] %v1559_v54  ;;  %v1407_v20 = vsel %vm6822_vm10, %v1399_v9, %v1406_v33  ;;  %v1570_v1 = vsel %vm6680_vm2, %v1408_v8, %v1569_v62  ;;  %v1390_v14 = vsel %vm6822_vm10, %v1382_v19, %v1389_v42  ;;  %v5124_v38 = vpop.f32.mrb[17].mxu1 }
 0x22f   : > { %3293 = vmatprep.mubr.bf16.mxu0 %v7157_v58  ;;  %v1563_v26 = vsel %vm6680_vm2, %v1391_v30, %v1562_v13  ;;  %1568 = vst [vmem:[#allocation2 + $0xc4] sm:$0xf] %v1407_v20  ;;  %1571 = vst [vmem:[#allocation2 + $0xc8] sm:$0x1] %v1570_v1  ;;  %v7223_v21 = vsel %vm2111_vm7, %v2250_v24, %v2254_v45  ;;  %v7229_v40 = vsel %vm2320_vm8, %v2351_v35, %v2352_v18  ;;  %v5126_v62 = vpop.f32.mrb[18].mxu1  ;;  %v7250_v24 = vld [vmem:[#allocation2 + $0xa8] sm:$0xff]  }
 0x230   : > { %1561 = vst [vmem:[#allocation2 + $0xb8] sm:$0xf] %v1390_v14  ;;  %1564 = vst [vmem:[#allocation2 + $0xbc] sm:$0x1] %v1563_v26  ;;  %v2257_v15 = vshrl.u32 %v7202_v60, 16  ;;  %v2261_v12 = vrot.slane %v2259_v2, 1  ;;  %v7236_v49 = vadd.f32 %v5124_v38, %v5123_v25 }
 0x231   : > { %v2264_v28 = vshll.u32 %v5968_v32, 16  ;;  %v2271_v50 = vshll.u32 %v7225_v22, 16  ;;  %v2354_v57 = vrot.slane %v7157_v58, 1  ;;  %v2355_v19 = vrot.slane %v7181_v39, 1  ;;  %v5127_v13 = vpop.f32.mrb[19].mxu1 }
 0x232   : > { %v2262_v3 = vor.u32 %v2261_v12, %v2257_v15  ;;  %v2269_v33 = vshrl.u32 %v7225_v22, 16  ;;  %v2276_v42 = vshll.u32 %v5974_v23, 16  ;;  %v7241_v30 = vadd.f32 %v5127_v13, %v5126_v62  ;;  %v5976_v14 = vld [vmem:[#allocation2 + $0xb0] ss:$0 sps:$4 sm:$0x11]  }
 0x233   : > { %v2266_v9 = vrot.slane %v2264_v28, 1  ;;  %v2273_v8 = vrot.slane %v2271_v50, 1  ;;  %v7248_v54 = vsel %vm2320_vm8, %v2354_v57, %v2355_v19  ;;  %v2357_v20 = vrot.slane %v7202_v60, 1 }
 0x234   : > { %3133 = vmatmul.mubr.bf16.gmra.mrb[56].mxu1 %v7141_v59  ;;  %v2278_v45 = vrot.slane %v2276_v42, 1  ;;  %v2358_v1 = vrot.slane %v5968_v32, 1  ;;  %v2283_v26 = vshll.u32 %v7250_v24, 16  ;;  %v2281_v15 = vshrl.u32 %v7250_v24, 16 }
 0x235   : > { %3140 = vmatprep.mubr.bf16.mxu1 %v7223_v21  ;;  %v7245_v7 = vsel %vm2111_vm7, %v2262_v3, %v2266_v9  ;;  %v2274_v39 = vor.u32 %v2273_v8, %v2269_v33  ;;  %v2288_v28 = vshll.u32 %v5976_v14, 16  ;;  %v2360_v3 = vrot.slane %v7225_v22, 1 }
 0x236   : > { %3294 = vmatmul.mubr.bf16.gmra.mrb[56].mxu0 %v7229_v40  ;;  %v7264_v2 = vsel %vm2320_vm8, %v2357_v20, %v2358_v1  ;;  %v2285_v12 = vrot.slane %v2283_v26, 1  ;;  %v2361_v9 = vrot.slane %v5974_v23, 1  ;;  %v2363_v42 = vrot.slane %v7250_v24, 1  ;;  %v644_v26 = vld [vmem:[#allocation2 + $0xd4] sm:$0x1] }
 0x237   : > { %3301 = vmatprep.mubr.bf16.mxu0 %v7202_v60  ;;  %v7258_v35 = vsel %vm2111_vm7, %v2274_v39, %v2278_v45  ;;  %v7260_v18 = vld [vmem:[#allocation2 + $0xb4] sm:$0xff]   ;;  %v5982_v32 = vld [vmem:[#allocation2 + $0xbc] ss:$0 sps:$4 sm:$0x11]   ;;  %v2290_v38 = vrot.slane %v2288_v28, 1  ;;  %v2364_v39 = vrot.slane %v5976_v14, 1 }
 0x238   : > { %v2295_v25 = vshll.u32 %v7260_v18, 16  ;;  %v2286_v50 = vor.u32 %v2285_v12, %v2281_v15  ;;  %v2293_v57 = vshrl.u32 %v7260_v18, 16  ;;  %v2300_v62 = vshll.u32 %v5982_v32, 16  ;;  %v588_v45 = vld [vmem:[#allocation2 + $0xcc] sm:$0x1]  ;;  %v7293_v12 = vld [vmem:[#allocation2 + $0xc0] sm:$0xff]  }
 0x239   : > { %v7278_v33 = vsel %vm2320_vm8, %v2360_v3, %v2361_v9  ;;  %v589_v1 = vsel %vm6680_vm2, 0, %v588_v45  ;;  %v7291_v15 = vsel %vm2320_vm8, %v2363_v42, %v2364_v39  ;;  %v645_v28 = vsel %vm6702_vm4, 0, %v644_v26  ;;  %v7370_v45 = vld [vmem:[#allocation2 + $0xc8] ss:$0 sps:$4 sm:$0x11]  }
 0x23a   : > { %v2297_v19 = vrot.slane %v2295_v25, 1  ;;  %v7275_v13 = vsel %vm2111_vm7, %v2286_v50, %v2290_v38  ;;  %v2302_v23 = vrot.slane %v2300_v62, 1  ;;  %590 = vst [vmem:[#allocation2 + $0xcc] sm:$0x1] %v589_v1  ;;  %646 = vst [vmem:[#allocation2 + $0xd4] sm:$0x1] %v645_v28 }
 0x23b   : > { %v2366_v14 = vrot.slane %v7260_v18, 1  ;;  %v2367_v25 = vrot.slane %v5982_v32, 1  ;;  %v5993_v32 = vld [vmem:[#allocation11 + $0x208] sm:$0xff]   ;;  %v6003_v28 = vld [vmem:[#allocation12] sm:$0xff]  }
 0x23c   : > { %3141 = vmatmul.mubr.bf16.gmra.mrb[60].mxu1 %v7157_v58  ;;  %v2298_v8 = vor.u32 %v2297_v19, %v2293_v57  ;;  %v6013_v57 = vld [vmem:[#allocation2 + $0x18] sm:$0xff]   ;;  %v5994_v19 = vld [vmem:[#allocation11 + $0x210] sm:$0xff]   ;;  %v5997_v62 = vld [vmem:[#allocation11 + $0x228] sm:$0xff]   ;;  %5699 = vmatprep.subr.bf16.mxu0 %v6003_v28 }
 0x23d   : > { %3148 = vmatprep.mubr.bf16.mxu1 %v7245_v7  ;;  %v7305_v3 = vsel %vm2320_vm8, %v2366_v14, %v2367_v25 }
 0x23e   : > { %3302 = vmatmul.mubr.bf16.gmra.mrb[60].mxu0 %v7248_v54  ;;  %v7285_v20 = vsel %vm2111_vm7, %v2298_v8, %v2302_v23  ;;  %v6015_v8 = vld [vmem:[#allocation2 + $0x30] sm:$0xff]  }
 0x23f   : > { %3309 = vmatprep.mubr.bf16.mxu0 %v7225_v22  ;;  %v6000_v23 = vld [vmem:[#allocation11 + $0x238] sm:$0xff]  }
 0x241   : > { %v1906_v50 = vld [vmem:[#allocation2 + $0xcc] sm:$0xf]  ;;  %v1910_v37 = vld [vmem:[#allocation2 + $0xd4] sm:$0x1] }
 0x242   : > { %v1907_v38 = vsel %vm6711_vm6, 0, %v1906_v50  ;;  %v1911_v9 = vsel %vm6680_vm2, 0, %v1910_v37 }
 0x243   : > { %1908 = vst [vmem:[#allocation2 + $0xcc] sm:$0xf] %v1907_v38  ;;  %1912 = vst [vmem:[#allocation2 + $0xd4] sm:$0x1] %v1911_v9  ;;  %v2395_v38 = vshrl.u32 %v7293_v12, 16  ;;  %v2402_v9 = vshll.u32 %v7370_v45, 16 }
 0x244   : > { %3149 = vmatmul.mubr.bf16.gmra.mrb[64].mxu1 %v7202_v60 }
 0x245   : > { %3156 = vmatprep.mubr.bf16.mxu1 %v7258_v35 }
 0x246   : > { %3310 = vmatmul.mubr.bf16.gmra.mrb[64].mxu0 %v7264_v2 }
 0x247   : > { %3317 = vmatprep.mubr.bf16.mxu0 %v7250_v24 }
 0x24a   : > { %v7375_v14 = vld [vmem:[#allocation2 + $0xcc] sm:$0xff]  }
 0x24c   : > { %3157 = vmatmul.mubr.bf16.gmra.mrb[68].mxu1 %v7225_v22 }
 0x24d   : > { %3164 = vmatprep.mubr.bf16.mxu1 %v7275_v13 }
 0x24e   : > { %3318 = vmatmul.mubr.bf16.gmra.mrb[68].mxu0 %v7278_v33 }
 0x24f   : > { %3325 = vmatprep.mubr.bf16.mxu0 %v7260_v18 }
 0x254   : > { %3165 = vmatmul.mubr.bf16.gmra.mrb[72].mxu1 %v7250_v24 }
 0x255   : > { %3172 = vmatprep.mubr.bf16.mxu1 %v7285_v20 }
 0x256   : > { %3326 = vmatmul.mubr.bf16.gmra.mrb[72].mxu0 %v7291_v15 }
 0x257   : > { %3333 = vmatprep.mubr.bf16.mxu0 %v7293_v12 }
 0x25c   : > { %3173 = vmatmul.mubr.bf16.gmra.mrb[76].mxu1 %v7260_v18 }
 0x25d   : > { %3374 = vmatprep.mubr.bf16.mxu1 %v6937_v36  ;;  %v6014_v36 = vld [vmem:[#allocation2 + $0x24] sm:$0xff]  }
 0x25e   : > { %3334 = vmatmul.mubr.bf16.gmra.mrb[76].mxu0 %v7305_v3 }
 0x25f   : > { %3535 = vmatprep.mubr.bf16.mxu0 %v6958_v17 }
 0x264   : > { %3375 = vmatmul.mubr.bf16.vlgmr.msra.gmra.mrb[80].mxu1 %v6934_v63  ;;  %v5996_v63 = vld [vmem:[#allocation11 + $0x220] sm:$0xff]  }
 0x265   : > { %5652 = vmatpush3.bf16.msra.mxu1 %v6012_v46  ;;  %3382 = vmatprep.mubr.bf16.mxu1 %v6987_v31 }
 0x266   : > { %3536 = vmatmul.mubr.bf16.vlgmr.msra.gmra.mrb[80].mxu0 %v6013_v57  ;;  %5653 = vmatprep.subr.bf16.mxu1 %v5993_v32 }
 0x267   : > { %3543 = vmatprep.mubr.bf16.mxu0 %v6984_v41  ;;  %5700 = vmatpush3.bf16.msra.mxu0 %v6003_v28 }
 0x269   : > { %5654 = vmatpush3.bf16.msra.mxu1 %v5993_v32 }
 0x26a   : > { %5655 = vmatprep.subr.bf16.mxu1 %v5994_v19 }
 0x26c   : > { %3383 = vmatmul.mubr.bf16.gmra.mrb[84].mxu1 %v6958_v17  ;;  %v5998_v17 = vld [vmem:[#allocation11 + $0x230] sm:$0xff]  }
 0x26d   : > { %3390 = vmatprep.mubr.bf16.mxu1 %v7013_v61  ;;  %5656 = vmatpush3.bf16.msra.mxu1 %v5994_v19  ;;  %v7387_v19 = vld [vmem:[#allocation2 + $0xd4] ss:$0 sps:$4 sm:$0x11]  }
 0x26e   : > { %3544 = vmatmul.mubr.bf16.gmra.mrb[84].mxu0 %v6014_v36  ;;  %5657 = vmatprep.subr.bf16.mxu1 %v5995_v10 }
 0x26f   : > { %3551 = vmatprep.mubr.bf16.mxu0 %v7010_v48 }
 0x271   : > { %5658 = vmatpush3.bf16.msra.mxu1 %v5995_v10  ;;  %v2423_v10 = vshll.u32 %v7375_v14, 16 }
 0x272   : > { %5659 = vmatprep.subr.bf16.mxu1 %v5996_v63 }
 0x274   : > { %3391 = vmatmul.mubr.bf16.gmra.mrb[88].mxu1 %v6984_v41  ;;  %v7352_v41 = vld [vmem:[%s7771_s6] ss:$0 sm:$0xff] }
 0x275   : > { %3398 = vmatprep.mubr.bf16.mxu1 %v7064_v47  ;;  %5660 = vmatpush3.bf16.msra.mxu1 %v5996_v63 }
 0x276   : > { %3552 = vmatmul.mubr.bf16.gmra.mrb[88].mxu0 %v6015_v8  ;;  %5661 = vmatprep.subr.bf16.mxu1 %v5997_v62 }
 0x277   : > { %3559 = vmatprep.mubr.bf16.mxu0 %v7049_v53 }
 0x279   : > { %5662 = vmatpush3.bf16.msra.mxu1 %v5997_v62 }
 0x27a   : > { %5663 = vmatprep.subr.bf16.mxu1 %v5998_v17 }
 0x27c   : > { %3399 = vmatmul.mubr.bf16.gmra.mrb[92].mxu1 %v7010_v48 }
 0x27d   : > { %3406 = vmatprep.mubr.bf16.mxu1 %v7079_v27  ;;  %5664 = vmatpush3.bf16.msra.mxu1 %v5998_v17 }
 0x27e   : > { %3560 = vmatmul.mubr.bf16.gmra.mrb[92].mxu0 %v6997_v11  ;;  %5665 = vmatprep.subr.bf16.mxu1 %v6000_v23  ;;  %v3055_v11 = vadd.f32 %v7236_v49, %v7352_v41 }
 0x27f   : > { %3567 = vmatprep.mubr.bf16.mxu0 %v7084_v5 }
 0x281   : > { %5666 = vmatpush3.bf16.msra.mxu1 %v6000_v23 }
 0x284   : > { %3407 = vmatmul.mubr.bf16.gmra.mrb[96].mxu1 %v7049_v53 }
 0x285   : > { %3414 = vmatprep.mubr.bf16.mxu1 %v7128_v29 }
 0x286   : > { %3568 = vmatmul.mubr.bf16.gmra.mrb[96].mxu0 %v7026_v43 }
 0x287   : > { %3575 = vmatprep.mubr.bf16.mxu0 %v7112_v0 }
 0x28c   : > { %3415 = vmatmul.mubr.bf16.gmra.mrb[100].mxu1 %v7084_v5 }
 0x28d   : > { %3422 = vmatprep.mubr.bf16.mxu1 %v7139_v34 }
 0x28e   : > { %3576 = vmatmul.mubr.bf16.gmra.mrb[100].mxu0 %v7053_v6 }
 0x28f   : > { %3583 = vmatprep.mubr.bf16.mxu0 %v7144_v4 }
 0x294   : > { %3423 = vmatmul.mubr.bf16.gmra.mrb[104].mxu1 %v7112_v0 }
 0x295   : > { %3430 = vmatprep.mubr.bf16.mxu1 %v7186_v52 }
 0x296   : > { %3584 = vmatmul.mubr.bf16.gmra.mrb[104].mxu0 %v7086_v55  ;;  %v3058_v55 = vadd.f32 %v7241_v30, %v7352_v41 }
 0x297   : > { %3591 = vmatprep.mubr.bf16.mxu0 %v7178_v56 }
 0x29c   : > { %3431 = vmatmul.mubr.bf16.gmra.mrb[108].mxu1 %v7144_v4 }
 0x29d   : > { %3438 = vmatprep.mubr.bf16.mxu1 %v7199_v44 }
 0x29e   : > { %3592 = vmatmul.mubr.bf16.gmra.mrb[108].mxu0 %v7114_v16 }
 0x29f   : > { %3599 = vmatprep.mubr.bf16.mxu0 %v7196_v51 }
 0x2a4   : > { %3439 = vmatmul.mubr.bf16.gmra.mrb[112].mxu1 %v7178_v56 }
 0x2a5   : > { %3446 = vmatprep.mubr.bf16.mxu1 %v7229_v40 }
 0x2a6   : > { %3600 = vmatmul.mubr.bf16.gmra.mrb[112].mxu0 %v7141_v59 }
 0x2a7   : > { %3607 = vmatprep.mubr.bf16.mxu0 %v7223_v21 }
 0x2ac   : > { %3447 = vmatmul.mubr.bf16.gmra.mrb[116].mxu1 %v7196_v51 }
 0x2ad   : > { %3454 = vmatprep.mubr.bf16.mxu1 %v7248_v54 }
 0x2ae   : > { %3608 = vmatmul.mubr.bf16.gmra.mrb[116].mxu0 %v7157_v58 }
 0x2af   : > { %3615 = vmatprep.mubr.bf16.mxu0 %v7245_v7 }
 0x2b1   : > { %v5235_v48 = vpop.f32.mrb[16].mxu0 }
 0x2b2   : > { %v5236_v43 = vpop.f32.mrb[17].mxu0 }
 0x2b3   : > { %v5237_v53 = vadd.f32 %v5236_v43, %v5235_v48  ;;  %v5238_v6 = vpop.f32.mrb[18].mxu0 }
 0x2b4   : > { %3455 = vmatmul.mubr.bf16.gmra.mrb[120].mxu1 %v7223_v21  ;;  %v5239_v5 = vpop.f32.mrb[19].mxu0 }
 0x2b5   : > { %3462 = vmatprep.mubr.bf16.mxu1 %v7264_v2  ;;  %v7362_v0 = vadd.f32 %v5237_v53, %v3055_v11  ;;  %v5240_v16 = vadd.f32 %v5239_v5, %v5238_v6  ;;  %v2404_v11 = vrot.slane %v2402_v9, 1  ;;  %v2421_v5 = vshrl.u32 %v7375_v14, 16  ;;  %v6004_v9 = vld [vmem:[#allocation12 + $0x8] sm:$0xff]  }
 0x2b6   : > { %3616 = vmatmul.mubr.bf16.gmra.mrb[120].mxu0 %v7202_v60  ;;  %5701 = vmatprep.subr.bf16.mxu0 %v6004_v9 }
 0x2b7   : > { %3623 = vmatprep.mubr.bf16.mxu0 %v7258_v35  ;;  %v7364_v59 = vadd.f32 %v5240_v16, %v3058_v55  ;;  %v2425_v55 = vrot.slane %v2423_v10, 1  ;;  %v2428_v16 = vshll.u32 %v7387_v19, 16  ;;  %5702 = vmatpush3.bf16.msra.mxu0 %v6004_v9 }
 0x2bc   : > { %3463 = vmatmul.mubr.bf16.gmra.mrb[124].mxu1 %v7245_v7  ;;  %v2397_v7 = vshll.u32 %v7293_v12, 16 }
 0x2bd   : > { %3470 = vmatprep.mubr.bf16.mxu1 %v7278_v33 }
 0x2be   : > { %3624 = vmatmul.mubr.bf16.gmra.mrb[124].mxu0 %v7225_v22  ;;  %v5241_v58 = vpop.f32.mrb[20].mxu0  ;;  %v2399_v37 = vrot.slane %v2397_v7, 1 }
 0x2bf   : > { %3631 = vmatprep.mubr.bf16.mxu0 %v7275_v13  ;;  %v5129_v4 = vpop.f32.mrb[20].mxu1  ;;  %v5242_v51 = vpop.f32.mrb[21].mxu0 }
 0x2c0   : > { %v5130_v56 = vpop.f32.mrb[21].mxu1  ;;  %v5243_v49 = vadd.f32 %v5242_v51, %v5241_v58  ;;  %v5244_v30 = vpop.f32.mrb[22].mxu0  ;;  %v2400_v23 = vor.u32 %v2399_v37, %v2395_v38 }
 0x2c1   : > { %v5131_v60 = vadd.f32 %v5130_v56, %v5129_v4  ;;  %v5132_v21 = vpop.f32.mrb[22].mxu1  ;;  %v5245_v39 = vpop.f32.mrb[23].mxu0 }
 0x2c2   : > { %v5133_v42 = vpop.f32.mrb[23].mxu1  ;;  %v5246_v22 = vadd.f32 %v5245_v39, %v5244_v30  ;;  %v2405_v56 = vsel %vm2111_vm7, %v2400_v23, %v2404_v11  ;;  %v2408_v30 = vrot.slane %v7370_v45, 1  ;;  %v2430_v39 = vrot.slane %v2428_v16, 1 }
 0x2c3   : > { %v3063_v1 = vadd.f32 %v5131_v60, %v7352_v41  ;;  %v5134_v26 = vadd.f32 %v5133_v42, %v5132_v21  ;;  %v2426_v42 = vor.u32 %v2425_v55, %v2421_v5 }
 0x2c4   : > { %3471 = vmatmul.mubr.bf16.gmra.mrb[128].mxu1 %v7258_v35 }
 0x2c5   : > { %v7377_v25 = vadd.f32 %v5243_v49, %v3063_v1  ;;  %v3066_v50 = vadd.f32 %v5134_v26, %v7352_v41  ;;  %3478 = vmatprep.mubr.bf16.mxu1 %v7291_v15  ;;  %v2407_v49 = vrot.slane %v7293_v12, 1  ;;  %v2431_v45 = vsel %vm2111_vm7, %v2426_v42, %v2430_v39 }
 0x2c6   : > { %3632 = vmatmul.mubr.bf16.gmra.mrb[128].mxu0 %v7250_v24 }
 0x2c7   : > { %v7384_v32 = vadd.f32 %v5246_v22, %v3066_v50  ;;  %3639 = vmatprep.mubr.bf16.mxu0 %v7285_v20  ;;  %v5135_v35 = vpop.f32.mrb[24].mxu1 }
 0x2c8   : > { %v5136_v46 = vpop.f32.mrb[25].mxu1 }
 0x2c9   : > { %v5247_v57 = vpop.f32.mrb[24].mxu0  ;;  %v5137_v36 = vadd.f32 %v5136_v46, %v5135_v35  ;;  %v5138_v63 = vpop.f32.mrb[26].mxu1  ;;  %v7407_v46 = vsel %vm2320_vm8, %v2407_v49, %v2408_v30 }
 0x2ca   : > { %v5248_v24 = vpop.f32.mrb[25].mxu0  ;;  %v5139_v8 = vpop.f32.mrb[27].mxu1 }
 0x2cb   : > { %v5249_v62 = vadd.f32 %v5248_v24, %v5247_v57  ;;  %v5250_v17 = vpop.f32.mrb[26].mxu0  ;;  %v3071_v48 = vadd.f32 %v5137_v36, %v7352_v41  ;;  %v5140_v43 = vadd.f32 %v5139_v8, %v5138_v63 }
 0x2cc   : > { %v5251_v53 = vpop.f32.mrb[27].mxu0  ;;  %3479 = vmatmul.mubr.bf16.gmra.mrb[132].mxu1 %v7275_v13 }
 0x2cd   : > { %v5252_v6 = vadd.f32 %v5251_v53, %v5250_v17  ;;  %v7394_v4 = vadd.f32 %v5249_v62, %v3071_v48  ;;  %v3074_v58 = vadd.f32 %v5140_v43, %v7352_v41  ;;  %3486 = vmatprep.mubr.bf16.mxu1 %v7305_v3 }
 0x2ce   : > { %3640 = vmatmul.mubr.bf16.gmra.mrb[132].mxu0 %v7260_v18 }
 0x2cf   : > { %v7400_v51 = vadd.f32 %v5252_v6, %v3074_v58  ;;  %3647 = vmatprep.mubr.bf16.mxu0 %v2405_v56  ;;  %v5141_v60 = vpop.f32.mrb[28].mxu1 }
 0x2d0   : > { %v5142_v13 = vpop.f32.mrb[29].mxu1 }
 0x2d1   : > { %v5253_v21 = vpop.f32.mrb[28].mxu0  ;;  %v5143_v7 = vadd.f32 %v5142_v13, %v5141_v60  ;;  %v5144_v1 = vpop.f32.mrb[30].mxu1 }
 0x2d2   : > { %v5254_v26 = vpop.f32.mrb[29].mxu0  ;;  %v5145_v28 = vpop.f32.mrb[31].mxu1 }
 0x2d3   : > { %v5255_v22 = vadd.f32 %v5254_v26, %v5253_v21  ;;  %v5256_v18 = vpop.f32.mrb[30].mxu0  ;;  %v3079_v50 = vadd.f32 %v5143_v7, %v7352_v41  ;;  %v5146_v38 = vadd.f32 %v5145_v28, %v5144_v1 }
 0x2d4   : > { %v5257_v37 = vpop.f32.mrb[31].mxu0  ;;  %3487 = vmatmul.mubr.bf16.gmra.mrb[136].mxu1 %v7285_v20 }
 0x2d5   : > { %v5258_v35 = vadd.f32 %v5257_v37, %v5256_v18  ;;  %v7410_v57 = vadd.f32 %v5255_v22, %v3079_v50  ;;  %v3082_v10 = vadd.f32 %v5146_v38, %v7352_v41  ;;  %3494 = vmatprep.mubr.bf16.mxu1 %v7407_v46  ;;  %v6005_v22 = vld [vmem:[#allocation12 + $0x10] sm:$0xff]  }
 0x2d6   : > { %3648 = vmatmul.mubr.bf16.gmra.mrb[136].mxu0 %v7293_v12  ;;  %5703 = vmatprep.subr.bf16.mxu0 %v6005_v22 }
 0x2d7   : > { %v7415_v36 = vadd.f32 %v5258_v35, %v3082_v10  ;;  %v5147_v63 = vpop.f32.mrb[32].mxu1  ;;  %3655 = vmatprep.mubr.bf16.mxu0 %v2431_v45  ;;  %5704 = vmatpush3.bf16.msra.mxu0 %v6005_v22 }
 0x2d8   : > { %v5148_v20 = vpop.f32.mrb[33].mxu1 }
 0x2d9   : > { %v5259_v24 = vpop.f32.mrb[32].mxu0  ;;  %v5149_v62 = vadd.f32 %v5148_v20, %v5147_v63  ;;  %v5150_v8 = vpop.f32.mrb[34].mxu1 }
 0x2da   : > { %v5260_v17 = vpop.f32.mrb[33].mxu0  ;;  %v5151_v11 = vpop.f32.mrb[35].mxu1 }
 0x2db   : > { %v5261_v23 = vadd.f32 %v5260_v17, %v5259_v24  ;;  %v5262_v48 = vpop.f32.mrb[34].mxu0  ;;  %v3087_v43 = vadd.f32 %v5149_v62, %v7352_v41  ;;  %v5152_v53 = vadd.f32 %v5151_v11, %v5150_v8 }
 0x2dc   : > { %v5263_v6 = vpop.f32.mrb[35].mxu0  ;;  %3495 = vmatmul.mubr.bf16.gmra.mrb[140].mxu1 %v2405_v56 }
 0x2dd   : > { %v5264_v5 = vadd.f32 %v5263_v6, %v5262_v48  ;;  %v7418_v12 = vadd.f32 %v5261_v23, %v3087_v43  ;;  %v3090_v55 = vadd.f32 %v5152_v53, %v7352_v41  ;;  %5667 = vmatprep.mubr.bf16.mxu1 %v6987_v31 }
 0x2de   : > { %3656 = vmatmul.mubr.bf16.gmra.mrb[140].mxu0 %v7375_v14 }
 0x2df   : > { %v7423_v16 = vadd.f32 %v5264_v5, %v3090_v55  ;;  %v5153_v58 = vpop.f32.mrb[36].mxu1 }
 0x2e0   : > { %v5154_v60 = vpop.f32.mrb[37].mxu1 }
 0x2e1   : > { %v5265_v13 = vpop.f32.mrb[36].mxu0  ;;  %v5155_v21 = vadd.f32 %v5154_v60, %v5153_v58  ;;  %v5156_v49 = vpop.f32.mrb[38].mxu1 }
 0x2e2   : > { %v5266_v30 = vpop.f32.mrb[37].mxu0  ;;  %v5157_v39 = vpop.f32.mrb[39].mxu1 }
 0x2e3   : > { %v5267_v42 = vadd.f32 %v5266_v30, %v5265_v13  ;;  %v5268_v7 = vpop.f32.mrb[38].mxu0  ;;  %v3095_v56 = vadd.f32 %v5155_v21, %v7352_v41  ;;  %v5158_v1 = vadd.f32 %v5157_v39, %v5156_v49  ;;  %v6006_v30 = vld [vmem:[#allocation12 + $0x18] sm:$0xff]  }
 0x2e4   : > { %v5269_v26 = vpop.f32.mrb[39].mxu0  ;;  %5668 = vmatmul.mubr.bf16.vlgmr.msra.gmra.mrb[144].mxu1 %v7013_v61  ;;  %5705 = vmatprep.subr.bf16.mxu0 %v6006_v30 }
 0x2e5   : > { %v5270_v28 = vadd.f32 %v5269_v26, %v5268_v7  ;;  %v7427_v31 = vadd.f32 %v5267_v42, %v3095_v56  ;;  %v3098_v18 = vadd.f32 %v5158_v1, %v7352_v41  ;;  %5671 = vmatprep.mubr.bf16.mxu1 %v7064_v47  ;;  %5706 = vmatpush3.bf16.msra.mxu0 %v6006_v30 }
 0x2e7   : > { %v7431_v50 = vadd.f32 %v5270_v28, %v3098_v18  ;;  %v5159_v38 = vpop.f32.mrb[40].mxu1 }
 0x2e8   : > { %v5160_v37 = vpop.f32.mrb[41].mxu1 }
 0x2e9   : > { %v5271_v9 = vpop.f32.mrb[40].mxu0  ;;  %v5161_v35 = vadd.f32 %v5160_v37, %v5159_v38  ;;  %v5162_v45 = vpop.f32.mrb[42].mxu1 }
 0x2ea   : > { %v5272_v10 = vpop.f32.mrb[41].mxu0  ;;  %v5163_v20 = vpop.f32.mrb[43].mxu1 }
 0x2eb   : > { %v5273_v63 = vadd.f32 %v5272_v10, %v5271_v9  ;;  %v5274_v24 = vpop.f32.mrb[42].mxu0  ;;  %v3103_v61 = vadd.f32 %v5161_v35, %v7352_v41  ;;  %v5164_v62 = vadd.f32 %v5163_v20, %v5162_v45 }
 0x2ec   : > { %v5275_v8 = vpop.f32.mrb[43].mxu0  ;;  %5672 = vmatmul.mubr.bf16.gmra.mrb[148].mxu1 %v7079_v27 }
 0x2ed   : > { %v5276_v17 = vadd.f32 %v5275_v8, %v5274_v24  ;;  %v7435_v47 = vadd.f32 %v5273_v63, %v3103_v61  ;;  %v3106_v23 = vadd.f32 %v5164_v62, %v7352_v41  ;;  %5675 = vmatprep.mubr.bf16.mxu1 %v7128_v29 }
 0x2ef   : > { %v7439_v11 = vadd.f32 %v5276_v17, %v3106_v23  ;;  %v5165_v48 = vpop.f32.mrb[44].mxu1 }
 0x2f0   : > { %v5166_v43 = vpop.f32.mrb[45].mxu1 }
 0x2f1   : > { %v5277_v53 = vpop.f32.mrb[44].mxu0  ;;  %v5167_v6 = vadd.f32 %v5166_v43, %v5165_v48  ;;  %v5168_v5 = vpop.f32.mrb[46].mxu1 }
 0x2f2   : > { %v5278_v55 = vpop.f32.mrb[45].mxu0  ;;  %v5169_v60 = vpop.f32.mrb[47].mxu1 }
 0x2f3   : > { %v5279_v58 = vadd.f32 %v5278_v55, %v5277_v53  ;;  %v5280_v13 = vpop.f32.mrb[46].mxu0  ;;  %v3111_v21 = vadd.f32 %v5167_v6, %v7352_v41  ;;  %v5170_v27 = vadd.f32 %v5169_v60, %v5168_v5  ;;  %v6007_v55 = vld [vmem:[#allocation12 + $0x20] sm:$0xff]  }
 0x2f4   : > { %v5281_v49 = vpop.f32.mrb[47].mxu0  ;;  %5676 = vmatmul.mubr.bf16.gmra.mrb[152].mxu1 %v7139_v34  ;;  %5707 = vmatprep.subr.bf16.mxu0 %v6007_v55 }
 0x2f5   : > { %v5282_v42 = vadd.f32 %v5281_v49, %v5280_v13  ;;  %v7443_v29 = vadd.f32 %v5279_v58, %v3111_v21  ;;  %v3114_v39 = vadd.f32 %v5170_v27, %v7352_v41  ;;  %5679 = vmatprep.mubr.bf16.mxu1 %v7186_v52  ;;  %5708 = vmatpush3.bf16.msra.mxu0 %v6007_v55 }
 0x2f7   : > { %v7447_v7 = vadd.f32 %v5282_v42, %v3114_v39  ;;  %v5171_v56 = vpop.f32.mrb[48].mxu1 }
 0x2f8   : > { %v5172_v1 = vpop.f32.mrb[49].mxu1 }
 0x2f9   : > { %v5283_v26 = vpop.f32.mrb[48].mxu0  ;;  %v5173_v22 = vadd.f32 %v5172_v1, %v5171_v56  ;;  %v5174_v28 = vpop.f32.mrb[50].mxu1 }
 0x2fa   : > { %v5284_v18 = vpop.f32.mrb[49].mxu0  ;;  %v5175_v37 = vpop.f32.mrb[51].mxu1 }
 0x2fb   : > { %v5285_v38 = vadd.f32 %v5284_v18, %v5283_v26  ;;  %v5286_v9 = vpop.f32.mrb[50].mxu0  ;;  %v3119_v34 = vadd.f32 %v5173_v22, %v7352_v41  ;;  %v5176_v35 = vadd.f32 %v5175_v37, %v5174_v28 }
 0x2fc   : > { %v5287_v45 = vpop.f32.mrb[51].mxu0  ;;  %5680 = vmatmul.mubr.bf16.gmra.mrb[156].mxu1 %v7199_v44 }
 0x2fd   : > { %v5288_v10 = vadd.f32 %v5287_v45, %v5286_v9  ;;  %v7451_v52 = vadd.f32 %v5285_v38, %v3119_v34  ;;  %v3122_v63 = vadd.f32 %v5176_v35, %v7352_v41  ;;  %5683 = vmatprep.mubr.bf16.mxu1 %v7229_v40 }
 0x2ff   : > { %v7455_v20 = vadd.f32 %v5288_v10, %v3122_v63  ;;  %v5177_v24 = vpop.f32.mrb[52].mxu1 }
 0x300   : > { %v5178_v61 = vpop.f32.mrb[53].mxu1 }
 0x301   : > { %v5289_v62 = vpop.f32.mrb[52].mxu0  ;;  %v5179_v8 = vadd.f32 %v5178_v61, %v5177_v24  ;;  %v5180_v17 = vpop.f32.mrb[54].mxu1 }
 0x302   : > { %v5290_v23 = vpop.f32.mrb[53].mxu0  ;;  %v5181_v43 = vpop.f32.mrb[55].mxu1 }
 0x303   : > { %v5291_v48 = vadd.f32 %v5290_v23, %v5289_v62  ;;  %v5292_v53 = vpop.f32.mrb[54].mxu0  ;;  %v3127_v6 = vadd.f32 %v5179_v8, %v7352_v41  ;;  %v5182_v44 = vadd.f32 %v5181_v43, %v5180_v17  ;;  %v6008_v23 = vld [vmem:[#allocation12 + $0x28] sm:$0xff]  }
 0x304   : > { %v5293_v5 = vpop.f32.mrb[55].mxu0  ;;  %5684 = vmatmul.mubr.bf16.gmra.mrb[160].mxu1 %v7248_v54  ;;  %5709 = vmatprep.subr.bf16.mxu0 %v6008_v23 }
 0x305   : > { %v5294_v58 = vadd.f32 %v5293_v5, %v5292_v53  ;;  %v7459_v40 = vadd.f32 %v5291_v48, %v3127_v6  ;;  %v3130_v60 = vadd.f32 %v5182_v44, %v7352_v41  ;;  %5687 = vmatprep.mubr.bf16.mxu1 %v7264_v2  ;;  %v2433_v53 = vrot.slane %v7375_v14, 1  ;;  %5710 = vmatpush3.bf16.msra.mxu0 %v6008_v23 }
 0x306   : > { %v2434_v6 = vrot.slane %v7387_v19, 1 }
 0x307   : > { %v7463_v13 = vadd.f32 %v5294_v58, %v3130_v60  ;;  %v5183_v21 = vpop.f32.mrb[56].mxu1 }
 0x308   : > { %v5184_v27 = vpop.f32.mrb[57].mxu1 }
 0x309   : > { %v5295_v49 = vpop.f32.mrb[56].mxu0  ;;  %v5185_v30 = vadd.f32 %v5184_v27, %v5183_v21  ;;  %v5186_v42 = vpop.f32.mrb[58].mxu1  ;;  %v2435_v27 = vsel %vm2320_vm8, %v2433_v53, %v2434_v6 }
 0x30a   : > { %v5296_v39 = vpop.f32.mrb[57].mxu0  ;;  %v5187_v1 = vpop.f32.mrb[59].mxu1 }
 0x30b   : > { %v5297_v56 = vadd.f32 %v5296_v39, %v5295_v49  ;;  %v5298_v26 = vpop.f32.mrb[58].mxu0  ;;  %v3135_v54 = vadd.f32 %v5185_v30, %v7352_v41  ;;  %v5188_v22 = vadd.f32 %v5187_v1, %v5186_v42 }
 0x30c   : > { %v5299_v28 = vpop.f32.mrb[59].mxu0  ;;  %5688 = vmatmul.mubr.bf16.gmra.mrb[164].mxu1 %v7278_v33 }
 0x30d   : > { %v5300_v18 = vadd.f32 %v5299_v28, %v5298_v26  ;;  %v7467_v2 = vadd.f32 %v5297_v56, %v3135_v54  ;;  %v3138_v38 = vadd.f32 %v5188_v22, %v7352_v41  ;;  %5691 = vmatprep.mubr.bf16.mxu1 %v7291_v15 }
 0x30f   : > { %v7471_v37 = vadd.f32 %v5300_v18, %v3138_v38  ;;  %v5189_v9 = vpop.f32.mrb[60].mxu1 }
 0x310   : > { %v5190_v34 = vpop.f32.mrb[61].mxu1 }
 0x311   : > { %v5301_v35 = vpop.f32.mrb[60].mxu0  ;;  %v5191_v45 = vadd.f32 %v5190_v34, %v5189_v9  ;;  %v5192_v10 = vpop.f32.mrb[62].mxu1 }
 0x312   : > { %v5302_v63 = vpop.f32.mrb[61].mxu0  ;;  %v5193_v61 = vpop.f32.mrb[63].mxu1 }
 0x313   : > { %v5303_v24 = vadd.f32 %v5302_v63, %v5301_v35  ;;  %v5304_v62 = vpop.f32.mrb[62].mxu0  ;;  %v3143_v8 = vadd.f32 %v5191_v45, %v7352_v41  ;;  %v5194_v33 = vadd.f32 %v5193_v61, %v5192_v10  ;;  %v6009_v61 = vld [vmem:[#allocation12 + $0x30] sm:$0xff]  }
 0x314   : > { %v5305_v17 = vpop.f32.mrb[63].mxu0  ;;  %5692 = vmatmul.mubr.bf16.gmra.mrb[168].mxu1 %v7305_v3  ;;  %5711 = vmatprep.subr.bf16.mxu0 %v6009_v61 }
 0x315   : > { %v5306_v48 = vadd.f32 %v5305_v17, %v5304_v62  ;;  %v7475_v15 = vadd.f32 %v5303_v24, %v3143_v8  ;;  %v3146_v43 = vadd.f32 %v5194_v33, %v7352_v41  ;;  %5695 = vmatprep.mubr.bf16.mxu1 %v7407_v46  ;;  %5712 = vmatpush3.bf16.msra.mxu0 %v6009_v61 }
 0x317   : > { %v7481_v44 = vadd.f32 %v5306_v48, %v3146_v43  ;;  %v5195_v5 = vpop.f32.mrb[64].mxu1 }
 0x318   : > { %v5196_v55 = vpop.f32.mrb[65].mxu1 }
 0x319   : > { %v5307_v58 = vpop.f32.mrb[64].mxu0  ;;  %v5197_v60 = vadd.f32 %v5196_v55, %v5195_v5  ;;  %v5198_v21 = vpop.f32.mrb[66].mxu1 }
 0x31a   : > { %v5308_v3 = vpop.f32.mrb[65].mxu0  ;;  %v5199_v30 = vpop.f32.mrb[67].mxu1 }
 0x31b   : > { %v5309_v49 = vadd.f32 %v5308_v3, %v5307_v58  ;;  %v5310_v42 = vpop.f32.mrb[66].mxu0  ;;  %v3151_v46 = vadd.f32 %v5197_v60, %v7352_v41  ;;  %v5200_v14 = vadd.f32 %v5199_v30, %v5198_v21 }
 0x31c   : > { %v5311_v39 = vpop.f32.mrb[67].mxu0  ;;  %5696 = vmatmul.mubr.bf16.gmra.mrb[172].mxu1 %v2435_v27 }
 0x31d   : > { %v5312_v19 = vadd.f32 %v5311_v39, %v5310_v42  ;;  %v7485_v56 = vadd.f32 %v5309_v49, %v3151_v46  ;;  %v3154_v1 = vadd.f32 %v5200_v14, %v7352_v41 }
 0x31f   : > { %v7488_v26 = vadd.f32 %v5312_v19, %v3154_v1  ;;  %v5201_v54 = vpop.f32.mrb[68].mxu1 }
 0x320   : > { %v5202_v22 = vpop.f32.mrb[69].mxu1 }
 0x321   : > { %v5313_v28 = vpop.f32.mrb[68].mxu0  ;;  %v5203_v18 = vadd.f32 %v5202_v22, %v5201_v54  ;;  %v5204_v38 = vpop.f32.mrb[70].mxu1 }
 0x322   : > { %v5314_v9 = vpop.f32.mrb[69].mxu0  ;;  %v5205_v35 = vpop.f32.mrb[71].mxu1 }
 0x323   : > { %v5315_v34 = vadd.f32 %v5314_v9, %v5313_v28  ;;  %v5316_v45 = vpop.f32.mrb[70].mxu0  ;;  %v3159_v10 = vadd.f32 %v5203_v18, %v7352_v41  ;;  %v5206_v63 = vadd.f32 %v5205_v35, %v5204_v38 }
 0x324   : > { %v5317_v24 = vpop.f32.mrb[71].mxu0 }
 0x325   : > { %v5318_v62 = vadd.f32 %v5317_v24, %v5316_v45  ;;  %v7491_v8 = vadd.f32 %v5315_v34, %v3159_v10  ;;  %v3162_v33 = vadd.f32 %v5206_v63, %v7352_v41  ;;  %v6010_v45 = vld [vmem:[#allocation12 + $0x38] sm:$0xff]  }
 0x326   : > { %5713 = vmatprep.subr.bf16.mxu0 %v6010_v45 }
 0x327   : > { %v7494_v17 = vadd.f32 %v5318_v62, %v3162_v33  ;;  %v5207_v23 = vpop.f32.mrb[72].mxu1  ;;  %5714 = vmatpush3.bf16.msra.mxu0 %v6010_v45 }
 0x328   : > { %v5208_v48 = vpop.f32.mrb[73].mxu1 }
 0x329   : > { %v5319_v43 = vpop.f32.mrb[72].mxu0  ;;  %v5209_v53 = vadd.f32 %v5208_v48, %v5207_v23  ;;  %v5210_v6 = vpop.f32.mrb[74].mxu1 }
 0x32a   : > { %v5320_v5 = vpop.f32.mrb[73].mxu0  ;;  %v5211_v58 = vpop.f32.mrb[75].mxu1 }
 0x32b   : > { %v5321_v55 = vadd.f32 %v5320_v5, %v5319_v43  ;;  %v5322_v60 = vpop.f32.mrb[74].mxu0  ;;  %v3167_v21 = vadd.f32 %v5209_v53, %v7352_v41  ;;  %v5212_v3 = vadd.f32 %v5211_v58, %v5210_v6 }
 0x32c   : > { %v5323_v27 = vpop.f32.mrb[75].mxu0 }
 0x32d   : > { %v5324_v49 = vadd.f32 %v5323_v27, %v5322_v60  ;;  %v7497_v30 = vadd.f32 %v5321_v55, %v3167_v21  ;;  %v3170_v42 = vadd.f32 %v5212_v3, %v7352_v41 }
 0x32f   : > { %v7500_v46 = vadd.f32 %v5324_v49, %v3170_v42  ;;  %v5213_v14 = vpop.f32.mrb[76].mxu1 }
 0x330   : > { %v5214_v39 = vpop.f32.mrb[77].mxu1 }
 0x331   : > { %v5325_v19 = vpop.f32.mrb[76].mxu0  ;;  %v5215_v1 = vadd.f32 %v5214_v39, %v5213_v14  ;;  %v5216_v54 = vpop.f32.mrb[78].mxu1 }
 0x332   : > { %v5326_v22 = vpop.f32.mrb[77].mxu0  ;;  %v5217_v18 = vpop.f32.mrb[79].mxu1 }
 0x333   : > { %v5327_v28 = vadd.f32 %v5326_v22, %v5325_v19  ;;  %v5328_v38 = vpop.f32.mrb[78].mxu0  ;;  %v3175_v9 = vadd.f32 %v5215_v1, %v7352_v41  ;;  %v5218_v34 = vadd.f32 %v5217_v18, %v5216_v54 }
 0x334   : > { %v5329_v35 = vpop.f32.mrb[79].mxu0 }
 0x335   : > { %v5330_v10 = vadd.f32 %v5329_v35, %v5328_v38  ;;  %v7503_v63 = vadd.f32 %v5327_v28, %v3175_v9  ;;  %v3178_v24 = vadd.f32 %v5218_v34, %v7352_v41 }
 0x337   : > { %v7506_v61 = vadd.f32 %v5330_v10, %v3178_v24  ;;  %v5347_v62 = vpop.f32.mrb[80].mxu1 }
 0x338   : > { %v5348_v33 = vpop.f32.mrb[81].mxu1 }
 0x339   : > { %v5349_v23 = vadd.f32 %v5348_v33, %v5347_v62  ;;  %v5459_v48 = vpop.f32.mrb[80].mxu0  ;;  %v5350_v43 = vpop.f32.mrb[82].mxu1 }
 0x33a   : > { %v5460_v53 = vpop.f32.mrb[81].mxu0  ;;  %v5351_v6 = vpop.f32.mrb[83].mxu1 }
 0x33b   : > { %v3377_v5 = vadd.f32 %v5349_v23, %v7362_v0  ;;  %v5461_v55 = vadd.f32 %v5460_v53, %v5459_v48  ;;  %v5352_v58 = vadd.f32 %v5351_v6, %v5350_v43  ;;  %v5462_v60 = vpop.f32.mrb[82].mxu0 }
 0x33c   : > { %v5463_v21 = vpop.f32.mrb[83].mxu0 }
 0x33d   : > { %v3380_v3 = vadd.f32 %v5352_v58, %v7364_v59  ;;  %v5464_v41 = vadd.f32 %v5463_v21, %v5462_v60  ;;  %v7510_v27 = vadd.f32 %v5461_v55, %v3377_v5 }
 0x33f   : > { %v5353_v49 = vpop.f32.mrb[84].mxu1  ;;  %v7512_v42 = vadd.f32 %v5464_v41, %v3380_v3 }
 0x340   : > { %v5354_v14 = vpop.f32.mrb[85].mxu1 }
 0x341   : > { %v5355_v39 = vadd.f32 %v5354_v14, %v5353_v49  ;;  %v5465_v19 = vpop.f32.mrb[84].mxu0  ;;  %v5356_v1 = vpop.f32.mrb[86].mxu1 }
 0x342   : > { %v5466_v54 = vpop.f32.mrb[85].mxu0  ;;  %v5357_v22 = vpop.f32.mrb[87].mxu1 }
 0x343   : > { %v3385_v0 = vadd.f32 %v5355_v39, %v7377_v25  ;;  %v5467_v28 = vadd.f32 %v5466_v54, %v5465_v19  ;;  %v5358_v18 = vadd.f32 %v5357_v22, %v5356_v1  ;;  %v5468_v38 = vpop.f32.mrb[86].mxu0 }
 0x344   : > { %v5469_v9 = vpop.f32.mrb[87].mxu0 }
 0x345   : > { %v3388_v59 = vadd.f32 %v5358_v18, %v7384_v32  ;;  %v5470_v34 = vadd.f32 %v5469_v9, %v5468_v38  ;;  %v7516_v35 = vadd.f32 %v5467_v28, %v3385_v0 }
 0x347   : > { %v5359_v45 = vpop.f32.mrb[88].mxu1  ;;  %v7518_v10 = vadd.f32 %v5470_v34, %v3388_v59 }
 0x348   : > { %v5360_v24 = vpop.f32.mrb[89].mxu1 }
 0x349   : > { %v5361_v62 = vadd.f32 %v5360_v24, %v5359_v45  ;;  %v5471_v33 = vpop.f32.mrb[88].mxu0  ;;  %v5362_v23 = vpop.f32.mrb[90].mxu1 }
 0x34a   : > { %v5472_v48 = vpop.f32.mrb[89].mxu0  ;;  %v5363_v43 = vpop.f32.mrb[91].mxu1 }
 0x34b   : > { %v3393_v25 = vadd.f32 %v5361_v62, %v7394_v4  ;;  %v5473_v53 = vadd.f32 %v5472_v48, %v5471_v33  ;;  %v5364_v6 = vadd.f32 %v5363_v43, %v5362_v23  ;;  %v5474_v5 = vpop.f32.mrb[90].mxu0 }
 0x34c   : > { %v5475_v55 = vpop.f32.mrb[91].mxu0 }
 0x34d   : > { %v3396_v32 = vadd.f32 %v5364_v6, %v7400_v51  ;;  %v5476_v58 = vadd.f32 %v5475_v55, %v5474_v5  ;;  %v7522_v60 = vadd.f32 %v5473_v53, %v3393_v25 }
 0x34f   : > { %v5365_v21 = vpop.f32.mrb[92].mxu1  ;;  %v7524_v3 = vadd.f32 %v5476_v58, %v3396_v32 }
 0x350   : > { %v5366_v41 = vpop.f32.mrb[93].mxu1 }
 0x351   : > { %v5367_v49 = vadd.f32 %v5366_v41, %v5365_v21  ;;  %v5477_v14 = vpop.f32.mrb[92].mxu0  ;;  %v5368_v39 = vpop.f32.mrb[94].mxu1 }
 0x352   : > { %v5478_v19 = vpop.f32.mrb[93].mxu0  ;;  %v5369_v1 = vpop.f32.mrb[95].mxu1 }
 0x353   : > { %v3401_v4 = vadd.f32 %v5367_v49, %v7410_v57  ;;  %v5479_v54 = vadd.f32 %v5478_v19, %v5477_v14  ;;  %v5370_v22 = vadd.f32 %v5369_v1, %v5368_v39  ;;  %v5480_v0 = vpop.f32.mrb[94].mxu0 }
 0x354   : > { %v5481_v28 = vpop.f32.mrb[95].mxu0 }
 0x355   : > { %v3404_v51 = vadd.f32 %v5370_v22, %v7415_v36  ;;  %v5482_v18 = vadd.f32 %v5481_v28, %v5480_v0  ;;  %v7528_v38 = vadd.f32 %v5479_v54, %v3401_v4 }
 0x357   : > { %v5371_v9 = vpop.f32.mrb[96].mxu1  ;;  %v7530_v59 = vadd.f32 %v5482_v18, %v3404_v51 }
 0x358   : > { %v5372_v34 = vpop.f32.mrb[97].mxu1 }
 0x359   : > { %v5373_v45 = vadd.f32 %v5372_v34, %v5371_v9  ;;  %v5483_v24 = vpop.f32.mrb[96].mxu0  ;;  %v5374_v62 = vpop.f32.mrb[98].mxu1 }
 0x35a   : > { %v5484_v33 = vpop.f32.mrb[97].mxu0  ;;  %v5375_v23 = vpop.f32.mrb[99].mxu1 }
 0x35b   : > { %v3409_v57 = vadd.f32 %v5373_v45, %v7418_v12  ;;  %v5485_v48 = vadd.f32 %v5484_v33, %v5483_v24  ;;  %v5376_v43 = vadd.f32 %v5375_v23, %v5374_v62  ;;  %v5486_v25 = vpop.f32.mrb[98].mxu0 }
 0x35c   : > { %v5487_v53 = vpop.f32.mrb[99].mxu0 }
 0x35d   : > { %v3412_v36 = vadd.f32 %v5376_v43, %v7423_v16  ;;  %v5488_v6 = vadd.f32 %v5487_v53, %v5486_v25  ;;  %v7534_v5 = vadd.f32 %v5485_v48, %v3409_v57 }
 0x35f   : > { %v5377_v55 = vpop.f32.mrb[100].mxu1  ;;  %v7536_v32 = vadd.f32 %v5488_v6, %v3412_v36 }
 0x360   : > { %v5378_v58 = vpop.f32.mrb[101].mxu1 }
 0x361   : > { %v5379_v21 = vadd.f32 %v5378_v58, %v5377_v55  ;;  %v5489_v41 = vpop.f32.mrb[100].mxu0  ;;  %v5380_v49 = vpop.f32.mrb[102].mxu1 }
 0x362   : > { %v5490_v14 = vpop.f32.mrb[101].mxu0  ;;  %v5381_v39 = vpop.f32.mrb[103].mxu1 }
 0x363   : > { %v3417_v12 = vadd.f32 %v5379_v21, %v7427_v31  ;;  %v5491_v19 = vadd.f32 %v5490_v14, %v5489_v41  ;;  %v5382_v1 = vadd.f32 %v5381_v39, %v5380_v49  ;;  %v5492_v4 = vpop.f32.mrb[102].mxu0 }
 0x364   : > { %v5493_v54 = vpop.f32.mrb[103].mxu0 }
 0x365   : > { %v3420_v16 = vadd.f32 %v5382_v1, %v7431_v50  ;;  %v5494_v22 = vadd.f32 %v5493_v54, %v5492_v4  ;;  %v7540_v0 = vadd.f32 %v5491_v19, %v3417_v12 }
 0x367   : > { %v5383_v28 = vpop.f32.mrb[104].mxu1  ;;  %v7542_v51 = vadd.f32 %v5494_v22, %v3420_v16 }
 0x368   : > { %v5384_v18 = vpop.f32.mrb[105].mxu1 }
 0x369   : > { %v5385_v9 = vadd.f32 %v5384_v18, %v5383_v28  ;;  %v5495_v34 = vpop.f32.mrb[104].mxu0  ;;  %v5386_v45 = vpop.f32.mrb[106].mxu1 }
 0x36a   : > { %v5496_v24 = vpop.f32.mrb[105].mxu0  ;;  %v5387_v62 = vpop.f32.mrb[107].mxu1 }
 0x36b   : > { %v3425_v31 = vadd.f32 %v5385_v9, %v7435_v47  ;;  %v5497_v33 = vadd.f32 %v5496_v24, %v5495_v34  ;;  %v5388_v23 = vadd.f32 %v5387_v62, %v5386_v45  ;;  %v5498_v57 = vpop.f32.mrb[106].mxu0 }
 0x36c   : > { %v5499_v48 = vpop.f32.mrb[107].mxu0 }
 0x36d   : > { %v3428_v50 = vadd.f32 %v5388_v23, %v7439_v11  ;;  %v5500_v43 = vadd.f32 %v5499_v48, %v5498_v57  ;;  %v7546_v25 = vadd.f32 %v5497_v33, %v3425_v31 }
 0x36f   : > { %v5389_v53 = vpop.f32.mrb[108].mxu1  ;;  %v7548_v36 = vadd.f32 %v5500_v43, %v3428_v50 }
 0x370   : > { %v5390_v6 = vpop.f32.mrb[109].mxu1 }
 0x371   : > { %v5391_v55 = vadd.f32 %v5390_v6, %v5389_v53  ;;  %v5501_v58 = vpop.f32.mrb[108].mxu0  ;;  %v5392_v21 = vpop.f32.mrb[110].mxu1 }
 0x372   : > { %v5502_v41 = vpop.f32.mrb[109].mxu0  ;;  %v5393_v49 = vpop.f32.mrb[111].mxu1 }
 0x373   : > { %v3433_v47 = vadd.f32 %v5391_v55, %v7443_v29  ;;  %v5503_v14 = vadd.f32 %v5502_v41, %v5501_v58  ;;  %v5394_v39 = vadd.f32 %v5393_v49, %v5392_v21  ;;  %v5504_v12 = vpop.f32.mrb[110].mxu0 }
 0x374   : > { %v5505_v19 = vpop.f32.mrb[111].mxu0 }
 0x375   : > { %v3436_v11 = vadd.f32 %v5394_v39, %v7447_v7  ;;  %v5506_v1 = vadd.f32 %v5505_v19, %v5504_v12  ;;  %v7552_v4 = vadd.f32 %v5503_v14, %v3433_v47 }
 0x377   : > { %v5395_v54 = vpop.f32.mrb[112].mxu1  ;;  %v7554_v16 = vadd.f32 %v5506_v1, %v3436_v11 }
 0x378   : > { %v5396_v22 = vpop.f32.mrb[113].mxu1 }
 0x379   : > { %v5397_v28 = vadd.f32 %v5396_v22, %v5395_v54  ;;  %v5507_v18 = vpop.f32.mrb[112].mxu0  ;;  %v5398_v9 = vpop.f32.mrb[114].mxu1 }
 0x37a   : > { %v5508_v34 = vpop.f32.mrb[113].mxu0  ;;  %v5399_v45 = vpop.f32.mrb[115].mxu1 }
 0x37b   : > { %v3441_v29 = vadd.f32 %v5397_v28, %v7451_v52  ;;  %v5509_v24 = vadd.f32 %v5508_v34, %v5507_v18  ;;  %v5400_v62 = vadd.f32 %v5399_v45, %v5398_v9  ;;  %v5510_v31 = vpop.f32.mrb[114].mxu0 }
 0x37c   : > { %v5511_v33 = vpop.f32.mrb[115].mxu0 }
 0x37d   : > { %v3444_v7 = vadd.f32 %v5400_v62, %v7455_v20  ;;  %v5512_v23 = vadd.f32 %v5511_v33, %v5510_v31  ;;  %v7558_v57 = vadd.f32 %v5509_v24, %v3441_v29 }
 0x37f   : > { %v5401_v48 = vpop.f32.mrb[116].mxu1  ;;  %v7560_v50 = vadd.f32 %v5512_v23, %v3444_v7 }
 0x380   : > { %v5402_v43 = vpop.f32.mrb[117].mxu1 }
 0x381   : > { %v5403_v53 = vadd.f32 %v5402_v43, %v5401_v48  ;;  %v5513_v6 = vpop.f32.mrb[116].mxu0  ;;  %v5404_v55 = vpop.f32.mrb[118].mxu1 }
 0x382   : > { %v5514_v58 = vpop.f32.mrb[117].mxu0  ;;  %v5405_v21 = vpop.f32.mrb[119].mxu1 }
 0x383   : > { %v3449_v52 = vadd.f32 %v5403_v53, %v7459_v40  ;;  %v5515_v41 = vadd.f32 %v5514_v58, %v5513_v6  ;;  %v5406_v49 = vadd.f32 %v5405_v21, %v5404_v55  ;;  %v5516_v47 = vpop.f32.mrb[118].mxu0 }
 0x384   : > { %v5517_v14 = vpop.f32.mrb[119].mxu0 }
 0x385   : > { %v3452_v20 = vadd.f32 %v5406_v49, %v7463_v13  ;;  %v5518_v39 = vadd.f32 %v5517_v14, %v5516_v47  ;;  %v7564_v12 = vadd.f32 %v5515_v41, %v3449_v52 }
 0x387   : > { %v5407_v19 = vpop.f32.mrb[120].mxu1  ;;  %v7566_v11 = vadd.f32 %v5518_v39, %v3452_v20 }
 0x388   : > { %v5408_v1 = vpop.f32.mrb[121].mxu1 }
 0x389   : > { %v5409_v54 = vadd.f32 %v5408_v1, %v5407_v19  ;;  %v5519_v22 = vpop.f32.mrb[120].mxu0  ;;  %v5410_v28 = vpop.f32.mrb[122].mxu1 }
 0x38a   : > { %v5520_v18 = vpop.f32.mrb[121].mxu0  ;;  %v5411_v9 = vpop.f32.mrb[123].mxu1 }
 0x38b   : > { %v3457_v40 = vadd.f32 %v5409_v54, %v7467_v2  ;;  %v5521_v34 = vadd.f32 %v5520_v18, %v5519_v22  ;;  %v5412_v45 = vadd.f32 %v5411_v9, %v5410_v28  ;;  %v5522_v29 = vpop.f32.mrb[122].mxu0 }
 0x38c   : > { %v5523_v24 = vpop.f32.mrb[123].mxu0 }
 0x38d   : > { %v3460_v13 = vadd.f32 %v5412_v45, %v7471_v37  ;;  %v5524_v62 = vadd.f32 %v5523_v24, %v5522_v29  ;;  %v7570_v31 = vadd.f32 %v5521_v34, %v3457_v40 }
 0x38f   : > { %v5413_v33 = vpop.f32.mrb[124].mxu1  ;;  %v7572_v7 = vadd.f32 %v5524_v62, %v3460_v13 }
 0x390   : > { %v5414_v23 = vpop.f32.mrb[125].mxu1 }
 0x391   : > { %v5415_v48 = vadd.f32 %v5414_v23, %v5413_v33  ;;  %v5525_v43 = vpop.f32.mrb[124].mxu0  ;;  %v5416_v53 = vpop.f32.mrb[126].mxu1 }
 0x392   : > { %v5526_v6 = vpop.f32.mrb[125].mxu0  ;;  %v5417_v55 = vpop.f32.mrb[127].mxu1 }
 0x393   : > { %v3465_v2 = vadd.f32 %v5415_v48, %v7475_v15  ;;  %v5527_v58 = vadd.f32 %v5526_v6, %v5525_v43  ;;  %v5418_v21 = vadd.f32 %v5417_v55, %v5416_v53  ;;  %v5528_v52 = vpop.f32.mrb[126].mxu0 }
 0x394   : > { %v5529_v41 = vpop.f32.mrb[127].mxu0 }
 0x395   : > { %v3468_v37 = vadd.f32 %v5418_v21, %v7481_v44  ;;  %v5530_v49 = vadd.f32 %v5529_v41, %v5528_v52  ;;  %v7576_v47 = vadd.f32 %v5527_v58, %v3465_v2 }
 0x397   : > { %v5419_v14 = vpop.f32.mrb[128].mxu1  ;;  %v7578_v20 = vadd.f32 %v5530_v49, %v3468_v37 }
 0x398   : > { %v5420_v39 = vpop.f32.mrb[129].mxu1 }
 0x399   : > { %v5421_v19 = vadd.f32 %v5420_v39, %v5419_v14  ;;  %v5531_v1 = vpop.f32.mrb[128].mxu0  ;;  %v5422_v54 = vpop.f32.mrb[130].mxu1 }
 0x39a   : > { %v5532_v22 = vpop.f32.mrb[129].mxu0  ;;  %v5423_v28 = vpop.f32.mrb[131].mxu1 }
 0x39b   : > { %v3473_v15 = vadd.f32 %v5421_v19, %v7485_v56  ;;  %v5533_v18 = vadd.f32 %v5532_v22, %v5531_v1  ;;  %v5424_v9 = vadd.f32 %v5423_v28, %v5422_v54  ;;  %v5534_v40 = vpop.f32.mrb[130].mxu0 }
 0x39c   : > { %v5535_v34 = vpop.f32.mrb[131].mxu0 }
 0x39d   : > { %v3476_v44 = vadd.f32 %v5424_v9, %v7488_v26  ;;  %v5536_v45 = vadd.f32 %v5535_v34, %v5534_v40  ;;  %v7582_v29 = vadd.f32 %v5533_v18, %v3473_v15 }
 0x39f   : > { %v5425_v24 = vpop.f32.mrb[132].mxu1  ;;  %v7584_v13 = vadd.f32 %v5536_v45, %v3476_v44 }
 0x3a0   : > { %v5426_v62 = vpop.f32.mrb[133].mxu1 }
 0x3a1   : > { %v5427_v33 = vadd.f32 %v5426_v62, %v5425_v24  ;;  %v5537_v23 = vpop.f32.mrb[132].mxu0  ;;  %v5428_v48 = vpop.f32.mrb[134].mxu1 }
 0x3a2   : > { %v5538_v43 = vpop.f32.mrb[133].mxu0  ;;  %v5429_v53 = vpop.f32.mrb[135].mxu1 }
 0x3a3   : > { %v3481_v56 = vadd.f32 %v5427_v33, %v7491_v8  ;;  %v5539_v6 = vadd.f32 %v5538_v43, %v5537_v23  ;;  %v5430_v55 = vadd.f32 %v5429_v53, %v5428_v48  ;;  %v5540_v2 = vpop.f32.mrb[134].mxu0 }
 0x3a4   : > { %v5541_v58 = vpop.f32.mrb[135].mxu0 }
 0x3a5   : > { %v3484_v26 = vadd.f32 %v5430_v55, %v7494_v17  ;;  %v5542_v21 = vadd.f32 %v5541_v58, %v5540_v2  ;;  %v7588_v52 = vadd.f32 %v5539_v6, %v3481_v56 }
 0x3a7   : > { %v5431_v41 = vpop.f32.mrb[136].mxu1  ;;  %v7590_v37 = vadd.f32 %v5542_v21, %v3484_v26 }
 0x3a8   : > { %v5432_v49 = vpop.f32.mrb[137].mxu1 }
 0x3a9   : > { %v5433_v14 = vadd.f32 %v5432_v49, %v5431_v41  ;;  %v5543_v39 = vpop.f32.mrb[136].mxu0  ;;  %v5434_v19 = vpop.f32.mrb[138].mxu1 }
 0x3aa   : > { %v5544_v1 = vpop.f32.mrb[137].mxu0  ;;  %v5435_v54 = vpop.f32.mrb[139].mxu1 }
 0x3ab   : > { %v3489_v8 = vadd.f32 %v5433_v14, %v7497_v30  ;;  %v5545_v22 = vadd.f32 %v5544_v1, %v5543_v39  ;;  %v5436_v28 = vadd.f32 %v5435_v54, %v5434_v19  ;;  %v5546_v15 = vpop.f32.mrb[138].mxu0 }
 0x3ac   : > { %v5547_v18 = vpop.f32.mrb[139].mxu0 }
 0x3ad   : > { %v3492_v17 = vadd.f32 %v5436_v28, %v7500_v46  ;;  %v5548_v9 = vadd.f32 %v5547_v18, %v5546_v15  ;;  %v7594_v40 = vadd.f32 %v5545_v22, %v3489_v8 }
 0x3af   : > { %v5437_v34 = vpop.f32.mrb[140].mxu1  ;;  %v7596_v44 = vadd.f32 %v5548_v9, %v3492_v17 }
 0x3b0   : > { %v5438_v45 = vpop.f32.mrb[141].mxu1 }
 0x3b1   : > { %v5439_v24 = vadd.f32 %v5438_v45, %v5437_v34  ;;  %v5440_v62 = vpop.f32.mrb[142].mxu1  ;;  %v5549_v33 = vpop.f32.mrb[140].mxu0 }
 0x3b2   : > { %v5441_v23 = vpop.f32.mrb[143].mxu1  ;;  %v5550_v48 = vpop.f32.mrb[141].mxu0 }
 0x3b3   : > { %v3497_v30 = vadd.f32 %v5439_v24, %v7503_v63  ;;  %v5442_v43 = vadd.f32 %v5441_v23, %v5440_v62  ;;  %v5551_v53 = vadd.f32 %v5550_v48, %v5549_v33  ;;  %v5552_v56 = vpop.f32.mrb[142].mxu0 }
 0x3b4   : > { %v5553_v6 = vpop.f32.mrb[143].mxu0 }
 0x3b5   : > { %v3500_v46 = vadd.f32 %v5442_v43, %v7506_v61  ;;  %v5554_v55 = vadd.f32 %v5553_v6, %v5552_v56  ;;  %v7600_v2 = vadd.f32 %v5551_v53, %v3497_v30 }
 0x3b7   : > { %v5669_v58 = vpop.f32.mrb[144].mxu1  ;;  %v7602_v26 = vadd.f32 %v5554_v55, %v3500_v46 }
 0x3b8   : > { %v3707_v21 = vadd.f32 %v5669_v58, %v7516_v35  ;;  %v3698_v41 = vpop.f32.mrb[145].mxu1 }
 0x3b9   : > { %v3699_v49 = vadd.f32 %v3698_v41, %v7510_v27  ;;  %v5670_v14 = vpop.f32.mrb[146].mxu1 }
 0x3ba   : > { %v3710_v63 = vadd.f32 %v5670_v14, %v7518_v10  ;;  %v3701_v39 = vpop.f32.mrb[147].mxu1  ;;  %v3827_v1 = vmax.f32 %v3707_v21, 0.0 }
 0x3bb   : > { %v3702_v19 = vadd.f32 %v3701_v39, %v7512_v42  ;;  %v3825_v61 = vmax.f32 %v3699_v49, 0.0 }
 0x3bc   : > { %v3828_v54 = vmax.f32 %v3710_v63, 0.0 }
 0x3bd   : > { %v3826_v8 = vmax.f32 %v3702_v19, 0.0 }
 0x3be   : > { %v3858_v22 = vpack.c.bf16 %v3828_v54, %v3827_v1 }
 0x3bf   : > { %v3857_v28 = vpack.c.bf16 %v3826_v8, %v3825_v61  ;;  %v5673_v15 = vpop.f32.mrb[148].mxu1 }
 0x3c0   : > { %v3723_v18 = vadd.f32 %v5673_v15, %v7528_v38  ;;  %v3714_v17 = vpop.f32.mrb[149].mxu1 }
 0x3c1   : > { %v3715_v35 = vadd.f32 %v3714_v17, %v7522_v60  ;;  %v5674_v9 = vpop.f32.mrb[150].mxu1  ;;  %5715 = vmatprep.mubr.bf16.mxu0 %v3857_v28 }
 0x3c2   : > { %v3726_v27 = vadd.f32 %v5674_v9, %v7530_v59  ;;  %v3717_v10 = vpop.f32.mrb[151].mxu1  ;;  %5716 = vmatmul.mubr.bf16.vlgmr.msra.gmra.mrb[144].mxu0 %v3858_v22  ;;  %v3831_v34 = vmax.f32 %v3723_v18, 0.0 }
 0x3c3   : > { %v3718_v42 = vadd.f32 %v3717_v10, %v7524_v3  ;;  %v3829_v24 = vmax.f32 %v3715_v35, 0.0 }
 0x3c4   : > { %v3832_v45 = vmax.f32 %v3726_v27, 0.0 }
 0x3c5   : > { %v3830_v62 = vmax.f32 %v3718_v42, 0.0 }
 0x3c6   : > { %v3860_v33 = vpack.c.bf16 %v3832_v45, %v3831_v34 }
 0x3c7   : > { %v3859_v23 = vpack.c.bf16 %v3830_v62, %v3829_v24  ;;  %v5677_v48 = vpop.f32.mrb[152].mxu1 }
 0x3c8   : > { %v3739_v38 = vadd.f32 %v5677_v48, %v7540_v0  ;;  %v3730_v30 = vpop.f32.mrb[153].mxu1 }
 0x3c9   : > { %v3731_v60 = vadd.f32 %v3730_v30, %v7534_v5  ;;  %v5678_v43 = vpop.f32.mrb[154].mxu1  ;;  %5719 = vmatprep.mubr.bf16.mxu0 %v3859_v23 }
 0x3ca   : > { %v3742_v59 = vadd.f32 %v5678_v43, %v7542_v51  ;;  %v3733_v53 = vpop.f32.mrb[155].mxu1  ;;  %5720 = vmatmul.mubr.bf16.gmra.mrb[148].mxu0 %v3860_v33  ;;  %v3835_v56 = vmax.f32 %v3739_v38, 0.0 }
 0x3cb   : > { %v3734_v3 = vadd.f32 %v3733_v53, %v7536_v32  ;;  %v3833_v46 = vmax.f32 %v3731_v60, 0.0 }
 0x3cc   : > { %v3836_v6 = vmax.f32 %v3742_v59, 0.0 }
 0x3cd   : > { %v3834_v55 = vmax.f32 %v3734_v3, 0.0 }
 0x3ce   : > { %v3862_v58 = vpack.c.bf16 %v3836_v6, %v3835_v56 }
 0x3cf   : > { %v3861_v21 = vpack.c.bf16 %v3834_v55, %v3833_v46  ;;  %v5681_v41 = vpop.f32.mrb[156].mxu1 }
 0x3d0   : > { %v3755_v0 = vadd.f32 %v5681_v41, %v7552_v4  ;;  %v3746_v49 = vpop.f32.mrb[157].mxu1 }
 0x3d1   : > { %v3747_v5 = vadd.f32 %v3746_v49, %v7546_v25  ;;  %v5682_v14 = vpop.f32.mrb[158].mxu1  ;;  %5723 = vmatprep.mubr.bf16.mxu0 %v3861_v21 }
 0x3d2   : > { %v3758_v51 = vadd.f32 %v5682_v14, %v7554_v16  ;;  %v3749_v63 = vpop.f32.mrb[159].mxu1  ;;  %5724 = vmatmul.mubr.bf16.gmra.mrb[152].mxu0 %v3862_v58  ;;  %v3839_v39 = vmax.f32 %v3755_v0, 0.0 }
 0x3d3   : > { %v3750_v32 = vadd.f32 %v3749_v63, %v7548_v36  ;;  %v3837_v1 = vmax.f32 %v3747_v5, 0.0 }
 0x3d4   : > { %v3840_v19 = vmax.f32 %v3758_v51, 0.0 }
 0x3d5   : > { %v3838_v54 = vmax.f32 %v3750_v32, 0.0 }
 0x3d6   : > { %v3864_v61 = vpack.c.bf16 %v3840_v19, %v3839_v39 }
 0x3d7   : > { %v3863_v8 = vpack.c.bf16 %v3838_v54, %v3837_v1  ;;  %v5685_v22 = vpop.f32.mrb[160].mxu1  ;;  %v4909_v1 = vld [vmem:[%s6662_s21] sm:$0xff]  }
 0x3d8   : > { %v3771_v4 = vadd.f32 %v5685_v22, %v7564_v12  ;;  %v3762_v28 = vpop.f32.mrb[161].mxu1 }
 0x3d9   : > { %v3763_v25 = vadd.f32 %v3762_v28, %v7558_v57  ;;  %v5686_v15 = vpop.f32.mrb[162].mxu1  ;;  %5727 = vmatprep.mubr.bf16.mxu0 %v3863_v8 }
 0x3da   : > { %v3774_v16 = vadd.f32 %v5686_v15, %v7566_v11  ;;  %v3765_v18 = vpop.f32.mrb[163].mxu1  ;;  %5728 = vmatmul.mubr.bf16.gmra.mrb[156].mxu0 %v3864_v61  ;;  %v3843_v17 = vmax.f32 %v3771_v4, 0.0 }
 0x3db   : > { %v3766_v36 = vadd.f32 %v3765_v18, %v7560_v50  ;;  %v3841_v9 = vmax.f32 %v3763_v25, 0.0  ;;  %v4911_v25 = vunpack.c.h.bf16 %v4909_v1 }
 0x3dc   : > { %v3844_v35 = vmax.f32 %v3774_v16, 0.0 }
 0x3dd   : > { %v3842_v27 = vmax.f32 %v3766_v36, 0.0 }
 0x3de   : > { %v3866_v10 = vpack.c.bf16 %v3844_v35, %v3843_v17  ;;  %v5055_v35 = vld [vmem:[%s6662_s21 + $0x18] sm:$0xff]  }
 0x3df   : > { %v3865_v42 = vpack.c.bf16 %v3842_v27, %v3841_v9  ;;  %v5689_v34 = vpop.f32.mrb[164].mxu1  ;;  %v5054_v27 = vld [vmem:[%s6662_s21 + $0x10] sm:$0xff]  }
 0x3e0   : > { %v3787_v12 = vadd.f32 %v5689_v34, %v7576_v47  ;;  %v3778_v45 = vpop.f32.mrb[165].mxu1 }
 0x3e1   : > { %v3779_v57 = vadd.f32 %v3778_v45, %v7570_v31  ;;  %v5690_v24 = vpop.f32.mrb[166].mxu1  ;;  %5731 = vmatprep.mubr.bf16.mxu0 %v3865_v42 }
 0x3e2   : > { %v3790_v11 = vadd.f32 %v5690_v24, %v7578_v20  ;;  %v3781_v62 = vpop.f32.mrb[167].mxu1  ;;  %5732 = vmatmul.mubr.bf16.gmra.mrb[160].mxu0 %v3866_v10  ;;  %v3847_v33 = vmax.f32 %v3787_v12, 0.0  ;;  %v4922_v12 = vunpack.c.l.bf16 %v5055_v35 }
 0x3e3   : > { %v3782_v50 = vadd.f32 %v3781_v62, %v7572_v7  ;;  %v3845_v48 = vmax.f32 %v3779_v57, 0.0 }
 0x3e4   : > { %v3848_v23 = vmax.f32 %v3790_v11, 0.0  ;;  %v4918_v11 = vunpack.c.l.bf16 %v5054_v27 }
 0x3e5   : > { %v3846_v38 = vmax.f32 %v3782_v50, 0.0 }
 0x3e6   : > { %v3868_v30 = vpack.c.bf16 %v3848_v23, %v3847_v33  ;;  %v4923_v23 = vunpack.c.h.bf16 %v5055_v35 }
 0x3e7   : > { %v3867_v60 = vpack.c.bf16 %v3846_v38, %v3845_v48  ;;  %v5693_v43 = vpop.f32.mrb[168].mxu1 }
 0x3e8   : > { %v3803_v47 = vadd.f32 %v5693_v43, %v7588_v52  ;;  %v3794_v59 = vpop.f32.mrb[169].mxu1 }
 0x3e9   : > { %v3795_v31 = vadd.f32 %v3794_v59, %v7582_v29  ;;  %v5694_v53 = vpop.f32.mrb[170].mxu1  ;;  %5735 = vmatprep.mubr.bf16.mxu0 %v3867_v60  ;;  %v4919_v60 = vunpack.c.h.bf16 %v5054_v27 }
 0x3ea   : > { %v3806_v20 = vadd.f32 %v5694_v53, %v7590_v37  ;;  %v3797_v3 = vpop.f32.mrb[171].mxu1  ;;  %5736 = vmatmul.mubr.bf16.gmra.mrb[164].mxu0 %v3868_v30  ;;  %v3851_v56 = vmax.f32 %v3803_v47, 0.0 }
 0x3eb   : > { %v3798_v7 = vadd.f32 %v3797_v3, %v7584_v13  ;;  %v3849_v46 = vmax.f32 %v3795_v31, 0.0 }
 0x3ec   : > { %v3852_v6 = vmax.f32 %v3806_v20, 0.0  ;;  %v5057_v20 = vld [vmem:[%s6662_s21 + $0x28] sm:$0xff]  }
 0x3ed   : > { %v3850_v55 = vmax.f32 %v3798_v7, 0.0  ;;  %v5056_v7 = vld [vmem:[%s6662_s21 + $0x20] sm:$0xff]  }
 0x3ee   : > { %v3870_v58 = vpack.c.bf16 %v3852_v6, %v3851_v56 }
 0x3ef   : > { %v3869_v21 = vpack.c.bf16 %v3850_v55, %v3849_v46  ;;  %v5697_v41 = vpop.f32.mrb[172].mxu1  ;;  %v4930_v55 = vunpack.c.l.bf16 %v5057_v20 }
 0x3f0   : > { %v3819_v52 = vadd.f32 %v5697_v41, %v7600_v2  ;;  %v3810_v0 = vpop.f32.mrb[173].mxu1  ;;  %v5053_v2 = vld [vmem:[%s6662_s21 + $0x8] sm:$0xff]  }
 0x3f1   : > { %v3811_v29 = vadd.f32 %v3810_v0, %v7594_v40  ;;  %v5698_v49 = vpop.f32.mrb[174].mxu1  ;;  %5739 = vmatprep.mubr.bf16.mxu0 %v3869_v21  ;;  %v7641_v40 = vld [vmem:[%s7847_s16] ss:$0 sm:$0xff]  ;;  %v4915_v22 = vunpack.c.h.bf16 %v5053_v2 }
 0x3f2   : > { %v3822_v37 = vadd.f32 %v5698_v49, %v7602_v26  ;;  %v3813_v5 = vpop.f32.mrb[175].mxu1  ;;  %5740 = vmatmul.mubr.bf16.gmra.mrb[168].mxu0 %v3870_v58  ;;  %v3855_v14 = vmax.f32 %v3819_v52, 0.0  ;;  %v4914_v26 = vunpack.c.l.bf16 %v5053_v2  ;;  %v4926_v52 = vunpack.c.l.bf16 %v5056_v7 }
 0x3f3   : > { %v3814_v13 = vadd.f32 %v3813_v5, %v7596_v44  ;;  %v3853_v63 = vmax.f32 %v3811_v29, 0.0  ;;  %v4910_v44 = vunpack.c.l.bf16 %v4909_v1  ;;  %v5059_v1 = vld [vmem:[%s6662_s21 + $0x38] sm:$0xff]  }
 0x3f4   : > { %v3856_v51 = vmax.f32 %v3822_v37, 0.0  ;;  %v4931_v37 = vunpack.c.h.bf16 %v5057_v20 }
 0x3f5   : > { %v3854_v32 = vmax.f32 %v3814_v13, 0.0 }
 0x3f6   : > { %v3872_v39 = vpack.c.bf16 %v3856_v51, %v3855_v14  ;;  %v4927_v51 = vunpack.c.h.bf16 %v5056_v7 }
 0x3f7   : > { %v3871_v19 = vpack.c.bf16 %v3854_v32, %v3853_v63 }
 0x3f9   : > { %5743 = vmatprep.mubr.bf16.mxu0 %v3871_v19 }
 0x3fa   : > { %5744 = vmatmul.mubr.bf16.gmra.mrb[172].mxu0 %v3872_v39 }
 0x495   : > { %v5717_v54 = vpop.f32.mrb[144].mxu0 }
 0x496   : > { %v4051_v61 = vadd.f32 %v5717_v54, %v7641_v40  ;;  %v4042_v8 = vpop.f32.mrb[145].mxu0  ;;  %v5058_v54 = vld [vmem:[%s6662_s21 + $0x30] sm:$0xff]  }
 0x497   : > { %v4043_v4 = vadd.f32 %v7641_v40, %v4042_v8  ;;  %v5718_v28 = vpop.f32.mrb[146].mxu0 }
 0x498   : > { %v4171_v15 = vadd.f32 %v4914_v26, %v4051_v61  ;;  %v4054_v16 = vadd.f32 %v5718_v28, %v7641_v40  ;;  %v4045_v18 = vpop.f32.mrb[147].mxu0 }
 0x499   : > { %v4169_v36 = vadd.f32 %v4910_v44, %v4043_v4  ;;  %v4046_v17 = vadd.f32 %v7641_v40, %v4045_v18 }
 0x49a   : > { %v4172_v9 = vadd.f32 %v4915_v22, %v4054_v16  ;;  %v4203_v42 = vmax.f32 %v4171_v15, 0.0  ;;  %v4938_v22 = vunpack.c.l.bf16 %v5059_v1  ;;  %v4934_v15 = vunpack.c.l.bf16 %v5058_v54 }
 0x49b   : > { %v4170_v10 = vadd.f32 %v4911_v25, %v4046_v17  ;;  %v4201_v45 = vmax.f32 %v4169_v36, 0.0  ;;  %v4939_v17 = vunpack.c.h.bf16 %v5059_v1 }
 0x49c   : > { %v4204_v34 = vmax.f32 %v4172_v9, 0.0 }
 0x49d   : > { %v4202_v57 = vmax.f32 %v4170_v10, 0.0  ;;  %v5721_v24 = vpop.f32.mrb[148].mxu0  ;;  %v4935_v10 = vunpack.c.h.bf16 %v5058_v54 }
 0x49e   : > { %v4980_v62 = vpack.c.bf16 %v4204_v34, %v4203_v42  ;;  %v4067_v50 = vadd.f32 %v5721_v24, %v7641_v40  ;;  %v4058_v33 = vpop.f32.mrb[149].mxu0  ;;  %v5061_v24 = vld [vmem:[%s6662_s21 + $0x48] sm:$0xff]  }
 0x49f   : > { %v4975_v48 = vpack.c.bf16 %v4202_v57, %v4201_v45  ;;  %v4059_v38 = vadd.f32 %v7641_v40, %v4058_v33  ;;  %v5722_v30 = vpop.f32.mrb[150].mxu0 }
 0x4a0   : > { %5068 = vst [vmem:[%s7653_s30 + $0x8] sm:$0xff] %v4980_v62   ;;  %v4175_v43 = vadd.f32 %v4922_v12, %v4067_v50  ;;  %v4070_v47 = vadd.f32 %v5722_v30, %v7641_v40  ;;  %v4061_v59 = vpop.f32.mrb[151].mxu0  ;;  %v5060_v62 = vld [vmem:[%s6662_s21 + $0x40] sm:$0xff]  }
 0x4a1   : > { %4976 = vst [vmem:[%s7653_s30] sm:$0xff] %v4975_v48   ;;  %v4173_v31 = vadd.f32 %v4918_v11, %v4059_v38  ;;  %v4062_v53 = vadd.f32 %v7641_v40, %v4061_v59  ;;  %v4946_v48 = vunpack.c.l.bf16 %v5061_v24 }
 0x4a2   : > { %v4176_v3 = vadd.f32 %v4923_v23, %v4070_v47  ;;  %v4207_v6 = vmax.f32 %v4175_v43, 0.0  ;;  %v4942_v43 = vunpack.c.l.bf16 %v5060_v62 }
 0x4a3   : > { %v4174_v56 = vadd.f32 %v4919_v60, %v4062_v53  ;;  %v4205_v58 = vmax.f32 %v4173_v31, 0.0  ;;  %v4947_v53 = vunpack.c.h.bf16 %v5061_v24 }
 0x4a4   : > { %v4208_v46 = vmax.f32 %v4176_v3, 0.0 }
 0x4a5   : > { %v4206_v21 = vmax.f32 %v4174_v56, 0.0  ;;  %v5725_v41 = vpop.f32.mrb[152].mxu0  ;;  %v4943_v56 = vunpack.c.h.bf16 %v5060_v62 }
 0x4a6   : > { %v4990_v0 = vpack.c.bf16 %v4208_v46, %v4207_v6  ;;  %v4083_v29 = vadd.f32 %v5725_v41, %v7641_v40  ;;  %v4074_v49 = vpop.f32.mrb[153].mxu0  ;;  %v5063_v41 = vld [vmem:[%s6662_s21 + $0x58] sm:$0xff]  }
 0x4a7   : > { %v4985_v5 = vpack.c.bf16 %v4206_v21, %v4205_v58  ;;  %v4075_v13 = vadd.f32 %v7641_v40, %v4074_v49  ;;  %v5726_v14 = vpop.f32.mrb[154].mxu0 }
 0x4a8   : > { %5070 = vst [vmem:[%s7653_s30 + $0x18] sm:$0xff] %v4990_v0   ;;  %v4179_v63 = vadd.f32 %v4930_v55, %v4083_v29  ;;  %v4086_v32 = vadd.f32 %v5726_v14, %v7641_v40  ;;  %v4077_v39 = vpop.f32.mrb[155].mxu0  ;;  %v5062_v0 = vld [vmem:[%s6662_s21 + $0x50] sm:$0xff]  }
 0x4a9   : > { %5069 = vst [vmem:[%s7653_s30 + $0x10] sm:$0xff] %v4985_v5   ;;  %v4177_v19 = vadd.f32 %v4926_v52, %v4075_v13  ;;  %v4078_v2 = vadd.f32 %v7641_v40, %v4077_v39  ;;  %v4954_v5 = vunpack.c.l.bf16 %v5063_v41 }
 0x4aa   : > { %v4180_v26 = vadd.f32 %v4931_v37, %v4086_v32  ;;  %v4211_v61 = vmax.f32 %v4179_v63, 0.0  ;;  %v4950_v63 = vunpack.c.l.bf16 %v5062_v0 }
 0x4ab   : > { %v4178_v44 = vadd.f32 %v4927_v51, %v4078_v2  ;;  %v4209_v4 = vmax.f32 %v4177_v19, 0.0  ;;  %v4955_v2 = vunpack.c.h.bf16 %v5063_v41 }
 0x4ac   : > { %v4212_v8 = vmax.f32 %v4180_v26, 0.0 }
 0x4ad   : > { %v4210_v28 = vmax.f32 %v4178_v44, 0.0  ;;  %v5729_v25 = vpop.f32.mrb[156].mxu0  ;;  %v4951_v44 = vunpack.c.h.bf16 %v5062_v0 }
 0x4ae   : > { %v5000_v16 = vpack.c.bf16 %v4212_v8, %v4211_v61  ;;  %v4099_v18 = vadd.f32 %v5729_v25, %v7641_v40  ;;  %v4090_v36 = vpop.f32.mrb[157].mxu0  ;;  %v5065_v25 = vld [vmem:[%s6662_s21 + $0x68] sm:$0xff]  }
 0x4af   : > { %v4995_v35 = vpack.c.bf16 %v4210_v28, %v4209_v4  ;;  %v4091_v9 = vadd.f32 %v7641_v40, %v4090_v36  ;;  %v5730_v27 = vpop.f32.mrb[158].mxu0 }
 0x4b0   : > { %5072 = vst [vmem:[%s7653_s30 + $0x28] sm:$0xff] %v5000_v16   ;;  %v4183_v42 = vadd.f32 %v4938_v22, %v4099_v18  ;;  %v4102_v34 = vadd.f32 %v5730_v27, %v7641_v40  ;;  %v4093_v12 = vpop.f32.mrb[159].mxu0  ;;  %v5064_v16 = vld [vmem:[%s6662_s21 + $0x60] sm:$0xff]  }
 0x4b1   : > { %5071 = vst [vmem:[%s7653_s30 + $0x20] sm:$0xff] %v4995_v35   ;;  %v4181_v45 = vadd.f32 %v4934_v15, %v4091_v9  ;;  %v4094_v57 = vadd.f32 %v7641_v40, %v4093_v12  ;;  %v4962_v35 = vunpack.c.l.bf16 %v5065_v25 }
 0x4b2   : > { %v4184_v11 = vadd.f32 %v4939_v17, %v4102_v34  ;;  %v4215_v33 = vmax.f32 %v4183_v42, 0.0  ;;  %v4958_v42 = vunpack.c.l.bf16 %v5064_v16 }
 0x4b3   : > { %v4182_v50 = vadd.f32 %v4935_v10, %v4094_v57  ;;  %v4213_v38 = vmax.f32 %v4181_v45, 0.0  ;;  %v4963_v57 = vunpack.c.h.bf16 %v5065_v25 }
 0x4b4   : > { %v4216_v23 = vmax.f32 %v4184_v11, 0.0 }
 0x4b5   : > { %v4214_v30 = vmax.f32 %v4182_v50, 0.0  ;;  %v5733_v60 = vpop.f32.mrb[160].mxu0  ;;  %v4959_v50 = vunpack.c.h.bf16 %v5064_v16 }
 0x4b6   : > { %v5010_v47 = vpack.c.bf16 %v4216_v23, %v4215_v33  ;;  %v4115_v59 = vadd.f32 %v5733_v60, %v7641_v40  ;;  %v4106_v31 = vpop.f32.mrb[161].mxu0  ;;  %v5067_v60 = vld [vmem:[%s6662_s21 + $0x78] sm:$0xff]  }
 0x4b7   : > { %v5005_v20 = vpack.c.bf16 %v4214_v30, %v4213_v38  ;;  %v4107_v3 = vadd.f32 %v7641_v40, %v4106_v31  ;;  %v5734_v7 = vpop.f32.mrb[162].mxu0 }
 0x4b8   : > { %5074 = vst [vmem:[%s7653_s30 + $0x38] sm:$0xff] %v5010_v47   ;;  %v4187_v6 = vadd.f32 %v4946_v48, %v4115_v59  ;;  %v4118_v46 = vadd.f32 %v5734_v7, %v7641_v40  ;;  %v4109_v55 = vpop.f32.mrb[163].mxu0  ;;  %v5066_v47 = vld [vmem:[%s6662_s21 + $0x70] sm:$0xff]   ;;  %s6194_s21 = sshll.u32 %s6295_s26, 4  ;;  %s6195_s21 = int_to_ptr.vmem [resolvable:$false] %s6194_s21 }
 0x4b9   : > { %5073 = vst [vmem:[%s7653_s30 + $0x30] sm:$0xff] %v5005_v20   ;;  %v4185_v58 = vadd.f32 %v4942_v43, %v4107_v3  ;;  %v4110_v21 = vadd.f32 %v7641_v40, %v4109_v55  ;;  %v4970_v20 = vunpack.c.l.bf16 %v5067_v60  ;;  %s6196_s15 = scalar_lea.vmem %s6195_s21, 4096  ;;  %p6197_p13 = scmp.lt.s32.totalorder %s7714_s20, %s6195_s21 }
 0x4ba   : > { %v4188_v52 = vadd.f32 %v4947_v53, %v4118_v46  ;;  %v4219_v49 = vmax.f32 %v4187_v6, 0.0  ;;  %v4966_v6 = vunpack.c.l.bf16 %v5066_v47  ;;  %p6198_p5 = scmp.lt.s32.totalorder %s6196_s15, %s6190_s14 }
 0x4bb   : > { %v4186_v29 = vadd.f32 %v4943_v56, %v4110_v21  ;;  %v4217_v13 = vmax.f32 %v4185_v58, 0.0  ;;  %v4971_v21 = vunpack.c.h.bf16 %v5067_v60 }
 0x4bc   : > { %v4220_v37 = vmax.f32 %v4188_v52, 0.0  ;;  %p6199_p3 = por %p6198_p5, %p6197_p13 }
 0x4bd   : > { %v4218_v14 = vmax.f32 %v4186_v29, 0.0  ;;  %v5737_v51 = vpop.f32.mrb[164].mxu0  ;;  %v4967_v29 = vunpack.c.h.bf16 %v5066_v47 }
 0x4be   : > { %v5020_v32 = vpack.c.bf16 %v4220_v37, %v4219_v49  ;;  %v4131_v39 = vadd.f32 %v5737_v51, %v7641_v40  ;;  %v4122_v19 = vpop.f32.mrb[165].mxu0  ;;  %p6200_p6 = pnand %p6199_p3, %p6193_p0 }
 0x4bf   : > { %v5015_v1 = vpack.c.bf16 %v4218_v14, %v4217_v13  ;;  %v4123_v26 = vadd.f32 %v7641_v40, %v4122_v19  ;;  %v5738_v54 = vpop.f32.mrb[166].mxu0 }
 0x4c0   : > { %5076 = vst [vmem:[%s7653_s30 + $0x48] sm:$0xff] %v5020_v32   ;;  %v4191_v61 = vadd.f32 %v4954_v5, %v4131_v39  ;;  %v4134_v8 = vadd.f32 %v5738_v54, %v7641_v40  ;;  %v4125_v22 = vpop.f32.mrb[167].mxu0 }
 0x4c1   : > { %5075 = vst [vmem:[%s7653_s30 + $0x40] sm:$0xff] %v5015_v1   ;;  %v4189_v4 = vadd.f32 %v4950_v63, %v4123_v26  ;;  %v4126_v28 = vadd.f32 %v7641_v40, %v4125_v22 }
 0x4c2   : > { %v4192_v15 = vadd.f32 %v4955_v2, %v4134_v8  ;;  %v4223_v36 = vmax.f32 %v4191_v61, 0.0 }
 0x4c3   : > { %v4190_v18 = vadd.f32 %v4951_v44, %v4126_v28  ;;  %v4221_v9 = vmax.f32 %v4189_v4, 0.0 }
 0x4c4   : > { %v4224_v17 = vmax.f32 %v4192_v15, 0.0 }
 0x4c5   : > { %v4222_v27 = vmax.f32 %v4190_v18, 0.0  ;;  %v5741_v10 = vpop.f32.mrb[168].mxu0 }
 0x4c6   : > { %v5030_v34 = vpack.c.bf16 %v4224_v17, %v4223_v36  ;;  %v4147_v12 = vadd.f32 %v5741_v10, %v7641_v40  ;;  %v4138_v45 = vpop.f32.mrb[169].mxu0 }
 0x4c7   : > { %v5025_v24 = vpack.c.bf16 %v4222_v27, %v4221_v9  ;;  %v4139_v11 = vadd.f32 %v7641_v40, %v4138_v45  ;;  %v5742_v62 = vpop.f32.mrb[170].mxu0 }
 0x4c8   : > { %5078 = vst [vmem:[%s7653_s30 + $0x58] sm:$0xff] %v5030_v34   ;;  %v4195_v33 = vadd.f32 %v4962_v35, %v4147_v12  ;;  %v4150_v23 = vadd.f32 %v5742_v62, %v7641_v40  ;;  %v4141_v48 = vpop.f32.mrb[171].mxu0 }
 0x4c9   : > { %5077 = vst [vmem:[%s7653_s30 + $0x50] sm:$0xff] %v5025_v24   ;;  %v4193_v38 = vadd.f32 %v4958_v42, %v4139_v11  ;;  %v4142_v30 = vadd.f32 %v7641_v40, %v4141_v48 }
 0x4ca   : > { %v4196_v43 = vadd.f32 %v4963_v57, %v4150_v23  ;;  %v4227_v31 = vmax.f32 %v4195_v33, 0.0 }
 0x4cb   : > { %v4194_v59 = vadd.f32 %v4959_v50, %v4142_v30  ;;  %v4225_v3 = vmax.f32 %v4193_v38, 0.0 }
 0x4cc   : > { %v4228_v53 = vmax.f32 %v4196_v43, 0.0 }
 0x4cd   : > { %v4226_v7 = vmax.f32 %v4194_v59, 0.0  ;;  %v5745_v56 = vpop.f32.mrb[172].mxu0 }
 0x4ce   : > { %v5040_v46 = vpack.c.bf16 %v4228_v53, %v4227_v31  ;;  %v4163_v55 = vadd.f32 %v5745_v56, %v7641_v40  ;;  %v4154_v58 = vpop.f32.mrb[173].mxu0 }
 0x4cf   : > { %v5035_v41 = vpack.c.bf16 %v4226_v7, %v4225_v3  ;;  %v4155_v52 = vadd.f32 %v7641_v40, %v4154_v58  ;;  %v5746_v0 = vpop.f32.mrb[174].mxu0 }
 0x4d0   : > { %5080 = vst [vmem:[%s7653_s30 + $0x68] sm:$0xff] %v5040_v46   ;;  %v4199_v49 = vadd.f32 %v4970_v20, %v4163_v55  ;;  %v4166_v37 = vadd.f32 %v5746_v0, %v7641_v40  ;;  %v4157_v5 = vpop.f32.mrb[175].mxu0 }
 0x4d1   : > { %5079 = vst [vmem:[%s7653_s30 + $0x60] sm:$0xff] %v5035_v41   ;;  %v4197_v13 = vadd.f32 %v4966_v6, %v4155_v52  ;;  %v4158_v14 = vadd.f32 %v7641_v40, %v4157_v5 }
 0x4d2   : > { %v4200_v51 = vadd.f32 %v4971_v21, %v4166_v37  ;;  %v4231_v32 = vmax.f32 %v4199_v49, 0.0 }
 0x4d3   : > { %v4198_v63 = vadd.f32 %v4967_v29, %v4158_v14  ;;  %v4229_v19 = vmax.f32 %v4197_v13, 0.0 }
 0x4d4   : > { %v4232_v39 = vmax.f32 %v4200_v51, 0.0 }
 0x4d5   : > { %v4230_v2 = vmax.f32 %v4198_v63, 0.0 }
 0x4d6   : > { %v5050_v1 = vpack.c.bf16 %v4232_v39, %v4231_v32 }
 0x4d7   : > { %v5045_v40 = vpack.c.bf16 %v4230_v2, %v4229_v19 }
 0x4d8   : > { %5082 = vst [vmem:[%s7653_s30 + $0x78] sm:$0xff] %v5050_v1  }
 0x4d9   : > { %5081 = vst [vmem:[%s7653_s30 + $0x70] sm:$0xff] %v5045_v40  }
 0x4da   : > { %6203 = shalt.err (!%p6200_p6)
}
 0x4db   : > { %s6204_s18 = scalar_lea.hbm %s7712_s22, 2048  ;;  %s6208_s1 = scalar_lea.hbm %s7851_s24, 4096 }
 0x4dc   : > { %p6205_p7 = scmp.ne.s32.totalorder %s7712_s22, %s6204_s18  ;;  %p6209_p4 = scmp.lt.u32.totalorder %s7712_s22, %s7851_s24 }
 0x4dd   : > { %p6210_p12 = scmp.lt.u32.totalorder %s6208_s1, %s6204_s18  ;;  %p6212_p11 = scmp.lt.u32.totalorder %s6204_s18, %s7712_s22 }
 0x4de   : > { %p6206_p9 = pnand %p6205_p7, %p7852_p10 }
 0x4df   : > { %p6211_p2 = por %p6210_p12, %p6209_p4 }
 0x4e0   : > { %p6207_p8 = pneg %p6206_p9 }
 0x4e1   : > { %p6213_p1 = por %p6212_p11, %p6211_p2 }
 0x4e3   : > { %p6214_p0 = pnand %p6213_p1, %p6207_p8 }
 0x4e5   : > { %6217 = shalt.err (!%p6214_p0)
}
 0x4e6   : > { %s6296_s3 = smov 64   ;;  %s6297_s16 = smov 4  }
 0x4e7   : > { %5781 = dma.vmem_to_hbm [thread:$0]  (%p7852_p10), %s7714_s20, 2048, %s7712_s22, %s4394_s19, %s6296_s3, %s6296_s3, %s6297_s16  }
 0x4e8 PF: > { %s7853_s30 = sld [smem:[#allocation20_spill]]  ;;  %s7854_s9 = sld [smem:[#allocation26_spill]] }
 0x4e9   : > { %s7855_s27 = sld [smem:[#allocation24_spill]] }
 0x4ee   : > { %s4425_s29 = sand.u32 1, %s7853_s30   ;;  %p7856_p13 = scmp.ne.s32.totalorder %s7854_s9, 0 }
 0x4ef   : > { %p7857_p5 = scmp.ge.s32.totalorder %s7855_s27, 2  ;;  %s4426_s25 = scalar_lea.sflag [#allocation5], %s4425_s29 }
 0x4f1   : > { %p5804_p3 = pnand %p7857_p5, %p7856_p13 }
 0x4f3   : > { %6259 = dma.done.wait (!%p5804_p3), %s4426_s25, 2048  }
 0x4f4   : > { %6261 = vsyncadd (!%p5804_p3), %s4426_s25, 4294965248  ;;  %s30_s14 = sadd.s32 1, %s7855_s27   ;;  %s7858_s11 = sld [smem:[#allocation21_spill]] }
 0x4f5   : > { %p27_p6 = scmp.ge.s32.totalorder %s30_s14, 4   ;;  %s7859_s26 = sld [smem:[#allocation28_spill]] }
 0x4f6   : > { %s7860_s12 = sld [smem:[#allocation23_spill]]  ;;  %s7861_s13 = sld [smem:[#allocation27_spill]] }
 0x4f7   : > { %s7862_s30 = smov %s6268_s10  ;;  %29 = sbr.rel (!%p27_p6) target bundleno = 15 (0xf), region = 156 }
 0x4fa   : > { %s7863_s10 = smov %s7858_s11 }
 0x4fb   : > { %s7864_s11 = smov %s7859_s26 }
 0x4fe   :  { %4431 = vsyncpa [#allocation4], 1 }
 0x4ff   :  { %4433 = vsyncpa [#allocation4 + $0x1], 1 }
 0x500   :  { %4434 = vsyncpa [#allocation7], 1 }
 0x501   :  { %4436 = vsyncpa [#allocation7 + $0x1], 1 }
 0x502   :  { %4437 = vsyncpa [#allocation10], 1 }
 0x503   :  { %4438 = vsyncpa [#allocation13], 1 }
 0x504   :  { %4439 = vsyncpa [#allocation5], 1 }
 0x505   :  { %4441 = vsyncpa [#allocation5 + $0x1], 1 }

</bundles_post_ra>
